<compile_context>
chip_gen: v7x
topology: tpu7x:2x2x1
jax: 0.10.0
libtpu: 0.0.40
codegen_flags: <defaults>
</compile_context>

<pallas_src>
import math
import functools

import jax
import jax.numpy as jnp
from jax import lax
from jax.experimental import pallas as pl
from jax.experimental.pallas import tpu as pltpu

_SUBLANE = 8


def _left_halo(pad):
    # Left halo width inside the padded VMEM scratch, rounded up to a sublane multiple
    # so the per-image interior store is sublane-aligned. The extra zero columns only
    # appear in the once-per-step scratch zero (amortized over Nb images), never in
    # the per-tap window reads.
    return ((pad + _SUBLANE - 1) // _SUBLANE) * _SUBLANE


def _residual_kernel(x_ref, w_ref, b_ref, scale_ref, shift_ref, o_ref, xpad_ref,
                     *, K, H, W, Nb, Hc, approximate_gelu):
    # Per-(batch-block, channel-block) grid point, NHWC with channels on lanes:
    #   x_ref    : (Nb, H, W, Cb)                 input tile (conv source AND residual)
    #   w_ref    : (K, K, Cb)                     depthwise conv weights
    #   b_ref    : (1, Cb)                        conv bias
    #   scale_ref: (1, Cb)                        folded BN scale = gamma / sqrt(var+eps)
    #   shift_ref: (1, Cb)                        folded BN shift = beta - mean * scale
    #   o_ref    : (Nb, H, W, Cb)
    #   xpad_ref : (H + 2*pad, PADL + W + pad, Cb) f32 VMEM halo scratch
    pad = K // 2
    padl = xpad_ref.shape[1] - (W + pad)
    Cb = x_ref.shape[-1]
    f32 = jnp.float32

    # ---- once per grid step (amortized over the Nb images of this block) -----------
    # Bulk-zero the halo scratch. Only the border actually needs to stay zero (the
    # interior is overwritten below for every image); one bulk zero per *step* replaces
    # the old per-image zero + full reload round trip.
    xpad_ref[...] = jnp.zeros(xpad_ref.shape, f32)

    # Hoist per-channel parameter loads/casts out of the unrolled tap loops (JAX does
    # not CSE broadcast_in_dim, so inlining them re-emits a load + broadcast per tap).
    w_f = [[w_ref[dy, dx, :].astype(f32) for dx in range(K)] for dy in range(K)]
    b0 = b_ref[0].astype(f32)
    scale0 = scale_ref[0].astype(f32)
    shift0 = shift_ref[0].astype(f32)

    inv_sqrt2 = 1.0 / math.sqrt(2.0)
    c_gelu = math.sqrt(2.0 / math.pi)

    for n in range(Nb):
        # Copy this image into the scratch interior with sublane-aligned, row-chunked
        # stores (PADL is a multiple of 8, width is the full row). No full-image value
        # is ever materialized, so the copy streams through a few vregs.
        for r0 in range(0, H, Hc):
            hc = min(Hc, H - r0)
            xpad_ref[pad + r0:pad + r0 + hc, padl:padl + W, :] = (
                x_ref[n, r0:r0 + hc, :, :].astype(f32))

        # Depthwise conv + GELU + folded BN + residual, one small row chunk at a time.
        # Live set per chunk: acc (<= ~8 vregs) + one dy row-window + hoisted params —
        # well inside the 64-entry vreg file, so no spills.
        for r0 in range(0, H, Hc):
            hc = min(Hc, H - r0)
            acc = jnp.zeros((hc, W, Cb), f32)
            for dy in range(K):
                # One ref read per (chunk, dy); the W shift per dx is a cheap value
                # slice of that row-window (the padded tile itself is never a value).
                rowwin = xpad_ref[r0 + dy:r0 + dy + hc, :, :]
                for dx in range(K):
                    c0 = padl - pad + dx
                    acc = acc + rowwin[:, c0:c0 + W, :] * w_f[dy][dx]
            acc = acc + b0

            if approximate_gelu:
                # tanh GELU: the transcendental runs on the EUP (its own bundle slot),
                # cutting ~15 VALU ops/element vs the erf polynomial — use on v6e/v7x
                # when bit parity with torch.nn.GELU() is not required.
                inner = c_gelu * (acc + 0.044715 * (acc * acc * acc))
                g = 0.5 * acc * (1.0 + jnp.tanh(inner))
            else:
                # Exact erf GELU (bit parity with torch.nn.GELU() default).
                g = 0.5 * acc * (1.0 + lax.erf(acc * inv_sqrt2))

            y = g * scale0 + shift0
            xres = x_ref[n, r0:r0 + hc, :, :].astype(f32)
            o_ref[n, r0:r0 + hc, :, :] = (xres + y).astype(o_ref.dtype)


def residual_convmixer_nhwc(x_nhwc, w, b, gamma, beta, mean, var, *, eps=1e-5,
                            approximate_gelu=False, donate_input=False):
    """y = x + BN(GELU(DepthwiseConv2d(x)))  — ConvMixer residual branch, NHWC fast path.

    x_nhwc: (N, H, W, C); w: (K, K, C) depthwise weights; b/gamma/beta/mean/var: (C,).
    Keep the surrounding model channels-last to avoid NCHW<->NHWC transposes (each is
    a full HBM pass). Set donate_input=True when the caller no longer needs x.
    """
    N, H, W, C = x_nhwc.shape
    K = w.shape[0]
    assert w.shape == (K, K, C), "depthwise weights must be (K, K, C)"
    assert K % 2 == 1, "padding='same' fold assumes odd depthwise kernels (ConvMixer)"
    pad = K // 2
    padl = _left_halo(pad)

    # Fold inference BatchNorm into per-channel scale/shift (tiny C-length glue math).
    inv_std = 1.0 / jnp.sqrt(var.astype(jnp.float32) + eps)
    scale = (gamma.astype(jnp.float32) * inv_std).reshape(1, C)
    shift = (beta.astype(jnp.float32)
             - mean.astype(jnp.float32) * gamma.astype(jnp.float32) * inv_std).reshape(1, C)
    b2 = b.astype(jnp.float32).reshape(1, C)

    # Channel tiling: lane-dense blocks whenever C allows (real ConvMixer dims are
    # 256/512/768/1024/1536). Lane-dense output stores are the biggest store-path lever.
    if C % 256 == 0:
        cb = 256
    elif C % 128 == 0:
        cb = 128
    else:
        cb = C  # TODO(synk): pad C to a multiple of 128 in the caller for full perf
                # (this fallback produces masked partial stores).
    n_cb = C // cb

    # Batch tiling: block several images per grid step so each step moves ~0.5-2 MiB
    # (amortizes the ~0.35 us/step pipeline overhead); keep >= 2 total grid steps when
    # possible so both v7x TensorCores get work.
    bytes_per_image = H * W * cb * x_nhwc.dtype.itemsize
    nb = 1
    for d in range(1, min(N, 8) + 1):
        if N % d == 0 and d * bytes_per_image <= (2 << 20):
            nb = d
    if nb > 1 and n_cb * (N // nb) < 2:
        nb = max(d for d in range(1, nb) if N % d == 0)
    n_nb = N // nb

    # Row-chunk size: accumulator chunk <= ~8 vregs so acc + one dy row-window + params
    # stay well inside the 64-entry vreg file.
    vregs_per_row = ((W + 7) // 8) * ((cb + 127) // 128)
    Hc = max(1, min(H, 8 // max(1, vregs_per_row)))

    scratch_shape = (H + 2 * pad, padl + W + pad, cb)

    # VMEM budget: double-buffered in + out blocks + scratch + params. Capped at 48 MiB
    # so the same tiling is safe on v7x's 64 MiB VMEM; >= 32 MiB on v5e/v6e.
    blk_bytes = nb * H * W * cb * x_nhwc.dtype.itemsize
    scratch_bytes = scratch_shape[0] * scratch_shape[1] * cb * 4
    params_bytes = 2 * (K * K + 3) * cb * 4
    footprint = 4 * blk_bytes + scratch_bytes + params_bytes
    vmem_limit = int(min(48 * 2 ** 20, max(32 * 2 ** 20, 2 * footprint)))

    kernel = functools.partial(_residual_kernel, K=K, H=H, W=W, Nb=nb, Hc=Hc,
                               approximate_gelu=approximate_gelu)

    return pl.pallas_call(
        kernel,
        out_shape=jax.ShapeDtypeStruct((N, H, W, C), x_nhwc.dtype),
        grid_spec=pltpu.PrefetchScalarGridSpec(
            num_scalar_prefetch=0,
            grid=(n_nb, n_cb),
            in_specs=[
                pl.BlockSpec((nb, H, W, cb), lambda i, c: (i, 0, 0, c)),
                pl.BlockSpec((K, K, cb), lambda i, c: (0, 0, c)),
                pl.BlockSpec((1, cb), lambda i, c: (0, c)),
                pl.BlockSpec((1, cb), lambda i, c: (0, c)),
                pl.BlockSpec((1, cb), lambda i, c: (0, c)),
            ],
            out_specs=pl.BlockSpec((nb, H, W, cb), lambda i, c: (i, 0, 0, c)),
            scratch_shapes=[pltpu.VMEM(scratch_shape, jnp.float32)],
        ),
        compiler_params=pltpu.CompilerParams(
            dimension_semantics=("parallel", "parallel"),
            vmem_limit_bytes=vmem_limit,
        ),
        input_output_aliases=({0: 0} if donate_input else {}),
    )(x_nhwc, w, b2, scale, shift)


def residual_convmixer_nchw(x_nchw, w, b, gamma, beta, mean, var, *, eps=1e-5,
                            approximate_gelu=False, donate_input=False):
    """PyTorch-convention entry point (NCHW in/out).

    Prefer residual_convmixer_nhwc and keep the model channels-last end-to-end; these
    two transposes are full HBM passes done outside the kernel.
    """
    x_nhwc = jnp.transpose(x_nchw, (0, 2, 3, 1))
    out_nhwc = residual_convmixer_nhwc(x_nhwc, w, b, gamma, beta, mean, var, eps=eps,
                                       approximate_gelu=approximate_gelu,
                                       donate_input=donate_input)
    return jnp.transpose(out_nhwc, (0, 3, 1, 2))


def _reference_nchw(x_nchw, w, b, gamma, beta, mean, var, *, eps=1e-5,
                    approximate_gelu=False):
    # Pure-JAX reference for validation (same math, no Pallas).
    x = jnp.transpose(x_nchw, (0, 2, 3, 1)).astype(jnp.float32)
    N, H, W, C = x.shape
    K = w.shape[0]
    pad = K // 2
    xp = jnp.pad(x, ((0, 0), (pad, pad), (pad, pad), (0, 0)))
    acc = jnp.zeros((N, H, W, C), jnp.float32)
    for dy in range(K):
        for dx in range(K):
            acc = acc + xp[:, dy:dy + H, dx:dx + W, :] * w[dy, dx, :].astype(jnp.float32)
    acc = acc + b
    if approximate_gelu:
        inner = math.sqrt(2.0 / math.pi) * (acc + 0.044715 * (acc * acc * acc))
        g = 0.5 * acc * (1.0 + jnp.tanh(inner))
    else:
        g = 0.5 * acc * (1.0 + lax.erf(acc * (1.0 / math.sqrt(2.0))))
    inv_std = 1.0 / jnp.sqrt(var.astype(jnp.float32) + eps)
    y = g * (gamma * inv_std) + (beta - mean * gamma * inv_std)
    out = x + y
    return jnp.transpose(out, (0, 3, 1, 2)).astype(x_nchw.dtype)


def _run_case(key, N, C, H, W, K, approximate_gelu=False):
    kx, kw, kb, kg, kbe, km, kv = jax.random.split(key, 7)
    x = jax.random.normal(kx, (N, C, H, W), dtype=jnp.float32)          # NCHW input
    w = jax.random.normal(kw, (K, K, C), dtype=jnp.float32) * 0.1       # depthwise weights
    b = jax.random.normal(kb, (C,), dtype=jnp.float32) * 0.1            # conv bias
    gamma = 1.0 + 0.1 * jax.random.normal(kg, (C,), dtype=jnp.float32)  # BN weight
    beta = 0.1 * jax.random.normal(kbe, (C,), dtype=jnp.float32)        # BN bias
    mean = 0.1 * jax.random.normal(km, (C,), dtype=jnp.float32)         # BN running_mean
    var = jnp.abs(1.0 + 0.1 * jax.random.normal(kv, (C,), dtype=jnp.float32))  # BN running_var

    out = residual_convmixer_nchw(x, w, b, gamma, beta, mean, var,
                                  approximate_gelu=approximate_gelu)
    out = jax.block_until_ready(out)

    ref = _reference_nchw(x, w, b, gamma, beta, mean, var,
                          approximate_gelu=approximate_gelu)
    assert out.shape == (N, C, H, W)
    assert jnp.allclose(out, ref, atol=1e-4, rtol=1e-4), "mismatch vs reference"


if __name__ == "__main__":
    key = jax.random.PRNGKey(0)
    k1, k2, k3 = jax.random.split(key, 3)

    # Small case: single channel block (cb = C = 32), two batch grid steps.
    _run_case(k1, N=2, C=32, H=16, W=16, K=3)
    # Lane-dense channel block (cb = 256), K = 3 (exact erf GELU, torch parity).
    _run_case(k2, N=2, C=256, H=16, W=16, K=3)
    # Wider halo (K = 5) and the tanh/EUP GELU fast path.
    _run_case(k3, N=2, C=128, H=8, W=8, K=5, approximate_gelu=True)

    print("KERNEL_OK")
</pallas_src>

<mosaic_0001>
module attributes {stable_mosaic.version = 11 : i64} {
  func.func @_residual_kernel(%arg0: i32, %arg1: i32, %arg2: memref<1x16x16x32xf32, #tpu.memory_space<vmem>>, %arg3: memref<3x3x32xf32, #tpu.memory_space<vmem>>, %arg4: memref<1x32xf32, #tpu.memory_space<vmem>>, %arg5: memref<1x32xf32, #tpu.memory_space<vmem>>, %arg6: memref<1x32xf32, #tpu.memory_space<vmem>>, %arg7: memref<1x16x16x32xf32, #tpu.memory_space<vmem>>, %arg8: memref<18x25x32xf32, #tpu.memory_space<vmem>>) attributes {dimension_semantics = [#tpu.dimension_semantics<parallel>, #tpu.dimension_semantics<parallel>], iteration_bounds = array<i64: 2, 1>, scalar_prefetch = 0 : i64, scratch_operands = 1 : i64, tpu.core_type = #tpu.core_type<tc>, window_params = [{transform_indices = @transform_0, window_bounds = array<i64: 1, 16, 16, 32>}, {transform_indices = @transform_1, window_bounds = array<i64: 3, 3, 32>}, {transform_indices = @transform_2, window_bounds = array<i64: 1, 32>}, {transform_indices = @transform_3, window_bounds = array<i64: 1, 32>}, {transform_indices = @transform_4, window_bounds = array<i64: 1, 32>}, {transform_indices = @transform_5, window_bounds = array<i64: 1, 16, 16, 32>}]} {
    %cst = arith.constant 0.000000e+00 : f32
    %0 = vector.broadcast %cst : f32 to vector<18x25x32xf32>
    %c0 = arith.constant 0 : index
    %c0_0 = arith.constant 0 : index
    %c0_1 = arith.constant 0 : index
    %1 = vector.load %arg8[%c0, %c0_0, %c0_1] : memref<18x25x32xf32, #tpu.memory_space<vmem>>, vector<18x25x32xf32>
    tpu.vector_store %arg8[%c0, %c0_0, %c0_1], %0 {strides = array<i32>} : memref<18x25x32xf32, #tpu.memory_space<vmem>>, vector<18x25x32xf32>,
    %c0_2 = arith.constant 0 : index
    %c0_3 = arith.constant 0 : index
    %c0_4 = arith.constant 0 : index
    %2 = vector.load %arg3[%c0_2, %c0_3, %c0_4] : memref<3x3x32xf32, #tpu.memory_space<vmem>>, vector<1x1x32xf32>
    %3 = vector.shape_cast %2 : vector<1x1x32xf32> to vector<32xf32>
    %c0_5 = arith.constant 0 : index
    %c1 = arith.constant 1 : index
    %c0_6 = arith.constant 0 : index
    %4 = vector.load %arg3[%c0_5, %c1, %c0_6] : memref<3x3x32xf32, #tpu.memory_space<vmem>>, vector<1x1x32xf32>
    %5 = vector.shape_cast %4 : vector<1x1x32xf32> to vector<32xf32>
    %c0_7 = arith.constant 0 : index
    %c2 = arith.constant 2 : index
    %c0_8 = arith.constant 0 : index
    %6 = vector.load %arg3[%c0_7, %c2, %c0_8] : memref<3x3x32xf32, #tpu.memory_space<vmem>>, vector<1x1x32xf32>
    %7 = vector.shape_cast %6 : vector<1x1x32xf32> to vector<32xf32>
    %c1_9 = arith.constant 1 : index
    %c0_10 = arith.constant 0 : index
    %c0_11 = arith.constant 0 : index
    %8 = vector.load %arg3[%c1_9, %c0_10, %c0_11] : memref<3x3x32xf32, #tpu.memory_space<vmem>>, vector<1x1x32xf32>
    %9 = vector.shape_cast %8 : vector<1x1x32xf32> to vector<32xf32>
    %c1_12 = arith.constant 1 : index
    %c1_13 = arith.constant 1 : index
    %c0_14 = arith.constant 0 : index
    %10 = vector.load %arg3[%c1_12, %c1_13, %c0_14] : memref<3x3x32xf32, #tpu.memory_space<vmem>>, vector<1x1x32xf32>
    %11 = vector.shape_cast %10 : vector<1x1x32xf32> to vector<32xf32>
    %c1_15 = arith.constant 1 : index
    %c2_16 = arith.constant 2 : index
    %c0_17 = arith.constant 0 : index
    %12 = vector.load %arg3[%c1_15, %c2_16, %c0_17] : memref<3x3x32xf32, #tpu.memory_space<vmem>>, vector<1x1x32xf32>
    %13 = vector.shape_cast %12 : vector<1x1x32xf32> to vector<32xf32>
    %c2_18 = arith.constant 2 : index
    %c0_19 = arith.constant 0 : index
    %c0_20 = arith.constant 0 : index
    %14 = vector.load %arg3[%c2_18, %c0_19, %c0_20] : memref<3x3x32xf32, #tpu.memory_space<vmem>>, vector<1x1x32xf32>
    %15 = vector.shape_cast %14 : vector<1x1x32xf32> to vector<32xf32>
    %c2_21 = arith.constant 2 : index
    %c1_22 = arith.constant 1 : index
    %c0_23 = arith.constant 0 : index
    %16 = vector.load %arg3[%c2_21, %c1_22, %c0_23] : memref<3x3x32xf32, #tpu.memory_space<vmem>>, vector<1x1x32xf32>
    %17 = vector.shape_cast %16 : vector<1x1x32xf32> to vector<32xf32>
    %c2_24 = arith.constant 2 : index
    %c2_25 = arith.constant 2 : index
    %c0_26 = arith.constant 0 : index
    %18 = vector.load %arg3[%c2_24, %c2_25, %c0_26] : memref<3x3x32xf32, #tpu.memory_space<vmem>>, vector<1x1x32xf32>
    %19 = vector.shape_cast %18 : vector<1x1x32xf32> to vector<32xf32>
    %c0_27 = arith.constant 0 : index
    %c0_28 = arith.constant 0 : index
    %20 = vector.load %arg4[%c0_27, %c0_28] : memref<1x32xf32, #tpu.memory_space<vmem>>, vector<1x32xf32>
    %21 = vector.shape_cast %20 : vector<1x32xf32> to vector<32xf32>
    %c0_29 = arith.constant 0 : index
    %c0_30 = arith.constant 0 : index
    %22 = vector.load %arg5[%c0_29, %c0_30] : memref<1x32xf32, #tpu.memory_space<vmem>>, vector<1x32xf32>
    %23 = vector.shape_cast %22 : vector<1x32xf32> to vector<32xf32>
    %c0_31 = arith.constant 0 : index
    %c0_32 = arith.constant 0 : index
    %24 = vector.load %arg6[%c0_31, %c0_32] : memref<1x32xf32, #tpu.memory_space<vmem>>, vector<1x32xf32>
    %25 = vector.shape_cast %24 : vector<1x32xf32> to vector<32xf32>
    %c0_33 = arith.constant 0 : index
    %c0_34 = arith.constant 0 : index
    %c0_35 = arith.constant 0 : index
    %c0_36 = arith.constant 0 : index
    %26 = vector.load %arg2[%c0_33, %c0_34, %c0_35, %c0_36] : memref<1x16x16x32xf32, #tpu.memory_space<vmem>>, vector<1x4x16x32xf32>
    %27 = vector.shape_cast %26 : vector<1x4x16x32xf32> to vector<4x16x32xf32>
    %c1_37 = arith.constant 1 : index
    %c8 = arith.constant 8 : index
    %c0_38 = arith.constant 0 : index
    %28 = vector.load %arg8[%c1_37, %c8, %c0_38] : memref<18x25x32xf32, #tpu.memory_space<vmem>>, vector<4x16x32xf32>
    tpu.vector_store %arg8[%c1_37, %c8, %c0_38], %27 {strides = array<i32>} : memref<18x25x32xf32, #tpu.memory_space<vmem>>, vector<4x16x32xf32>,
    %c0_39 = arith.constant 0 : index
    %c4 = arith.constant 4 : index
    %c0_40 = arith.constant 0 : index
    %c0_41 = arith.constant 0 : index
    %29 = vector.load %arg2[%c0_39, %c4, %c0_40, %c0_41] : memref<1x16x16x32xf32, #tpu.memory_space<vmem>>, vector<1x4x16x32xf32>
    %30 = vector.shape_cast %29 : vector<1x4x16x32xf32> to vector<4x16x32xf32>
    %c5 = arith.constant 5 : index
    %c8_42 = arith.constant 8 : index
    %c0_43 = arith.constant 0 : index
    %31 = vector.load %arg8[%c5, %c8_42, %c0_43] : memref<18x25x32xf32, #tpu.memory_space<vmem>>, vector<4x16x32xf32>
    tpu.vector_store %arg8[%c5, %c8_42, %c0_43], %30 {strides = array<i32>} : memref<18x25x32xf32, #tpu.memory_space<vmem>>, vector<4x16x32xf32>,
    %c0_44 = arith.constant 0 : index
    %c8_45 = arith.constant 8 : index
    %c0_46 = arith.constant 0 : index
    %c0_47 = arith.constant 0 : index
    %32 = vector.load %arg2[%c0_44, %c8_45, %c0_46, %c0_47] : memref<1x16x16x32xf32, #tpu.memory_space<vmem>>, vector<1x4x16x32xf32>
    %33 = vector.shape_cast %32 : vector<1x4x16x32xf32> to vector<4x16x32xf32>
    %c9 = arith.constant 9 : index
    %c8_48 = arith.constant 8 : index
    %c0_49 = arith.constant 0 : index
    %34 = vector.load %arg8[%c9, %c8_48, %c0_49] : memref<18x25x32xf32, #tpu.memory_space<vmem>>, vector<4x16x32xf32>
    tpu.vector_store %arg8[%c9, %c8_48, %c0_49], %33 {strides = array<i32>} : memref<18x25x32xf32, #tpu.memory_space<vmem>>, vector<4x16x32xf32>,
    %c0_50 = arith.constant 0 : index
    %c12 = arith.constant 12 : index
    %c0_51 = arith.constant 0 : index
    %c0_52 = arith.constant 0 : index
    %35 = vector.load %arg2[%c0_50, %c12, %c0_51, %c0_52] : memref<1x16x16x32xf32, #tpu.memory_space<vmem>>, vector<1x4x16x32xf32>
    %36 = vector.shape_cast %35 : vector<1x4x16x32xf32> to vector<4x16x32xf32>
    %c13 = arith.constant 13 : index
    %c8_53 = arith.constant 8 : index
    %c0_54 = arith.constant 0 : index
    %37 = vector.load %arg8[%c13, %c8_53, %c0_54] : memref<18x25x32xf32, #tpu.memory_space<vmem>>, vector<4x16x32xf32>
    tpu.vector_store %arg8[%c13, %c8_53, %c0_54], %36 {strides = array<i32>} : memref<18x25x32xf32, #tpu.memory_space<vmem>>, vector<4x16x32xf32>,
    %cst_55 = arith.constant 0.000000e+00 : f32
    %38 = vector.broadcast %cst_55 : f32 to vector<4x16x32xf32>
    %c0_56 = arith.constant 0 : index
    %c0_57 = arith.constant 0 : index
    %c0_58 = arith.constant 0 : index
    %39 = vector.load %arg8[%c0_56, %c0_57, %c0_58] : memref<18x25x32xf32, #tpu.memory_space<vmem>>, vector<4x25x32xf32>
    %40 = vector.extract_strided_slice %39 {offsets = [0, 7, 0], sizes = [4, 16, 32], strides = [1, 1, 1]} : vector<4x25x32xf32> to vector<4x16x32xf32>
    %41 = vector.shape_cast %3 : vector<32xf32> to vector<1x1x32xf32>
    %42 = vector.broadcast %41 : vector<1x1x32xf32> to vector<4x16x32xf32>
    %43 = arith.mulf %40, %42 : vector<4x16x32xf32>
    %44 = arith.addf %38, %43 : vector<4x16x32xf32>
    %45 = vector.extract_strided_slice %39 {offsets = [0, 8, 0], sizes = [4, 16, 32], strides = [1, 1, 1]} : vector<4x25x32xf32> to vector<4x16x32xf32>
    %46 = vector.shape_cast %5 : vector<32xf32> to vector<1x1x32xf32>
    %47 = vector.broadcast %46 : vector<1x1x32xf32> to vector<4x16x32xf32>
    %48 = arith.mulf %45, %47 : vector<4x16x32xf32>
    %49 = arith.addf %44, %48 : vector<4x16x32xf32>
    %50 = vector.extract_strided_slice %39 {offsets = [0, 9, 0], sizes = [4, 16, 32], strides = [1, 1, 1]} : vector<4x25x32xf32> to vector<4x16x32xf32>
    %51 = vector.shape_cast %7 : vector<32xf32> to vector<1x1x32xf32>
    %52 = vector.broadcast %51 : vector<1x1x32xf32> to vector<4x16x32xf32>
    %53 = arith.mulf %50, %52 : vector<4x16x32xf32>
    %54 = arith.addf %49, %53 : vector<4x16x32xf32>
    %c1_59 = arith.constant 1 : index
    %c0_60 = arith.constant 0 : index
    %c0_61 = arith.constant 0 : index
    %55 = vector.load %arg8[%c1_59, %c0_60, %c0_61] : memref<18x25x32xf32, #tpu.memory_space<vmem>>, vector<4x25x32xf32>
    %56 = vector.extract_strided_slice %55 {offsets = [0, 7, 0], sizes = [4, 16, 32], strides = [1, 1, 1]} : vector<4x25x32xf32> to vector<4x16x32xf32>
    %57 = vector.shape_cast %9 : vector<32xf32> to vector<1x1x32xf32>
    %58 = vector.broadcast %57 : vector<1x1x32xf32> to vector<4x16x32xf32>
    %59 = arith.mulf %56, %58 : vector<4x16x32xf32>
    %60 = arith.addf %54, %59 : vector<4x16x32xf32>
    %61 = vector.extract_strided_slice %55 {offsets = [0, 8, 0], sizes = [4, 16, 32], strides = [1, 1, 1]} : vector<4x25x32xf32> to vector<4x16x32xf32>
    %62 = vector.shape_cast %11 : vector<32xf32> to vector<1x1x32xf32>
    %63 = vector.broadcast %62 : vector<1x1x32xf32> to vector<4x16x32xf32>
    %64 = arith.mulf %61, %63 : vector<4x16x32xf32>
    %65 = arith.addf %60, %64 : vector<4x16x32xf32>
    %66 = vector.extract_strided_slice %55 {offsets = [0, 9, 0], sizes = [4, 16, 32], strides = [1, 1, 1]} : vector<4x25x32xf32> to vector<4x16x32xf32>
    %67 = vector.shape_cast %13 : vector<32xf32> to vector<1x1x32xf32>
    %68 = vector.broadcast %67 : vector<1x1x32xf32> to vector<4x16x32xf32>
    %69 = arith.mulf %66, %68 : vector<4x16x32xf32>
    %70 = arith.addf %65, %69 : vector<4x16x32xf32>
    %c2_62 = arith.constant 2 : index
    %c0_63 = arith.constant 0 : index
    %c0_64 = arith.constant 0 : index
    %71 = vector.load %arg8[%c2_62, %c0_63, %c0_64] : memref<18x25x32xf32, #tpu.memory_space<vmem>>, vector<4x25x32xf32>
    %72 = vector.extract_strided_slice %71 {offsets = [0, 7, 0], sizes = [4, 16, 32], strides = [1, 1, 1]} : vector<4x25x32xf32> to vector<4x16x32xf32>
    %73 = vector.shape_cast %15 : vector<32xf32> to vector<1x1x32xf32>
    %74 = vector.broadcast %73 : vector<1x1x32xf32> to vector<4x16x32xf32>
    %75 = arith.mulf %72, %74 : vector<4x16x32xf32>
    %76 = arith.addf %70, %75 : vector<4x16x32xf32>
    %77 = vector.extract_strided_slice %71 {offsets = [0, 8, 0], sizes = [4, 16, 32], strides = [1, 1, 1]} : vector<4x25x32xf32> to vector<4x16x32xf32>
    %78 = vector.shape_cast %17 : vector<32xf32> to vector<1x1x32xf32>
    %79 = vector.broadcast %78 : vector<1x1x32xf32> to vector<4x16x32xf32>
    %80 = arith.mulf %77, %79 : vector<4x16x32xf32>
    %81 = arith.addf %76, %80 : vector<4x16x32xf32>
    %82 = vector.extract_strided_slice %71 {offsets = [0, 9, 0], sizes = [4, 16, 32], strides = [1, 1, 1]} : vector<4x25x32xf32> to vector<4x16x32xf32>
    %83 = vector.shape_cast %19 : vector<32xf32> to vector<1x1x32xf32>
    %84 = vector.broadcast %83 : vector<1x1x32xf32> to vector<4x16x32xf32>
    %85 = arith.mulf %82, %84 : vector<4x16x32xf32>
    %86 = arith.addf %81, %85 : vector<4x16x32xf32>
    %87 = vector.shape_cast %21 : vector<32xf32> to vector<1x1x32xf32>
    %88 = vector.broadcast %87 : vector<1x1x32xf32> to vector<4x16x32xf32>
    %89 = arith.addf %86, %88 : vector<4x16x32xf32>
    %cst_65 = arith.constant 5.000000e-01 : f32
    %90 = vector.broadcast %cst_65 : f32 to vector<4x16x32xf32>
    %91 = arith.mulf %90, %89 : vector<4x16x32xf32>
    %cst_66 = arith.constant 0.707106769 : f32
    %92 = vector.broadcast %cst_66 : f32 to vector<4x16x32xf32>
    %93 = arith.mulf %89, %92 : vector<4x16x32xf32>
    %94 = math.erf %93 : vector<4x16x32xf32>
    %cst_67 = arith.constant 1.000000e+00 : f32
    %95 = vector.broadcast %cst_67 : f32 to vector<4x16x32xf32>
    %96 = arith.addf %95, %94 : vector<4x16x32xf32>
    %97 = arith.mulf %91, %96 : vector<4x16x32xf32>
    %98 = vector.shape_cast %23 : vector<32xf32> to vector<1x1x32xf32>
    %99 = vector.broadcast %98 : vector<1x1x32xf32> to vector<4x16x32xf32>
    %100 = arith.mulf %97, %99 : vector<4x16x32xf32>
    %101 = vector.shape_cast %25 : vector<32xf32> to vector<1x1x32xf32>
    %102 = vector.broadcast %101 : vector<1x1x32xf32> to vector<4x16x32xf32>
    %103 = arith.addf %100, %102 : vector<4x16x32xf32>
    %c0_68 = arith.constant 0 : index
    %c0_69 = arith.constant 0 : index
    %c0_70 = arith.constant 0 : index
    %c0_71 = arith.constant 0 : index
    %104 = vector.load %arg2[%c0_68, %c0_69, %c0_70, %c0_71] : memref<1x16x16x32xf32, #tpu.memory_space<vmem>>, vector<1x4x16x32xf32>
    %105 = vector.shape_cast %104 : vector<1x4x16x32xf32> to vector<4x16x32xf32>
    %106 = arith.addf %105, %103 : vector<4x16x32xf32>
    %c0_72 = arith.constant 0 : index
    %c0_73 = arith.constant 0 : index
    %c0_74 = arith.constant 0 : index
    %c0_75 = arith.constant 0 : index
    %107 = vector.load %arg7[%c0_72, %c0_73, %c0_74, %c0_75] : memref<1x16x16x32xf32, #tpu.memory_space<vmem>>, vector<1x4x16x32xf32>
    %108 = vector.shape_cast %107 : vector<1x4x16x32xf32> to vector<4x16x32xf32>
    %109 = vector.shape_cast %106 : vector<4x16x32xf32> to vector<1x4x16x32xf32>
    tpu.vector_store %arg7[%c0_72, %c0_73, %c0_74, %c0_75], %109 {strides = array<i32>} : memref<1x16x16x32xf32, #tpu.memory_space<vmem>>, vector<1x4x16x32xf32>,
    %cst_76 = arith.constant 0.000000e+00 : f32
    %110 = vector.broadcast %cst_76 : f32 to vector<4x16x32xf32>
    %c4_77 = arith.constant 4 : index
    %c0_78 = arith.constant 0 : index
    %c0_79 = arith.constant 0 : index
    %111 = vector.load %arg8[%c4_77, %c0_78, %c0_79] : memref<18x25x32xf32, #tpu.memory_space<vmem>>, vector<4x25x32xf32>
    %112 = vector.extract_strided_slice %111 {offsets = [0, 7, 0], sizes = [4, 16, 32], strides = [1, 1, 1]} : vector<4x25x32xf32> to vector<4x16x32xf32>
    %113 = vector.shape_cast %3 : vector<32xf32> to vector<1x1x32xf32>
    %114 = vector.broadcast %113 : vector<1x1x32xf32> to vector<4x16x32xf32>
    %115 = arith.mulf %112, %114 : vector<4x16x32xf32>
    %116 = arith.addf %110, %115 : vector<4x16x32xf32>
    %117 = vector.extract_strided_slice %111 {offsets = [0, 8, 0], sizes = [4, 16, 32], strides = [1, 1, 1]} : vector<4x25x32xf32> to vector<4x16x32xf32>
    %118 = vector.shape_cast %5 : vector<32xf32> to vector<1x1x32xf32>
    %119 = vector.broadcast %118 : vector<1x1x32xf32> to vector<4x16x32xf32>
    %120 = arith.mulf %117, %119 : vector<4x16x32xf32>
    %121 = arith.addf %116, %120 : vector<4x16x32xf32>
    %122 = vector.extract_strided_slice %111 {offsets = [0, 9, 0], sizes = [4, 16, 32], strides = [1, 1, 1]} : vector<4x25x32xf32> to vector<4x16x32xf32>
    %123 = vector.shape_cast %7 : vector<32xf32> to vector<1x1x32xf32>
    %124 = vector.broadcast %123 : vector<1x1x32xf32> to vector<4x16x32xf32>
    %125 = arith.mulf %122, %124 : vector<4x16x32xf32>
    %126 = arith.addf %121, %125 : vector<4x16x32xf32>
    %c5_80 = arith.constant 5 : index
    %c0_81 = arith.constant 0 : index
    %c0_82 = arith.constant 0 : index
    %127 = vector.load %arg8[%c5_80, %c0_81, %c0_82] : memref<18x25x32xf32, #tpu.memory_space<vmem>>, vector<4x25x32xf32>
    %128 = vector.extract_strided_slice %127 {offsets = [0, 7, 0], sizes = [4, 16, 32], strides = [1, 1, 1]} : vector<4x25x32xf32> to vector<4x16x32xf32>
    %129 = vector.shape_cast %9 : vector<32xf32> to vector<1x1x32xf32>
    %130 = vector.broadcast %129 : vector<1x1x32xf32> to vector<4x16x32xf32>
    %131 = arith.mulf %128, %130 : vector<4x16x32xf32>
    %132 = arith.addf %126, %131 : vector<4x16x32xf32>
    %133 = vector.extract_strided_slice %127 {offsets = [0, 8, 0], sizes = [4, 16, 32], strides = [1, 1, 1]} : vector<4x25x32xf32> to vector<4x16x32xf32>
    %134 = vector.shape_cast %11 : vector<32xf32> to vector<1x1x32xf32>
    %135 = vector.broadcast %134 : vector<1x1x32xf32> to vector<4x16x32xf32>
    %136 = arith.mulf %133, %135 : vector<4x16x32xf32>
    %137 = arith.addf %132, %136 : vector<4x16x32xf32>
    %138 = vector.extract_strided_slice %127 {offsets = [0, 9, 0], sizes = [4, 16, 32], strides = [1, 1, 1]} : vector<4x25x32xf32> to vector<4x16x32xf32>
    %139 = vector.shape_cast %13 : vector<32xf32> to vector<1x1x32xf32>
    %140 = vector.broadcast %139 : vector<1x1x32xf32> to vector<4x16x32xf32>
    %141 = arith.mulf %138, %140 : vector<4x16x32xf32>
    %142 = arith.addf %137, %141 : vector<4x16x32xf32>
    %c6 = arith.constant 6 : index
    %c0_83 = arith.constant 0 : index
    %c0_84 = arith.constant 0 : index
    %143 = vector.load %arg8[%c6, %c0_83, %c0_84] : memref<18x25x32xf32, #tpu.memory_space<vmem>>, vector<4x25x32xf32>
    %144 = vector.extract_strided_slice %143 {offsets = [0, 7, 0], sizes = [4, 16, 32], strides = [1, 1, 1]} : vector<4x25x32xf32> to vector<4x16x32xf32>
    %145 = vector.shape_cast %15 : vector<32xf32> to vector<1x1x32xf32>
    %146 = vector.broadcast %145 : vector<1x1x32xf32> to vector<4x16x32xf32>
    %147 = arith.mulf %144, %146 : vector<4x16x32xf32>
    %148 = arith.addf %142, %147 : vector<4x16x32xf32>
    %149 = vector.extract_strided_slice %143 {offsets = [0, 8, 0], sizes = [4, 16, 32], strides = [1, 1, 1]} : vector<4x25x32xf32> to vector<4x16x32xf32>
    %150 = vector.shape_cast %17 : vector<32xf32> to vector<1x1x32xf32>
    %151 = vector.broadcast %150 : vector<1x1x32xf32> to vector<4x16x32xf32>
    %152 = arith.mulf %149, %151 : vector<4x16x32xf32>
    %153 = arith.addf %148, %152 : vector<4x16x32xf32>
    %154 = vector.extract_strided_slice %143 {offsets = [0, 9, 0], sizes = [4, 16, 32], strides = [1, 1, 1]} : vector<4x25x32xf32> to vector<4x16x32xf32>
    %155 = vector.shape_cast %19 : vector<32xf32> to vector<1x1x32xf32>
    %156 = vector.broadcast %155 : vector<1x1x32xf32> to vector<4x16x32xf32>
    %157 = arith.mulf %154, %156 : vector<4x16x32xf32>
    %158 = arith.addf %153, %157 : vector<4x16x32xf32>
    %159 = vector.shape_cast %21 : vector<32xf32> to vector<1x1x32xf32>
    %160 = vector.broadcast %159 : vector<1x1x32xf32> to vector<4x16x32xf32>
    %161 = arith.addf %158, %160 : vector<4x16x32xf32>
    %cst_85 = arith.constant 5.000000e-01 : f32
    %162 = vector.broadcast %cst_85 : f32 to vector<4x16x32xf32>
    %163 = arith.mulf %162, %161 : vector<4x16x32xf32>
    %cst_86 = arith.constant 0.707106769 : f32
    %164 = vector.broadcast %cst_86 : f32 to vector<4x16x32xf32>
    %165 = arith.mulf %161, %164 : vector<4x16x32xf32>
    %166 = math.erf %165 : vector<4x16x32xf32>
    %cst_87 = arith.constant 1.000000e+00 : f32
    %167 = vector.broadcast %cst_87 : f32 to vector<4x16x32xf32>
    %168 = arith.addf %167, %166 : vector<4x16x32xf32>
    %169 = arith.mulf %163, %168 : vector<4x16x32xf32>
    %170 = vector.shape_cast %23 : vector<32xf32> to vector<1x1x32xf32>
    %171 = vector.broadcast %170 : vector<1x1x32xf32> to vector<4x16x32xf32>
    %172 = arith.mulf %169, %171 : vector<4x16x32xf32>
    %173 = vector.shape_cast %25 : vector<32xf32> to vector<1x1x32xf32>
    %174 = vector.broadcast %173 : vector<1x1x32xf32> to vector<4x16x32xf32>
    %175 = arith.addf %172, %174 : vector<4x16x32xf32>
    %c0_88 = arith.constant 0 : index
    %c4_89 = arith.constant 4 : index
    %c0_90 = arith.constant 0 : index
    %c0_91 = arith.constant 0 : index
    %176 = vector.load %arg2[%c0_88, %c4_89, %c0_90, %c0_91] : memref<1x16x16x32xf32, #tpu.memory_space<vmem>>, vector<1x4x16x32xf32>
    %177 = vector.shape_cast %176 : vector<1x4x16x32xf32> to vector<4x16x32xf32>
    %178 = arith.addf %177, %175 : vector<4x16x32xf32>
    %c0_92 = arith.constant 0 : index
    %c4_93 = arith.constant 4 : index
    %c0_94 = arith.constant 0 : index
    %c0_95 = arith.constant 0 : index
    %179 = vector.load %arg7[%c0_92, %c4_93, %c0_94, %c0_95] : memref<1x16x16x32xf32, #tpu.memory_space<vmem>>, vector<1x4x16x32xf32>
    %180 = vector.shape_cast %179 : vector<1x4x16x32xf32> to vector<4x16x32xf32>
    %181 = vector.shape_cast %178 : vector<4x16x32xf32> to vector<1x4x16x32xf32>
    tpu.vector_store %arg7[%c0_92, %c4_93, %c0_94, %c0_95], %181 {strides = array<i32>} : memref<1x16x16x32xf32, #tpu.memory_space<vmem>>, vector<1x4x16x32xf32>,
    %cst_96 = arith.constant 0.000000e+00 : f32
    %182 = vector.broadcast %cst_96 : f32 to vector<4x16x32xf32>
    %c8_97 = arith.constant 8 : index
    %c0_98 = arith.constant 0 : index
    %c0_99 = arith.constant 0 : index
    %183 = vector.load %arg8[%c8_97, %c0_98, %c0_99] : memref<18x25x32xf32, #tpu.memory_space<vmem>>, vector<4x25x32xf32>
    %184 = vector.extract_strided_slice %183 {offsets = [0, 7, 0], sizes = [4, 16, 32], strides = [1, 1, 1]} : vector<4x25x32xf32> to vector<4x16x32xf32>
    %185 = vector.shape_cast %3 : vector<32xf32> to vector<1x1x32xf32>
    %186 = vector.broadcast %185 : vector<1x1x32xf32> to vector<4x16x32xf32>
    %187 = arith.mulf %184, %186 : vector<4x16x32xf32>
    %188 = arith.addf %182, %187 : vector<4x16x32xf32>
    %189 = vector.extract_strided_slice %183 {offsets = [0, 8, 0], sizes = [4, 16, 32], strides = [1, 1, 1]} : vector<4x25x32xf32> to vector<4x16x32xf32>
    %190 = vector.shape_cast %5 : vector<32xf32> to vector<1x1x32xf32>
    %191 = vector.broadcast %190 : vector<1x1x32xf32> to vector<4x16x32xf32>
    %192 = arith.mulf %189, %191 : vector<4x16x32xf32>
    %193 = arith.addf %188, %192 : vector<4x16x32xf32>
    %194 = vector.extract_strided_slice %183 {offsets = [0, 9, 0], sizes = [4, 16, 32], strides = [1, 1, 1]} : vector<4x25x32xf32> to vector<4x16x32xf32>
    %195 = vector.shape_cast %7 : vector<32xf32> to vector<1x1x32xf32>
    %196 = vector.broadcast %195 : vector<1x1x32xf32> to vector<4x16x32xf32>
    %197 = arith.mulf %194, %196 : vector<4x16x32xf32>
    %198 = arith.addf %193, %197 : vector<4x16x32xf32>
    %c9_100 = arith.constant 9 : index
    %c0_101 = arith.constant 0 : index
    %c0_102 = arith.constant 0 : index
    %199 = vector.load %arg8[%c9_100, %c0_101, %c0_102] : memref<18x25x32xf32, #tpu.memory_space<vmem>>, vector<4x25x32xf32>
    %200 = vector.extract_strided_slice %199 {offsets = [0, 7, 0], sizes = [4, 16, 32], strides = [1, 1, 1]} : vector<4x25x32xf32> to vector<4x16x32xf32>
    %201 = vector.shape_cast %9 : vector<32xf32> to vector<1x1x32xf32>
    %202 = vector.broadcast %201 : vector<1x1x32xf32> to vector<4x16x32xf32>
    %203 = arith.mulf %200, %202 : vector<4x16x32xf32>
    %204 = arith.addf %198, %203 : vector<4x16x32xf32>
    %205 = vector.extract_strided_slice %199 {offsets = [0, 8, 0], sizes = [4, 16, 32], strides = [1, 1, 1]} : vector<4x25x32xf32> to vector<4x16x32xf32>
    %206 = vector.shape_cast %11 : vector<32xf32> to vector<1x1x32xf32>
    %207 = vector.broadcast %206 : vector<1x1x32xf32> to vector<4x16x32xf32>
    %208 = arith.mulf %205, %207 : vector<4x16x32xf32>
    %209 = arith.addf %204, %208 : vector<4x16x32xf32>
    %210 = vector.extract_strided_slice %199 {offsets = [0, 9, 0], sizes = [4, 16, 32], strides = [1, 1, 1]} : vector<4x25x32xf32> to vector<4x16x32xf32>
    %211 = vector.shape_cast %13 : vector<32xf32> to vector<1x1x32xf32>
    %212 = vector.broadcast %211 : vector<1x1x32xf32> to vector<4x16x32xf32>
    %213 = arith.mulf %210, %212 : vector<4x16x32xf32>
    %214 = arith.addf %209, %213 : vector<4x16x32xf32>
    %c10 = arith.constant 10 : index
    %c0_103 = arith.constant 0 : index
    %c0_104 = arith.constant 0 : index
    %215 = vector.load %arg8[%c10, %c0_103, %c0_104] : memref<18x25x32xf32, #tpu.memory_space<vmem>>, vector<4x25x32xf32>
    %216 = vector.extract_strided_slice %215 {offsets = [0, 7, 0], sizes = [4, 16, 32], strides = [1, 1, 1]} : vector<4x25x32xf32> to vector<4x16x32xf32>
    %217 = vector.shape_cast %15 : vector<32xf32> to vector<1x1x32xf32>
    %218 = vector.broadcast %217 : vector<1x1x32xf32> to vector<4x16x32xf32>
    %219 = arith.mulf %216, %218 : vector<4x16x32xf32>
    %220 = arith.addf %214, %219 : vector<4x16x32xf32>
    %221 = vector.extract_strided_slice %215 {offsets = [0, 8, 0], sizes = [4, 16, 32], strides = [1, 1, 1]} : vector<4x25x32xf32> to vector<4x16x32xf32>
    %222 = vector.shape_cast %17 : vector<32xf32> to vector<1x1x32xf32>
    %223 = vector.broadcast %222 : vector<1x1x32xf32> to vector<4x16x32xf32>
    %224 = arith.mulf %221, %223 : vector<4x16x32xf32>
    %225 = arith.addf %220, %224 : vector<4x16x32xf32>
    %226 = vector.extract_strided_slice %215 {offsets = [0, 9, 0], sizes = [4, 16, 32], strides = [1, 1, 1]} : vector<4x25x32xf32> to vector<4x16x32xf32>
    %227 = vector.shape_cast %19 : vector<32xf32> to vector<1x1x32xf32>
    %228 = vector.broadcast %227 : vector<1x1x32xf32> to vector<4x16x32xf32>
    %229 = arith.mulf %226, %228 : vector<4x16x32xf32>
    %230 = arith.addf %225, %229 : vector<4x16x32xf32>
    %231 = vector.shape_cast %21 : vector<32xf32> to vector<1x1x32xf32>
    %232 = vector.broadcast %231 : vector<1x1x32xf32> to vector<4x16x32xf32>
    %233 = arith.addf %230, %232 : vector<4x16x32xf32>
    %cst_105 = arith.constant 5.000000e-01 : f32
    %234 = vector.broadcast %cst_105 : f32 to vector<4x16x32xf32>
    %235 = arith.mulf %234, %233 : vector<4x16x32xf32>
    %cst_106 = arith.constant 0.707106769 : f32
    %236 = vector.broadcast %cst_106 : f32 to vector<4x16x32xf32>
    %237 = arith.mulf %233, %236 : vector<4x16x32xf32>
    %238 = math.erf %237 : vector<4x16x32xf32>
    %cst_107 = arith.constant 1.000000e+00 : f32
    %239 = vector.broadcast %cst_107 : f32 to vector<4x16x32xf32>
    %240 = arith.addf %239, %238 : vector<4x16x32xf32>
    %241 = arith.mulf %235, %240 : vector<4x16x32xf32>
    %242 = vector.shape_cast %23 : vector<32xf32> to vector<1x1x32xf32>
    %243 = vector.broadcast %242 : vector<1x1x32xf32> to vector<4x16x32xf32>
    %244 = arith.mulf %241, %243 : vector<4x16x32xf32>
    %245 = vector.shape_cast %25 : vector<32xf32> to vector<1x1x32xf32>
    %246 = vector.broadcast %245 : vector<1x1x32xf32> to vector<4x16x32xf32>
    %247 = arith.addf %244, %246 : vector<4x16x32xf32>
    %c0_108 = arith.constant 0 : index
    %c8_109 = arith.constant 8 : index
    %c0_110 = arith.constant 0 : index
    %c0_111 = arith.constant 0 : index
    %248 = vector.load %arg2[%c0_108, %c8_109, %c0_110, %c0_111] : memref<1x16x16x32xf32, #tpu.memory_space<vmem>>, vector<1x4x16x32xf32>
    %249 = vector.shape_cast %248 : vector<1x4x16x32xf32> to vector<4x16x32xf32>
    %250 = arith.addf %249, %247 : vector<4x16x32xf32>
    %c0_112 = arith.constant 0 : index
    %c8_113 = arith.constant 8 : index
    %c0_114 = arith.constant 0 : index
    %c0_115 = arith.constant 0 : index
    %251 = vector.load %arg7[%c0_112, %c8_113, %c0_114, %c0_115] : memref<1x16x16x32xf32, #tpu.memory_space<vmem>>, vector<1x4x16x32xf32>
    %252 = vector.shape_cast %251 : vector<1x4x16x32xf32> to vector<4x16x32xf32>
    %253 = vector.shape_cast %250 : vector<4x16x32xf32> to vector<1x4x16x32xf32>
    tpu.vector_store %arg7[%c0_112, %c8_113, %c0_114, %c0_115], %253 {strides = array<i32>} : memref<1x16x16x32xf32, #tpu.memory_space<vmem>>, vector<1x4x16x32xf32>,
    %cst_116 = arith.constant 0.000000e+00 : f32
    %254 = vector.broadcast %cst_116 : f32 to vector<4x16x32xf32>
    %c12_117 = arith.constant 12 : index
    %c0_118 = arith.constant 0 : index
    %c0_119 = arith.constant 0 : index
    %255 = vector.load %arg8[%c12_117, %c0_118, %c0_119] : memref<18x25x32xf32, #tpu.memory_space<vmem>>, vector<4x25x32xf32>
    %256 = vector.extract_strided_slice %255 {offsets = [0, 7, 0], sizes = [4, 16, 32], strides = [1, 1, 1]} : vector<4x25x32xf32> to vector<4x16x32xf32>
    %257 = vector.shape_cast %3 : vector<32xf32> to vector<1x1x32xf32>
    %258 = vector.broadcast %257 : vector<1x1x32xf32> to vector<4x16x32xf32>
    %259 = arith.mulf %256, %258 : vector<4x16x32xf32>
    %260 = arith.addf %254, %259 : vector<4x16x32xf32>
    %261 = vector.extract_strided_slice %255 {offsets = [0, 8, 0], sizes = [4, 16, 32], strides = [1, 1, 1]} : vector<4x25x32xf32> to vector<4x16x32xf32>
    %262 = vector.shape_cast %5 : vector<32xf32> to vector<1x1x32xf32>
    %263 = vector.broadcast %262 : vector<1x1x32xf32> to vector<4x16x32xf32>
    %264 = arith.mulf %261, %263 : vector<4x16x32xf32>
    %265 = arith.addf %260, %264 : vector<4x16x32xf32>
    %266 = vector.extract_strided_slice %255 {offsets = [0, 9, 0], sizes = [4, 16, 32], strides = [1, 1, 1]} : vector<4x25x32xf32> to vector<4x16x32xf32>
    %267 = vector.shape_cast %7 : vector<32xf32> to vector<1x1x32xf32>
    %268 = vector.broadcast %267 : vector<1x1x32xf32> to vector<4x16x32xf32>
    %269 = arith.mulf %266, %268 : vector<4x16x32xf32>
    %270 = arith.addf %265, %269 : vector<4x16x32xf32>
    %c13_120 = arith.constant 13 : index
    %c0_121 = arith.constant 0 : index
    %c0_122 = arith.constant 0 : index
    %271 = vector.load %arg8[%c13_120, %c0_121, %c0_122] : memref<18x25x32xf32, #tpu.memory_space<vmem>>, vector<4x25x32xf32>
    %272 = vector.extract_strided_slice %271 {offsets = [0, 7, 0], sizes = [4, 16, 32], strides = [1, 1, 1]} : vector<4x25x32xf32> to vector<4x16x32xf32>
    %273 = vector.shape_cast %9 : vector<32xf32> to vector<1x1x32xf32>
    %274 = vector.broadcast %273 : vector<1x1x32xf32> to vector<4x16x32xf32>
    %275 = arith.mulf %272, %274 : vector<4x16x32xf32>
    %276 = arith.addf %270, %275 : vector<4x16x32xf32>
    %277 = vector.extract_strided_slice %271 {offsets = [0, 8, 0], sizes = [4, 16, 32], strides = [1, 1, 1]} : vector<4x25x32xf32> to vector<4x16x32xf32>
    %278 = vector.shape_cast %11 : vector<32xf32> to vector<1x1x32xf32>
    %279 = vector.broadcast %278 : vector<1x1x32xf32> to vector<4x16x32xf32>
    %280 = arith.mulf %277, %279 : vector<4x16x32xf32>
    %281 = arith.addf %276, %280 : vector<4x16x32xf32>
    %282 = vector.extract_strided_slice %271 {offsets = [0, 9, 0], sizes = [4, 16, 32], strides = [1, 1, 1]} : vector<4x25x32xf32> to vector<4x16x32xf32>
    %283 = vector.shape_cast %13 : vector<32xf32> to vector<1x1x32xf32>
    %284 = vector.broadcast %283 : vector<1x1x32xf32> to vector<4x16x32xf32>
    %285 = arith.mulf %282, %284 : vector<4x16x32xf32>
    %286 = arith.addf %281, %285 : vector<4x16x32xf32>
    %c14 = arith.constant 14 : index
    %c0_123 = arith.constant 0 : index
    %c0_124 = arith.constant 0 : index
    %287 = vector.load %arg8[%c14, %c0_123, %c0_124] : memref<18x25x32xf32, #tpu.memory_space<vmem>>, vector<4x25x32xf32>
    %288 = vector.extract_strided_slice %287 {offsets = [0, 7, 0], sizes = [4, 16, 32], strides = [1, 1, 1]} : vector<4x25x32xf32> to vector<4x16x32xf32>
    %289 = vector.shape_cast %15 : vector<32xf32> to vector<1x1x32xf32>
    %290 = vector.broadcast %289 : vector<1x1x32xf32> to vector<4x16x32xf32>
    %291 = arith.mulf %288, %290 : vector<4x16x32xf32>
    %292 = arith.addf %286, %291 : vector<4x16x32xf32>
    %293 = vector.extract_strided_slice %287 {offsets = [0, 8, 0], sizes = [4, 16, 32], strides = [1, 1, 1]} : vector<4x25x32xf32> to vector<4x16x32xf32>
    %294 = vector.shape_cast %17 : vector<32xf32> to vector<1x1x32xf32>
    %295 = vector.broadcast %294 : vector<1x1x32xf32> to vector<4x16x32xf32>
    %296 = arith.mulf %293, %295 : vector<4x16x32xf32>
    %297 = arith.addf %292, %296 : vector<4x16x32xf32>
    %298 = vector.extract_strided_slice %287 {offsets = [0, 9, 0], sizes = [4, 16, 32], strides = [1, 1, 1]} : vector<4x25x32xf32> to vector<4x16x32xf32>
    %299 = vector.shape_cast %19 : vector<32xf32> to vector<1x1x32xf32>
    %300 = vector.broadcast %299 : vector<1x1x32xf32> to vector<4x16x32xf32>
    %301 = arith.mulf %298, %300 : vector<4x16x32xf32>
    %302 = arith.addf %297, %301 : vector<4x16x32xf32>
    %303 = vector.shape_cast %21 : vector<32xf32> to vector<1x1x32xf32>
    %304 = vector.broadcast %303 : vector<1x1x32xf32> to vector<4x16x32xf32>
    %305 = arith.addf %302, %304 : vector<4x16x32xf32>
    %cst_125 = arith.constant 5.000000e-01 : f32
    %306 = vector.broadcast %cst_125 : f32 to vector<4x16x32xf32>
    %307 = arith.mulf %306, %305 : vector<4x16x32xf32>
    %cst_126 = arith.constant 0.707106769 : f32
    %308 = vector.broadcast %cst_126 : f32 to vector<4x16x32xf32>
    %309 = arith.mulf %305, %308 : vector<4x16x32xf32>
    %310 = math.erf %309 : vector<4x16x32xf32>
    %cst_127 = arith.constant 1.000000e+00 : f32
    %311 = vector.broadcast %cst_127 : f32 to vector<4x16x32xf32>
    %312 = arith.addf %311, %310 : vector<4x16x32xf32>
    %313 = arith.mulf %307, %312 : vector<4x16x32xf32>
    %314 = vector.shape_cast %23 : vector<32xf32> to vector<1x1x32xf32>
    %315 = vector.broadcast %314 : vector<1x1x32xf32> to vector<4x16x32xf32>
    %316 = arith.mulf %313, %315 : vector<4x16x32xf32>
    %317 = vector.shape_cast %25 : vector<32xf32> to vector<1x1x32xf32>
    %318 = vector.broadcast %317 : vector<1x1x32xf32> to vector<4x16x32xf32>
    %319 = arith.addf %316, %318 : vector<4x16x32xf32>
    %c0_128 = arith.constant 0 : index
    %c12_129 = arith.constant 12 : index
    %c0_130 = arith.constant 0 : index
    %c0_131 = arith.constant 0 : index
    %320 = vector.load %arg2[%c0_128, %c12_129, %c0_130, %c0_131] : memref<1x16x16x32xf32, #tpu.memory_space<vmem>>, vector<1x4x16x32xf32>
    %321 = vector.shape_cast %320 : vector<1x4x16x32xf32> to vector<4x16x32xf32>
    %322 = arith.addf %321, %319 : vector<4x16x32xf32>
    %c0_132 = arith.constant 0 : index
    %c12_133 = arith.constant 12 : index
    %c0_134 = arith.constant 0 : index
    %c0_135 = arith.constant 0 : index
    %323 = vector.load %arg7[%c0_132, %c12_133, %c0_134, %c0_135] : memref<1x16x16x32xf32, #tpu.memory_space<vmem>>, vector<1x4x16x32xf32>
    %324 = vector.shape_cast %323 : vector<1x4x16x32xf32> to vector<4x16x32xf32>
    %325 = vector.shape_cast %322 : vector<4x16x32xf32> to vector<1x4x16x32xf32>
    tpu.vector_store %arg7[%c0_132, %c12_133, %c0_134, %c0_135], %325 {strides = array<i32>} : memref<1x16x16x32xf32, #tpu.memory_space<vmem>>, vector<1x4x16x32xf32>,
    return
  }
  func.func @transform_0(%arg0: i32, %arg1: i32) -> (i32, i32, i32, i32) {
    %c0_i32 = arith.constant 0 : i32
    %c0_i32_0 = arith.constant 0 : i32
    %c0_i32_1 = arith.constant 0 : i32
    return %arg0, %c0_i32, %c0_i32_0, %arg1 : i32, i32, i32, i32
  }
  func.func @transform_1(%arg0: i32, %arg1: i32) -> (i32, i32, i32) {
    %c0_i32 = arith.constant 0 : i32
    %c0_i32_0 = arith.constant 0 : i32
    %c0_i32_1 = arith.constant 0 : i32
    return %c0_i32, %c0_i32_0, %arg1 : i32, i32, i32
  }
  func.func @transform_2(%arg0: i32, %arg1: i32) -> (i32, i32) {
    %c0_i32 = arith.constant 0 : i32
    %c0_i32_0 = arith.constant 0 : i32
    return %c0_i32, %arg1 : i32, i32
  }
  func.func @transform_3(%arg0: i32, %arg1: i32) -> (i32, i32) {
    %c0_i32 = arith.constant 0 : i32
    %c0_i32_0 = arith.constant 0 : i32
    return %c0_i32, %arg1 : i32, i32
  }
  func.func @transform_4(%arg0: i32, %arg1: i32) -> (i32, i32) {
    %c0_i32 = arith.constant 0 : i32
    %c0_i32_0 = arith.constant 0 : i32
    return %c0_i32, %arg1 : i32, i32
  }
  func.func @transform_5(%arg0: i32, %arg1: i32) -> (i32, i32, i32, i32) {
    %c0_i32 = arith.constant 0 : i32
    %c0_i32_0 = arith.constant 0 : i32
    %c0_i32_1 = arith.constant 0 : i32
    return %arg0, %c0_i32, %c0_i32_0, %arg1 : i32, i32, i32, i32
  }
}

</mosaic_0001>

<bundles_post_ra>
// kernel: tpu_custom_call.1
= control target key start
LH: loop header
LB: loop body
LE: loop exit
PB: predicated region body
PF: predicated region fallthrough
CT: control target
= control target key end

     0   :  { %10 = vsyncpa [#allocation4], 0  ;;  %s6607_s0 = inlined_call_operand.hbm [shape: f32[2,16,16,32], index: 0, kind: input, shape index: {}]   ;;  %s6608_s1 = inlined_call_operand.hbm [shape: f32[3,3,32], index: 1, kind: input, shape index: {}]   ;;  %s6609_s2 = inlined_call_operand.vmem [shape: f32[1,32], index: 2, kind: input, shape index: {}]   ;;  %s6610_s3 = inlined_call_operand.vmem [shape: f32[1,32], index: 3, kind: input, shape index: {}]   ;;  %s6611_s4 = inlined_call_operand.vmem [shape: f32[1,32], index: 4, kind: input, shape index: {}]   ;;  %s6612_s5 = inlined_call_operand.hbm [shape: f32[2,16,16,32], index: 5, kind: output, shape index: {}]  }
   0x1   :  { %12 = vsyncpa [#allocation4 + $0x1], 0 }
   0x2   :  { %13 = vsyncpa [#allocation7], 0 }
   0x3   :  { %14 = vsyncpa [#allocation5], 0 }
   0x4   :  { %16 = vsyncpa [#allocation5 + $0x1], 0  ;;  %s3769_s18 = smov 0   ;;  %s3771_s19 = smov 0  }
   0x5   :  { %s3773_s20 = smov 0   ;;  %s3775_s21 = smov 0  }
   0x6   :  { %s3777_s22 = smov 0   ;;  %s3779_s23 = smov 0  }
   0x7 LB: > { %s3258_s24 = sadd.s32 4294967295, %s3727_s23   ;;  %s3259_s25 = sadd.s32 4294967294, %s3727_s23   ;;  %s3727_s23 = sphi %s3779_s23, %s22_s23   ;;  %s3723_s22 = sphi %s3777_s22, %s7414_s22   ;;  %s3719_s21 = sphi %s3775_s21, %s7413_s21   ;;  %s3715_s20 = sphi %s3773_s20, %s7412_s20   ;;  %s3711_s19 = sphi %s3771_s19, %s7411_s19   ;;  %s3707_s18 = sphi %s3769_s18, %s7410_s18  }
   0x8   : > { %p56_p0 = scmp.ne.s32.totalorder %s3711_s19, %s3707_s18  ;;  %p3803_p1 = scmp.eq.s32.totalorder %s3258_s24, 0 }
   0x9   : > { %p3807_p2 = scmp.eq.s32.totalorder %s3258_s24, 1  ;;  %p192_p3 = scmp.eq.s32.totalorder %s3259_s25, 1 }
   0xa   : > { %s6794_s26 = scalar_select %p3803_p1, 1, 0 }
   0xb   : > { %s6795_s27 = scalar_select %p3807_p2, 1, 0 }
   0xc   : > { %p3813_p4 = por %p3803_p1, %p56_p0  ;;  %p3260_p5 = scmp.ge.s32.totalorder %s3727_s23, 1 }
   0xd   : > { %p3818_p6 = por %p192_p3, %p56_p0  ;;  %p199_p7 = scmp.lt.s32.totalorder %s3727_s23, 3 }
   0xe   : > { %s6796_s28 = scalar_select %p3813_p4, 1, 0 }
   0xf   : > { %s6797_s29 = scalar_select %p3818_p6, 1, 0 }
  0x10   : > { %p3823_p8 = pnand %p3260_p5, %p199_p7  ;;  %s3729_s6 = smov [#allocation6]  }
  0x11   : > { %s213_s7 = sshll.u32 %s3729_s6, 4  ;;  %s34_s9 = sadd.s32 1, %s3723_s22  ;;  %s214_s7 = int_to_ptr.vmem [resolvable:$true] %s213_s7 }
  0x12   : > { %s6798_s30 = scalar_select %p3823_p8, 1, 0 }
  0x13   : > { %p3372_p9 = pneg %p3823_p8  ;;  %s3583_s12 = scalar_lea.hbm %s6608_s1, 192 }
  0x14   : > { %p3584_p12 = scmp.ne.s32.totalorder %s6608_s1, %s3583_s12  ;;  %p3590_p5 = scmp.lt.u32.totalorder %s3583_s12, %s6608_s1 }
  0x15   : > { %p3832_p11 = pnand %p3372_p9, %p3803_p1 }
  0x17   : > { %p3585_p13 = pneg %p3832_p11 }
  0x19   : > { %p3586_p0 = pnand %p3585_p13, %p3584_p12 }
  0x1b   : > { %p3587_p3 = pneg %p3586_p0 }
  0x1d   : > { %p3592_p7 = pnand %p3590_p5, %p3587_p3 }
  0x1f   : > { %3595 = shalt.err (!%p3592_p7)
}
  0x20   : > { %s3596_s17 = scalar_lea.vmem %s214_s7, 192  ;;  %p3604_p1 = scmp.lt.s32.totalorder %s214_s7, %s214_s7 }
  0x21   : > { %p3597_p9 = scmp.ne.s32.totalorder %s214_s7, %s3596_s17  ;;  %p3605_p4 = scmp.lt.s32.totalorder %s3596_s17, %s3596_s17 }
  0x23   : > { %p3599_p10 = pnand %p3597_p9, %p3585_p13  ;;  %p3606_p8 = por %p3605_p4, %p3604_p1 }
  0x25   : > { %p3600_p6 = pneg %p3599_p10 }
  0x27   : > { %p3607_p2 = pnand %p3606_p8, %p3600_p6 }
  0x29   : > { %3610 = shalt.err (!%p3607_p2)
}
  0x2a   : > { %s3730_s24 = smov 64   ;;  %s3731_s25 = smov 4  }
  0x2b   : > { %3375 = dma.hbm_to_vmem [thread:$0]  (!%p3832_p11), %s6608_s1, 192, %s214_s7, [#allocation7], %s3730_s24, %s3730_s24, %s3731_s25  }
  0x2c   : > { %p36_p1 = scmp.ge.s32.totalorder %s34_s9, 2  ;;  %s43_s11 = sadd.s32 1, %s3715_s20 }
  0x2d   : > { %p50_p2 = scmp.ne.s32.totalorder %s3715_s20, %s3711_s19  ;;  %p51_p4 = scmp.eq.s32.totalorder %s3727_s23, 0 }
  0x2e   : > { %s7416_s9 = smov (%p36_p1, %s34_s9), 0  ;;  %p6801_p8 = scmp.ne.s32.totalorder %s6795_s27, 0 }
  0x2f   : > { %p3859_p6 = por %p51_p4, %p50_p2  ;;  %s38_s8 = ssub.s32 %s3723_s22, %s7416_s9 }
  0x30   : > { %p3865_p10 = por %p6801_p8, %p50_p2  ;;  %p3385_p12 = scmp.lt.s32.totalorder %s3727_s23, 2 }
  0x31   : > { %p41_p11 = scmp.eq.s32.totalorder %s38_s8, 0  ;;  %s245_s7 = sand.u32 1, %s3715_s20  }
  0x32   : > { %s3266_s14 = sshll.u32 %s245_s7, 8  ;;  %s3362_s16 = sshll.u32 %s3723_s22, 12 }
  0x33   : > { %s3874_s15 = scalar_select %p41_p11, %s3715_s20, %s43_s11  }
  0x34   : > { %s3880_s25 = scalar_lea.hbm %s6607_s0, %s3362_s16  ;;  %s249_s27 = scalar_lea.vmem [#allocation3], %s3266_s14 }
  0x35   : > { %s257_s6 = sshll.u32 %s249_s27, 4  ;;  %p3886_p13 = pnand %p3385_p12, %p3859_p6  ;;  %s3882_s6 = int_to_ptr.vmem [resolvable:$true] %s257_s6 }
  0x36   : > { %s3890_s11 = scalar_lea.sflag [#allocation4], %s245_s7  ;;  %s3611_s8 = scalar_lea.hbm %s3880_s25, 4096 }
  0x37   : > { %p3612_p0 = scmp.ne.s32.totalorder %s3880_s25, %s3611_s8  ;;  %p3613_p3 = pneg %p3886_p13 }
  0x38   : > { %s3616_s12 = scalar_lea.hbm %s6607_s0, 8192  ;;  %p3617_p9 = scmp.lt.u32.totalorder %s3880_s25, %s6607_s0 }
  0x39   : > { %p3614_p5 = pnand %p3613_p3, %p3612_p0  ;;  %p3618_p1 = scmp.lt.u32.totalorder %s3616_s12, %s3611_s8 }
  0x3a   : > { %p3620_p4 = scmp.lt.u32.totalorder %s3611_s8, %s3880_s25 }
  0x3b   : > { %p3615_p7 = pneg %p3614_p5  ;;  %p3619_p2 = por %p3618_p1, %p3617_p9 }
  0x3d   : > { %p3621_p6 = por %p3620_p4, %p3619_p2 }
  0x3f   : > { %p3622_p8 = pnand %p3621_p6, %p3615_p7 }
  0x41   : > { %3625 = shalt.err (!%p3622_p8)
}
  0x42   : > { %s3626_s7 = scalar_lea.vmem %s3882_s6, 4096  ;;  %s3732_s27 = smov [#allocation3]  }
  0x43   : > { %p3627_p12 = scmp.ne.s32.totalorder %s3882_s6, %s3626_s7  ;;  %s3631_s14 = sshll.u32 %s3732_s27, 4  ;;  %s3632_s14 = int_to_ptr.vmem [resolvable:$false] %s3631_s14 }
  0x44   : > { %s3633_s16 = scalar_lea.vmem %s3632_s14, 8192  ;;  %p3634_p5 = scmp.lt.s32.totalorder %s3882_s6, %s3632_s14 }
  0x45   : > { %p3629_p11 = pnand %p3627_p12, %p3613_p3  ;;  %p3635_p9 = scmp.lt.s32.totalorder %s3633_s16, %s3626_s7 }
  0x47   : > { %p3630_p0 = pneg %p3629_p11  ;;  %p3636_p1 = por %p3635_p9, %p3634_p5 }
  0x49   : > { %p3637_p2 = pnand %p3636_p1, %p3630_p0 }
  0x4b   : > { %3640 = shalt.err (!%p3637_p2)
}
  0x4c   : > { %s3733_s8 = smov 128   ;;  %s3734_s12 = smov 8  }
  0x4d   : > { %3379 = dma.hbm_to_vmem [thread:$0]  (!%p3886_p13), %s3880_s25, 4096, %s3882_s6, %s3890_s11, %s3733_s8, %s3733_s8, %s3734_s12  }
  0x4e   : > { %p6804_p3 = scmp.ne.s32.totalorder %s6798_s30, 0 }
  0x50   : > { %269 = sbr.rel (%p6804_p3) target bundleno = 647 (0x287), region = 40 }
  0x57   : > { %s3921_s17 = sand.u32 1, %s3711_s19   ;;  %p6805_p7 = scmp.ne.s32.totalorder %s6796_s28, 0 }
  0x58   : > { %s3270_s24 = sshll.u32 %s3921_s17, 8  ;;  %s272_s7 = scalar_lea.sflag [#allocation4], %s3921_s17 }
  0x59   : > { %s3927_s27 = scalar_lea.vmem [#allocation3], %s3270_s24 }
  0x5a   : > { %3694 = dma.done.wait (%p6805_p7), %s272_s7, 4096  }
  0x5b   : > { %3696 = vsyncadd (%p6805_p7), %s272_s7, 4294963200  ;;  %p6806_p13 = scmp.ne.s32.totalorder %s6794_s26, 0 }
  0x5d   : > { %3698 = dma.done.wait (%p6806_p13), [#allocation7], 192  }
  0x5e   : > { %3700 = vsyncadd (%p6806_p13), [#allocation7], 4294967104  ;;  %vm324_vm0 = vcmask 261120   ;;  %vm328_vm1 = vcmask 253952   ;;  %v3735_v0 = vmov 0.0   ;;  %vm547_vm2 = vcmask 1046528  }
  0x5f   : > { %326 = vst.msk [vmem:[#allocation2 + $0x8] sm:$0xff] %vm324_vm0, %v3735_v0  ;;  %325 = vst.msk [vmem:[#allocation2] sm:$0xff] %vm324_vm0, %v3735_v0  ;;  %v4081_v1 = vld [vmem:[#allocation6] ss:$0 sm:$0xff]  ;;  %v4083_v2 = vld [vmem:[#allocation6 + $0x1] ss:$0 sm:$0xff] }
  0x60   : > { %327 = vst.msk [vmem:[#allocation2 + $0x10] sm:$0xff] %vm324_vm0, %v3735_v0  ;;  %330 = vst.msk [vmem:[#allocation2 + $0x20] sm:$0xff] %vm324_vm0, %v3735_v0  ;;  %v4085_v3 = vld [vmem:[#allocation6 + $0x2] ss:$0 sm:$0xff]  ;;  %v4093_v10 = vld [vmem:[#allocation6 + $0x4] ss:$0 sm:$0xff] }
  0x61   : > { %331 = vst.msk [vmem:[#allocation2 + $0x28] sm:$0xff] %vm324_vm0, %v3735_v0  ;;  %332 = vst.msk [vmem:[#allocation2 + $0x30] sm:$0xff] %vm324_vm0, %v3735_v0  ;;  %v4167_v52 = vld [vmem:[#allocation6 + $0x6] ss:$0 sm:$0xff]  ;;  %vm612_vm3 = vcmask 1045504   ;;  %vm1136_vm4 = vcmask 1040384  }
  0x62   : > { %334 = vst.msk [vmem:[#allocation2 + $0x40] sm:$0xff] %vm324_vm0, %v3735_v0  ;;  %335 = vst.msk [vmem:[#allocation2 + $0x48] sm:$0xff] %vm324_vm0, %v3735_v0  ;;  %s5396_s11 = scalar_lea.vmem [#allocation8], %s3270_s24  ;;  %s3363_s14 = sshll.u32 %s3719_s21, 12 }
  0x63   : > { %336 = vst.msk [vmem:[#allocation2 + $0x50] sm:$0xff] %vm324_vm0, %v3735_v0  ;;  %338 = vst.msk [vmem:[#allocation2 + $0x60] sm:$0xff] %vm324_vm0, %v3735_v0  ;;  %s3125_s16 = sshll.u32 %s5396_s11, 4  ;;  %s6554_s24 = scalar_lea.hbm %s6612_s5, %s3363_s14  ;;  %s6556_s16 = int_to_ptr.vmem [resolvable:$true] %s3125_s16 }
  0x64   : > { %339 = vst.msk [vmem:[#allocation2 + $0x68] sm:$0xff] %vm324_vm0, %v3735_v0  ;;  %340 = vst.msk [vmem:[#allocation2 + $0x70] sm:$0xff] %vm324_vm0, %v3735_v0  ;;  %s3111_s7 = scalar_lea.sflag [#allocation5], %s3921_s17  ;;  %s3641_s21 = scalar_lea.vmem %s6556_s16, 4096 }
  0x65   : > { %342 = vst.msk [vmem:[#allocation2 + $0x80] sm:$0xff] %vm324_vm0, %v3735_v0  ;;  %343 = vst.msk [vmem:[#allocation2 + $0x88] sm:$0xff] %vm324_vm0, %v3735_v0  ;;  %p3642_p4 = scmp.ne.s32.totalorder %s6556_s16, %s3641_s21 }
  0x66   : > { %344 = vst.msk [vmem:[#allocation2 + $0x90] sm:$0xff] %vm324_vm0, %v3735_v0  ;;  %346 = vst.msk [vmem:[#allocation2 + $0xa0] sm:$0xff] %vm324_vm0, %v3735_v0  ;;  %v484_v4 = vld [vmem:[#allocation2 + $0x8] sm:$0xff]  ;;  %v483_v5 = vld [vmem:[#allocation2] sm:$0xff] }
  0x67   : > { %347 = vst.msk [vmem:[#allocation2 + $0xa8] sm:$0xff] %vm324_vm0, %v3735_v0  ;;  %348 = vst.msk [vmem:[#allocation2 + $0xb0] sm:$0xff] %vm324_vm0, %v3735_v0  ;;  %v4088_v6 = vmul.f32 %v4083_v2, %v484_v4  ;;  %v4091_v7 = vmul.f32 %v4085_v3, %v484_v4  ;;  %v485_v8 = vld [vmem:[#allocation2 + $0x10] sm:$0xff]  ;;  %v487_v11 = vld [vmem:[#allocation2 + $0x20] sm:$0xff]  ;;  %v503_v13 = vmul.f32 %v4081_v1, %v483_v5  ;;  %p3643_p6 = pnand %p3642_p4, %p3865_p10 }
  0x68   : > { %350 = vst.msk [vmem:[#allocation2 + $0xc0] sm:$0xff] %vm324_vm0, %v3735_v0  ;;  %351 = vst.msk [vmem:[#allocation2 + $0xc8] sm:$0xff] %vm324_vm0, %v3735_v0  ;;  %v4097_v14 = vmul.f32 %v4083_v2, %v485_v8  ;;  %v4100_v15 = vmul.f32 %v4081_v1, %v484_v4  ;;  %v505_v17 = vmul.f32 %v4081_v1, %v485_v8 }
  0x69   : > { %352 = vst.msk [vmem:[#allocation2 + $0xd0] sm:$0xff] %vm324_vm0, %v3735_v0  ;;  %354 = vst.msk [vmem:[#allocation2 + $0xe0] sm:$0xff] %vm324_vm0, %v3735_v0  ;;  %v491_v9 = vld [vmem:[#allocation2 + $0x40] sm:$0xff]  ;;  %v6617_v16 = vrot.slane %v4088_v6, 1  ;;  %v4105_v18 = vmul.f32 %v4085_v3, %v485_v8  ;;  %v4109_v21 = vmul.f32 %v4081_v1, %v487_v11  ;;  %v4119_v28 = vmul.f32 %v4093_v10, %v487_v11  ;;  %p3644_p8 = pneg %p3643_p6 }
  0x6a   : > { %355 = vst.msk [vmem:[#allocation2 + $0xe8] sm:$0xff] %vm324_vm0, %v3735_v0  ;;  %356 = vst.msk [vmem:[#allocation2 + $0xf0] sm:$0xff] %vm324_vm0, %v3735_v0  ;;  %v495_v12 = vld [vmem:[#allocation2 + $0x60] sm:$0xff]  ;;  %v4112_v22 = vmul.f32 %v4081_v1, %v491_v9  ;;  %v6618_v23 = vrot.slane %v4097_v14, 1  ;;  %v4122_v29 = vmul.f32 %v4093_v10, %v491_v9 }
  0x6b   : > { %358 = vst.msk [vmem:[#allocation2 + $0x100] sm:$0xff] %vm324_vm0, %v3735_v0  ;;  %359 = vst.msk [vmem:[#allocation2 + $0x108] sm:$0xff] %vm324_vm0, %v3735_v0  ;;  %v4116_v27 = vmul.f32 %v4081_v1, %v495_v12  ;;  %v4125_v30 = vmul.f32 %v4093_v10, %v495_v12  ;;  %v4129_v32 = vadd.f32 %v6617_v16, %v503_v13 }
  0x6c   : > { %360 = vst.msk [vmem:[#allocation2 + $0x110] sm:$0xff] %vm324_vm0, %v3735_v0  ;;  %362 = vst.msk [vmem:[#allocation2 + $0x120] sm:$0xff] %vm324_vm0, %v3735_v0  ;;  %v669_v19 = vld [vmem:[#allocation2 + $0x80] sm:$0xff]  ;;  %v4140_v39 = vadd.f32 %v6618_v23, %v505_v17 }
  0x6d   : > { %363 = vst.msk [vmem:[#allocation2 + $0x128] sm:$0xff] %vm324_vm0, %v3735_v0  ;;  %364 = vst.msk [vmem:[#allocation2 + $0x130] sm:$0xff] %vm324_vm0, %v3735_v0  ;;  %v1186_v24 = vld [vmem:[#allocation2 + $0xa0] sm:$0xff]  ;;  %v4133_v34 = vmul.f32 %v4093_v10, %v669_v19  ;;  %v4136_v35 = vmul.f32 %v4081_v1, %v669_v19 }
  0x6e   : > { %366 = vst.msk [vmem:[#allocation2 + $0x140] sm:$0xff] %vm324_vm0, %v3735_v0  ;;  %367 = vst.msk [vmem:[#allocation2 + $0x148] sm:$0xff] %vm324_vm0, %v3735_v0  ;;  %v4143_v40 = vmul.f32 %v4081_v1, %v1186_v24  ;;  %v4154_v46 = vmul.f32 %v4093_v10, %v1186_v24 }
  0x6f   : > { %368 = vst.msk [vmem:[#allocation2 + $0x150] sm:$0xff] %vm324_vm0, %v3735_v0  ;;  %370 = vst.msk [vmem:[#allocation2 + $0x160] sm:$0xff] %vm324_vm0, %v3735_v0  ;;  %v1190_v25 = vld [vmem:[#allocation2 + $0xc0] sm:$0xff] }
  0x70   : > { %371 = vst.msk [vmem:[#allocation2 + $0x168] sm:$0xff] %vm324_vm0, %v3735_v0  ;;  %372 = vst.msk [vmem:[#allocation2 + $0x170] sm:$0xff] %vm324_vm0, %v3735_v0  ;;  %v1194_v26 = vld [vmem:[#allocation2 + $0xe0] sm:$0xff]  ;;  %v4146_v41 = vmul.f32 %v4081_v1, %v1190_v25  ;;  %v4157_v47 = vmul.f32 %v4093_v10, %v1190_v25 }
  0x71   : > { %374 = vst.msk [vmem:[#allocation2 + $0x180] sm:$0xff] %vm324_vm0, %v3735_v0  ;;  %375 = vst.msk [vmem:[#allocation2 + $0x188] sm:$0xff] %vm324_vm0, %v3735_v0  ;;  %v4149_v42 = vmul.f32 %v4081_v1, %v1194_v26  ;;  %v4160_v48 = vmul.f32 %v4093_v10, %v1194_v26 }
  0x72   : > { %376 = vst.msk [vmem:[#allocation2 + $0x190] sm:$0xff] %vm324_vm0, %v3735_v0  ;;  %378 = vst.msk [vmem:[#allocation2 + $0x1a0] sm:$0xff] %vm324_vm0, %v3735_v0  ;;  %v1354_v31 = vld [vmem:[#allocation2 + $0x100] sm:$0xff] }
  0x73   : > { %379 = vst.msk [vmem:[#allocation2 + $0x1a8] sm:$0xff] %vm324_vm0, %v3735_v0  ;;  %380 = vst.msk [vmem:[#allocation2 + $0x1b0] sm:$0xff] %vm324_vm0, %v3735_v0  ;;  %v1829_v36 = vld [vmem:[#allocation2 + $0x120] sm:$0xff]  ;;  %v4163_v49 = vmul.f32 %v4093_v10, %v1354_v31  ;;  %v4170_v53 = vmul.f32 %v4081_v1, %v1354_v31 }
  0x74   : > { %382 = vst.msk [vmem:[#allocation2 + $0x1c0] sm:$0xff] %vm324_vm0, %v3735_v0  ;;  %383 = vst.msk [vmem:[#allocation2 + $0x1c8] sm:$0xff] %vm324_vm0, %v3735_v0  ;;  %v4173_v54 = vmul.f32 %v4081_v1, %v1829_v36  ;;  %v4182_v60 = vmul.f32 %v4093_v10, %v1829_v36 }
  0x75   : > { %384 = vst.msk [vmem:[#allocation2 + $0x1d0] sm:$0xff] %vm324_vm0, %v3735_v0  ;;  %386 = vst.msk [vmem:[#allocation2 + $0x1e0] sm:$0xff] %vm324_vm0, %v3735_v0  ;;  %v1833_v37 = vld [vmem:[#allocation2 + $0x140] sm:$0xff] }
  0x76   : > { %387 = vst.msk [vmem:[#allocation2 + $0x1e8] sm:$0xff] %vm324_vm0, %v3735_v0  ;;  %388 = vst.msk [vmem:[#allocation2 + $0x1f0] sm:$0xff] %vm324_vm0, %v3735_v0  ;;  %v1837_v38 = vld [vmem:[#allocation2 + $0x160] sm:$0xff]  ;;  %v4176_v55 = vmul.f32 %v4081_v1, %v1833_v37  ;;  %v4185_v61 = vmul.f32 %v4093_v10, %v1833_v37 }
  0x77   : > { %390 = vst.msk [vmem:[#allocation2 + $0x200] sm:$0xff] %vm324_vm0, %v3735_v0  ;;  %391 = vst.msk [vmem:[#allocation2 + $0x208] sm:$0xff] %vm324_vm0, %v3735_v0  ;;  %v4179_v56 = vmul.f32 %v4081_v1, %v1837_v38  ;;  %v4188_v62 = vmul.f32 %v4093_v10, %v1837_v38 }
  0x78   : > { %392 = vst.msk [vmem:[#allocation2 + $0x210] sm:$0xff] %vm324_vm0, %v3735_v0  ;;  %394 = vst.msk [vmem:[#allocation2 + $0x220] sm:$0xff] %vm324_vm0, %v3735_v0  ;;  %v1997_v43 = vld [vmem:[#allocation2 + $0x180] sm:$0xff] }
  0x79   : > { %395 = vst.msk [vmem:[#allocation2 + $0x228] sm:$0xff] %vm324_vm0, %v3735_v0  ;;  %396 = vst.msk [vmem:[#allocation2 + $0x230] sm:$0xff] %vm324_vm0, %v3735_v0  ;;  %v2472_v44 = vld [vmem:[#allocation2 + $0x1a0] sm:$0xff]  ;;  %v4191_v63 = vmul.f32 %v4093_v10, %v1997_v43  ;;  %v4194_v8 = vmul.f32 %v4081_v1, %v1997_v43 }
  0x7a   : > { %329 = vst.msk [vmem:[#allocation2 + $0x18] sm:$0x1] %vm328_vm1, %v3735_v0  ;;  %333 = vst.msk [vmem:[#allocation2 + $0x38] sm:$0x1] %vm328_vm1, %v3735_v0  ;;  %v4197_v9 = vmul.f32 %v4081_v1, %v2472_v44  ;;  %v4220_v38 = vmul.f32 %v4093_v10, %v2472_v44 }
  0x7b   : > { %337 = vst.msk [vmem:[#allocation2 + $0x58] sm:$0x1] %vm328_vm1, %v3735_v0  ;;  %341 = vst.msk [vmem:[#allocation2 + $0x78] sm:$0x1] %vm328_vm1, %v3735_v0  ;;  %v4151_v45 = vld [vmem:[#allocation2 + $0x1c0] sm:$0xff] }
  0x7c   : > { %345 = vst.msk [vmem:[#allocation2 + $0x98] sm:$0x1] %vm328_vm1, %v3735_v0  ;;  %349 = vst.msk [vmem:[#allocation2 + $0xb8] sm:$0x1] %vm328_vm1, %v3735_v0  ;;  %v4165_v50 = vld [vmem:[#allocation2 + $0x1e0] sm:$0xff]  ;;  %v4201_v11 = vmul.f32 %v4081_v1, %v4151_v45 }
  0x7d   : > { %353 = vst.msk [vmem:[#allocation2 + $0xd8] sm:$0x1] %vm328_vm1, %v3735_v0  ;;  %357 = vst.msk [vmem:[#allocation2 + $0xf8] sm:$0x1] %vm328_vm1, %v3735_v0  ;;  %v4205_v12 = vmul.f32 %v4081_v1, %v4165_v50 }
  0x7e   : > { %361 = vst.msk [vmem:[#allocation2 + $0x118] sm:$0x1] %vm328_vm1, %v3735_v0  ;;  %365 = vst.msk [vmem:[#allocation2 + $0x138] sm:$0x1] %vm328_vm1, %v3735_v0 }
  0x7f   : > { %369 = vst.msk [vmem:[#allocation2 + $0x158] sm:$0x1] %vm328_vm1, %v3735_v0  ;;  %373 = vst.msk [vmem:[#allocation2 + $0x178] sm:$0x1] %vm328_vm1, %v3735_v0 }
  0x80   : > { %377 = vst.msk [vmem:[#allocation2 + $0x198] sm:$0x1] %vm328_vm1, %v3735_v0  ;;  %381 = vst.msk [vmem:[#allocation2 + $0x1b8] sm:$0x1] %vm328_vm1, %v3735_v0 }
  0x81   : > { %385 = vst.msk [vmem:[#allocation2 + $0x1d8] sm:$0x1] %vm328_vm1, %v3735_v0  ;;  %389 = vst.msk [vmem:[#allocation2 + $0x1f8] sm:$0x1] %vm328_vm1, %v3735_v0  ;;  %v486_v51 = vld [vmem:[#allocation2 + $0x18] sm:$0x1] }
  0x82   : > { %393 = vst.msk [vmem:[#allocation2 + $0x218] sm:$0x1] %vm328_vm1, %v3735_v0  ;;  %397 = vst.msk [vmem:[#allocation2 + $0x238] sm:$0x1] %vm328_vm1, %v3735_v0  ;;  %v490_v57 = vld [vmem:[#allocation2 + $0x38] sm:$0x1]  ;;  %v4208_v19 = vmul.f32 %v4085_v3, %v486_v51 }
  0x83   : > { %6807 = vst [vmem:[#allocation12_spill] sm:$0xff] %v4125_v30  ;;  %6808 = vst [vmem:[#allocation13_spill] sm:$0xff] %v4133_v34  ;;  %v494_v58 = vld [vmem:[#allocation2 + $0x58] sm:$0x1]  ;;  %v4211_v24 = vmul.f32 %v4085_v3, %v490_v57 }
  0x84   : > { %6809 = vst [vmem:[#allocation14_spill] sm:$0xff] %v4154_v46  ;;  %6810 = vst [vmem:[#allocation15_spill] sm:$0xff] %v4157_v47  ;;  %v498_v59 = vld [vmem:[#allocation2 + $0x78] sm:$0x1]  ;;  %v4214_v25 = vmul.f32 %v4085_v3, %v494_v58 }
  0x85   : > { %6811 = vst [vmem:[#allocation16_spill] sm:$0xff] %v4160_v48  ;;  %6812 = vst [vmem:[#allocation17_spill] sm:$0xff] %v4163_v49  ;;  %v660_v0 = vld [vmem:[#allocation2 + $0x38] sm:$0x1]  ;;  %v4217_v26 = vmul.f32 %v4085_v3, %v498_v59 }
  0x86   : > { %6813 = vst [vmem:[#allocation18_spill] sm:$0xff] %v4182_v60  ;;  %6814 = vst [vmem:[#allocation19_spill] sm:$0xff] %v4185_v61  ;;  %v664_v4 = vld [vmem:[#allocation2 + $0x58] sm:$0x1]  ;;  %v4223_v43 = vmul.f32 %v4167_v52, %v660_v0 }
  0x87   : > { %6815 = vst [vmem:[#allocation20_spill] sm:$0xff] %v4188_v62  ;;  %6816 = vst [vmem:[#allocation21_spill] sm:$0xff] %v4191_v63  ;;  %v668_v5 = vld [vmem:[#allocation2 + $0x78] sm:$0x1]  ;;  %v4226_v51 = vmul.f32 %v4167_v52, %v664_v4  ;;  %v2640_v62 = vld [vmem:[#allocation2 + $0x200] sm:$0xff] }
  0x88   : > { %v672_v13 = vld [vmem:[#allocation2 + $0x98] sm:$0x1]  ;;  %6817 = vst [vmem:[#allocation22_spill] sm:$0xff] %v4214_v25  ;;  %6818 = vst [vmem:[#allocation23_spill] sm:$0xff] %v4217_v26  ;;  %v4229_v57 = vmul.f32 %v4167_v52, %v668_v5 }
  0x89   : > { %v1185_v17 = vld [vmem:[#allocation2 + $0x98] sm:$0x1]  ;;  %6819 = vst [vmem:[#allocation24_spill] sm:$0xff] %v4220_v38  ;;  %v4235_v44 = vmul.f32 %v4167_v52, %v672_v13 }
  0x8a   : > { %v1189_v31 = vld [vmem:[#allocation2 + $0xb8] sm:$0x1]  ;;  %6820 = vst [vmem:[#allocation25_spill] sm:$0xff] %v4229_v57  ;;  %v4242_v61 = vmul.f32 %v4085_v3, %v1185_v17 }
  0x8b   : > { %v1193_v36 = vld [vmem:[#allocation2 + $0xd8] sm:$0x1]  ;;  %6821 = vst [vmem:[#allocation26_spill] sm:$0xff] %v4235_v44  ;;  %v4245_v16 = vmul.f32 %v4085_v3, %v1189_v31 }
  0x8c   : > { %v1197_v37 = vld [vmem:[#allocation2 + $0xf8] sm:$0x1]  ;;  %6822 = vst [vmem:[#allocation27_spill] sm:$0xff] %v4242_v61  ;;  %v4248_v23 = vmul.f32 %v4085_v3, %v1193_v36 }
  0x8d   : > { %v1345_v58 = vld [vmem:[#allocation2 + $0xb8] sm:$0x1]  ;;  %6823 = vst [vmem:[#allocation28_spill] sm:$0xff] %v4245_v16  ;;  %v4251_v13 = vmul.f32 %v4085_v3, %v1197_v37  ;;  %v4267_v37 = vmul.f32 %v4093_v10, %v4151_v45 }
  0x8e   : > { %v1349_v20 = vld [vmem:[#allocation2 + $0xd8] sm:$0x1]  ;;  %6824 = vst [vmem:[#allocation29_spill] sm:$0xff] %v4248_v23  ;;  %v4254_v5 = vmul.f32 %v4167_v52, %v1345_v58  ;;  %v4271_v58 = vmul.f32 %v4093_v10, %v4165_v50  ;;  %v4292_v23 = vmul.f32 %v4093_v10, %v2640_v62 }
  0x8f   : > { %v1353_v33 = vld [vmem:[#allocation2 + $0xf8] sm:$0x1]  ;;  %6825 = vst [vmem:[#allocation30_spill] sm:$0xff] %v4251_v13  ;;  %v4257_v63 = vmul.f32 %v4167_v52, %v1349_v20  ;;  %6830 = vst [vmem:[#allocation35_spill] sm:$0xff] %v4267_v37 }
  0x90   : > { %v1357_v0 = vld [vmem:[#allocation2 + $0x118] sm:$0x1]  ;;  %6826 = vst [vmem:[#allocation31_spill] sm:$0xff] %v4254_v5  ;;  %v4260_v17 = vmul.f32 %v4167_v52, %v1353_v33  ;;  %6831 = vst [vmem:[#allocation36_spill] sm:$0xff] %v4271_v58  ;;  %v4298_v5 = vld [vmem:[%s3927_s27] sm:$0xff] }
  0x91   : > { %v1828_v38 = vld [vmem:[#allocation2 + $0x118] sm:$0x1]  ;;  %6827 = vst [vmem:[#allocation32_spill] sm:$0xff] %v4257_v63  ;;  %v4263_v31 = vmul.f32 %v4167_v52, %v1357_v0  ;;  %6836 = vst [vmem:[#allocation41_spill] sm:$0xff] %v4292_v23 }
  0x92   : > { %v1832_v59 = vld [vmem:[#allocation2 + $0x138] sm:$0x1]  ;;  %6828 = vst [vmem:[#allocation33_spill] sm:$0xff] %v4260_v17  ;;  %v4280_v33 = vmul.f32 %v4085_v3, %v1828_v38  ;;  %6837 = vst [vmem:[#allocation42_spill] sm:$0xff] %v4298_v5  ;;  %v418_v17 = vld [vmem:[%s3927_s27 + $0x30] sm:$0xff] }
  0x93   : > { %v1836_v4 = vld [vmem:[#allocation2 + $0x158] sm:$0x1]  ;;  %6829 = vst [vmem:[#allocation34_spill] sm:$0xff] %v4263_v31  ;;  %v4283_v61 = vmul.f32 %v4085_v3, %v1832_v59  ;;  %421 = vst.msk [vmem:[#allocation2 + $0x28] sm:$0xff] %vm324_vm0, %v4298_v5  ;;  %v417_v31 = vld [vmem:[%s3927_s27 + $0x28] sm:$0xff] }
  0x94   : > { %v1840_v36 = vld [vmem:[#allocation2 + $0x178] sm:$0x1]  ;;  %6832 = vst [vmem:[#allocation37_spill] sm:$0xff] %v4280_v33  ;;  %v4286_v0 = vmul.f32 %v4085_v3, %v1836_v4  ;;  %v4301_v4 = vld [vmem:[%s3927_s27 + $0x8] sm:$0xff]  ;;  %426 = vst.msk [vmem:[#allocation2 + $0x70] sm:$0xff] %vm324_vm0, %v417_v31 }
  0x95   : > { %v1988_v60 = vld [vmem:[#allocation2 + $0x138] sm:$0x1]  ;;  %6833 = vst [vmem:[#allocation38_spill] sm:$0xff] %v4283_v61  ;;  %v4289_v26 = vmul.f32 %v4085_v3, %v1840_v36  ;;  %6838 = vst [vmem:[#allocation43_spill] sm:$0xff] %v4301_v4  ;;  %v414_v36 = vld [vmem:[%s3927_s27 + $0x10] sm:$0xff] }
  0x96   : > { %v1992_v49 = vld [vmem:[#allocation2 + $0x158] sm:$0x1]  ;;  %6834 = vst [vmem:[#allocation39_spill] sm:$0xff] %v4286_v0  ;;  %v4305_v44 = vmul.f32 %v4167_v52, %v1988_v60  ;;  %422 = vst.msk [vmem:[#allocation2 + $0x30] sm:$0xff] %vm324_vm0, %v4301_v4  ;;  %v3277_v31 = vld [vmem:[%s3927_s27 + $0x60] sm:$0xff] }
  0x97   : > { %v1996_v48 = vld [vmem:[#allocation2 + $0x178] sm:$0x1]  ;;  %6835 = vst [vmem:[#allocation40_spill] sm:$0xff] %v4289_v26  ;;  %v4308_v34 = vmul.f32 %v4167_v52, %v1992_v49  ;;  %423 = vst.msk [vmem:[#allocation2 + $0x48] sm:$0xff] %vm324_vm0, %v414_v36  ;;  %v416_v49 = vld [vmem:[%s3927_s27 + $0x20] sm:$0xff] }
  0x98   : > { %v2000_v47 = vld [vmem:[#allocation2 + $0x198] sm:$0x1]  ;;  %6839 = vst [vmem:[#allocation44_spill] sm:$0xff] %v4305_v44  ;;  %v4311_v62 = vmul.f32 %v4167_v52, %v1996_v48  ;;  %425 = vst.msk [vmem:[#allocation2 + $0x68] sm:$0xff] %vm324_vm0, %v416_v49  ;;  %v3273_v49 = vld [vmem:[%s3927_s27 + $0x40] sm:$0xff] }
  0x99   : > { %v2471_v37 = vld [vmem:[#allocation2 + $0x198] sm:$0x1]  ;;  %6840 = vst [vmem:[#allocation45_spill] sm:$0xff] %v4308_v34  ;;  %v4314_v16 = vmul.f32 %v4167_v52, %v2000_v47  ;;  %427 = vst.msk [vmem:[#allocation2 + $0x88] sm:$0xff] %vm324_vm0, %v418_v17  ;;  %v3275_v17 = vld [vmem:[%s3927_s27 + $0x50] sm:$0xff] }
  0x9a   : > { %v2475_v50 = vld [vmem:[#allocation2 + $0x1b8] sm:$0x1]  ;;  %6841 = vst [vmem:[#allocation46_spill] sm:$0xff] %v4311_v62  ;;  %v4332_v36 = vmul.f32 %v4085_v3, %v2471_v37  ;;  %v3274_v37 = vld [vmem:[%s3927_s27 + $0x48] sm:$0xff]  ;;  %439 = vst.msk [vmem:[#allocation2 + $0xa8] sm:$0xff] %vm324_vm0, %v3273_v49 }
  0x9b   : > { %v2479_v58 = vld [vmem:[#allocation2 + $0x1d8] sm:$0x1]  ;;  %6842 = vst [vmem:[#allocation47_spill] sm:$0xff] %v4314_v16  ;;  %v4335_v63 = vmul.f32 %v4085_v3, %v2475_v50  ;;  %440 = vst.msk [vmem:[#allocation2 + $0xb0] sm:$0xff] %vm324_vm0, %v3274_v37  ;;  %v4370_v26 = vld [vmem:[#allocation6 + $0x5] ss:$0 sm:$0xff] }
  0x9c   : > { %v2483_v20 = vld [vmem:[#allocation2 + $0x1f8] sm:$0x1]  ;;  %6843 = vst [vmem:[#allocation48_spill] sm:$0xff] %v4332_v36  ;;  %v4338_v48 = vmul.f32 %v4085_v3, %v2479_v58  ;;  %441 = vst.msk [vmem:[#allocation2 + $0xc8] sm:$0xff] %vm324_vm0, %v3275_v17  ;;  %v3279_v49 = vld [vmem:[%s3927_s27 + $0x70] sm:$0xff] }
  0x9d   : > { %v2631_v46 = vld [vmem:[#allocation2 + $0x1b8] sm:$0x1]  ;;  %6844 = vst [vmem:[#allocation49_spill] sm:$0xff] %v4335_v63  ;;  %v4341_v23 = vmul.f32 %v4085_v3, %v2483_v20  ;;  %443 = vst.msk [vmem:[#allocation2 + $0xe8] sm:$0xff] %vm324_vm0, %v3277_v31  ;;  %v3283_v38 = vld [vmem:[%s3927_s27 + $0x90] sm:$0xff] }
  0x9e   : > { %v2635_v45 = vld [vmem:[#allocation2 + $0x1d8] sm:$0x1]  ;;  %6845 = vst [vmem:[#allocation50_spill] sm:$0xff] %v4338_v48  ;;  %v4349_v47 = vmul.f32 %v4167_v52, %v2631_v46  ;;  %445 = vst.msk [vmem:[#allocation2 + $0x108] sm:$0xff] %vm324_vm0, %v3279_v49  ;;  %v6852_v49 = vrot.slane %v4088_v6, 1  ;;  %v6854_v6 = vrot.slane %v4091_v7, 2 }
  0x9f   : > { %v2639_v13 = vld [vmem:[#allocation2 + $0x1f8] sm:$0x1]  ;;  %6846 = vst [vmem:[#allocation51_spill] sm:$0xff] %v4341_v23  ;;  %v4352_v50 = vmul.f32 %v4167_v52, %v2635_v45  ;;  %v4399_v23 = vld [vmem:[#allocation2 + $0x28] sm:$0xff]  ;;  %v489_v45 = vld [vmem:[#allocation2 + $0x30] sm:$0xff] }
  0xa0   : > { %v2643_v59 = vld [vmem:[#allocation2 + $0x218] sm:$0x1]  ;;  %6847 = vst [vmem:[#allocation52_spill] sm:$0xff] %v4349_v47  ;;  %v4355_v58 = vmul.f32 %v4167_v52, %v2639_v13  ;;  %v3282_v13 = vld [vmem:[%s3927_s27 + $0x88] sm:$0xff]  ;;  %459 = vst.msk [vmem:[#allocation2 + $0x148] sm:$0xff] %vm324_vm0, %v3283_v38  ;;  %v4421_v38 = vmul.f32 %v4081_v1, %v4399_v23  ;;  %v4451_v31 = vmul.f32 %v4085_v3, %v489_v45 }
  0xa1   : > { %v415_v60 = vld [vmem:[%s3927_s27 + $0x18] sm:$0xff]  ;;  %6848 = vst [vmem:[#allocation53_spill] sm:$0xff] %v4352_v50  ;;  %v4358_v20 = vmul.f32 %v4167_v52, %v2643_v59  ;;  %458 = vst.msk [vmem:[#allocation2 + $0x130] sm:$0xff] %vm324_vm0, %v3282_v13  ;;  %v4429_v13 = vmul.f32 %v4085_v3, %v4399_v23  ;;  %v508_v16 = vmul.f32 %v4081_v1, %v489_v45  ;;  %v4502_v0 = vld [vmem:[#allocation2 + $0x68] sm:$0xff] }
  0xa2   : > { %424 = vst.msk [vmem:[#allocation2 + $0x50] sm:$0xff] %vm324_vm0, %v415_v60  ;;  %v419_v60 = vld [vmem:[%s3927_s27 + $0x38] sm:$0xff]  ;;  %6849 = vst [vmem:[#allocation54_spill] sm:$0xff] %v4355_v58  ;;  %v4470_v50 = vmul.f32 %v4167_v52, %v489_v45  ;;  %v3289_v44 = vld [vmem:[%s3927_s27 + $0xc0] sm:$0xff]  ;;  %v4546_v30 = vmul.f32 %v4083_v2, %v4502_v0 }
  0xa3   : > { %6850 = vst [vmem:[#allocation55_spill] sm:$0xff] %v4358_v20  ;;  %428 = vst.msk [vmem:[#allocation2 + $0x90] sm:$0xff] %vm324_vm0, %v419_v60  ;;  %v3276_v46 = vld [vmem:[%s3927_s27 + $0x58] sm:$0xff]  ;;  %v3278_v60 = vld [vmem:[%s3927_s27 + $0x68] sm:$0xff]  ;;  %v4461_v20 = vmul.f32 %v4370_v26, %v489_v45 }
  0xa4   : > { %442 = vst.msk [vmem:[#allocation2 + $0xd0] sm:$0xff] %vm324_vm0, %v3276_v46  ;;  %444 = vst.msk [vmem:[#allocation2 + $0xf0] sm:$0xff] %vm324_vm0, %v3278_v60  ;;  %v3280_v17 = vld [vmem:[%s3927_s27 + $0x78] sm:$0xff]  ;;  %v3281_v46 = vld [vmem:[%s3927_s27 + $0x80] sm:$0xff]  ;;  %v6851_v60 = vrot.slane %v4097_v14, 1  ;;  %v6853_v14 = vrot.slane %v4105_v18, 2 }
  0xa5   : > { %446 = vst.msk [vmem:[#allocation2 + $0x110] sm:$0xff] %vm324_vm0, %v3280_v17  ;;  %457 = vst.msk [vmem:[#allocation2 + $0x128] sm:$0xff] %vm324_vm0, %v3281_v46  ;;  %v3284_v59 = vld [vmem:[%s3927_s27 + $0x98] sm:$0xff]  ;;  %v3286_v18 = vld [vmem:[%s3927_s27 + $0xa8] sm:$0xff] }
  0xa6   : > { %v550_v37 = vsel %vm547_vm2, %v6852_v49, %v6851_v60  ;;  %460 = vst.msk [vmem:[#allocation2 + $0x150] sm:$0xff] %vm324_vm0, %v3284_v59  ;;  %v4412_v46 = vsel %vm612_vm3, %v6854_v6, %v6853_v14  ;;  %v6855_v60 = vmov %v6854_v6  ;;  %v3285_v59 = vld [vmem:[%s3927_s27 + $0xa0] sm:$0xff]  ;;  %v4445_v6 = vmul.f32 %v4370_v26, %v4399_v23  ;;  %462 = vst.msk [vmem:[#allocation2 + $0x170] sm:$0xff] %vm324_vm0, %v3286_v18  ;;  %v3288_v34 = vld [vmem:[%s3927_s27 + $0xb8] sm:$0xff] }
  0xa7   : > { %v4405_v17 = vadd.f32 %v550_v37, %v4100_v15  ;;  %v4417_v49 = vadd.f32 %v6855_v60, %v4129_v32  ;;  %v4425_v15 = vmul.f32 %v4083_v2, %v4399_v23  ;;  %v6856_v37 = vrot.slane %v4208_v19, 2  ;;  %v4453_v19 = vld [vmem:[#allocation2 + $0x48] sm:$0xff]  ;;  %461 = vst.msk [vmem:[#allocation2 + $0x168] sm:$0xff] %vm324_vm0, %v3285_v59  ;;  %464 = vst.msk [vmem:[#allocation2 + $0x190] sm:$0xff] %vm324_vm0, %v3288_v34  ;;  %v3291_v34 = vld [vmem:[%s3927_s27 + $0xd0] sm:$0xff] }
  0xa8   : > { %v4441_v32 = vmul.f32 %v4093_v10, %v4399_v23  ;;  %v4448_v60 = vmul.f32 %v4083_v2, %v489_v45  ;;  %v4467_v59 = vmul.f32 %v4093_v10, %v489_v45  ;;  %v4481_v18 = vmul.f32 %v4081_v1, %v4453_v19  ;;  %v3287_v45 = vld [vmem:[%s3927_s27 + $0xb0] sm:$0xff]  ;;  %v3290_v33 = vld [vmem:[%s3927_s27 + $0xc8] sm:$0xff]  ;;  %6868 = vst [vmem:[#allocation64_spill] sm:$0xff] %v4546_v30 }
  0xa9   : > { %v4437_v7 = vsel %vm612_vm3, %v6853_v14, %v6856_v37  ;;  %v4472_v37 = vld [vmem:[#allocation2 + $0x50] sm:$0xff]  ;;  %v6857_v14 = vrot.slane %v4425_v15, 1  ;;  %v4485_v48 = vmul.f32 %v4083_v2, %v4453_v19  ;;  %v4489_v58 = vmul.f32 %v4085_v3, %v4453_v19  ;;  %463 = vst.msk [vmem:[#allocation2 + $0x188] sm:$0xff] %vm324_vm0, %v3287_v45  ;;  %475 = vst.msk [vmem:[#allocation2 + $0x1a8] sm:$0xff] %vm324_vm0, %v3289_v44  ;;  %v3294_v44 = vld [vmem:[%s3927_s27 + $0xe8] sm:$0xff] }
  0xaa   : > { %6858 = vst [vmem:[#allocation56_spill] sm:$0xff] %v4481_v18  ;;  %v6861_v47 = vrot.slane %v4448_v60, 1  ;;  %v4500_v62 = vmul.f32 %v4093_v10, %v4453_v19  ;;  %v4521_v45 = vmul.f32 %v4085_v3, %v4472_v37  ;;  %v4529_v61 = vmul.f32 %v4167_v52, %v4472_v37  ;;  %476 = vst.msk [vmem:[#allocation2 + $0x1b0] sm:$0xff] %vm324_vm0, %v3290_v33  ;;  %v3295_v33 = vld [vmem:[%s3927_s27 + $0xf0] sm:$0xff] }
  0xab   : > { %v4477_v63 = vadd.f32 %v6857_v14, %v4109_v21  ;;  %6859 = vst [vmem:[#allocation57_spill] sm:$0xff] %v4485_v48  ;;  %6860 = vst [vmem:[#allocation58_spill] sm:$0xff] %v4489_v58  ;;  %v4514_v14 = vmul.f32 %v4083_v2, %v4472_v37  ;;  %v511_v21 = vmul.f32 %v4081_v1, %v4472_v37  ;;  %v6865_v4 = vrot.slane %v4485_v48, 1  ;;  %v4548_v58 = vld [vmem:[#allocation2 + $0x70] sm:$0xff] }
  0xac   : > { %v4494_v36 = vadd.f32 %v6861_v47, %v508_v16  ;;  %v4510_v47 = vmul.f32 %v4370_v26, %v4453_v19  ;;  %6864 = vst [vmem:[#allocation61_spill] sm:$0xff] %v4521_v45  ;;  %v4525_v16 = vmul.f32 %v4370_v26, %v4472_v37  ;;  %v4542_v25 = vmul.f32 %v4093_v10, %v4472_v37  ;;  %v4579_v45 = vld [vmem:[#allocation2 + $0x88] sm:$0xff] }
  0xad   : > { %6863 = vst [vmem:[#allocation60_spill] sm:$0xff] %v4514_v14  ;;  %v4537_v57 = vadd.f32 %v6865_v4, %v4112_v22  ;;  %477 = vst.msk [vmem:[#allocation2 + $0x1c8] sm:$0xff] %vm324_vm0, %v3291_v34  ;;  %v3292_v22 = vld [vmem:[%s3927_s27 + $0xd8] sm:$0xff]  ;;  %v3293_v4 = vld [vmem:[%s3927_s27 + $0xe0] sm:$0xff]  ;;  %v4559_v18 = vmul.f32 %v4081_v1, %v4502_v0  ;;  %v4563_v48 = vmul.f32 %v4085_v3, %v4502_v0  ;;  %v6871_v34 = vrot.slane %v4514_v14, 1 }
  0xae   : > { %6862 = vst [vmem:[#allocation59_spill] sm:$0xff] %v4494_v36  ;;  %6867 = vst [vmem:[#allocation63_spill] sm:$0xff] %v4542_v25  ;;  %v4595_v5 = vmul.f32 %v4085_v3, %v4548_v58 }
  0xaf   : > { %6866 = vst [vmem:[#allocation62_spill] sm:$0xff] %v4537_v57  ;;  %6869 = vst [vmem:[#allocation65_spill] sm:$0xff] %v4559_v18  ;;  %v4571_v25 = vadd.f32 %v6871_v34, %v511_v21  ;;  %v6656_v57 = vrot.slane %v4546_v30, 1  ;;  %v4577_v18 = vmul.f32 %v4093_v10, %v4502_v0  ;;  %v4587_v21 = vmul.f32 %v4370_v26, %v4502_v0 }
  0xb0   : > { %6870 = vst [vmem:[#allocation66_spill] sm:$0xff] %v4563_v48  ;;  %478 = vst.msk [vmem:[#allocation2 + $0x1d0] sm:$0xff] %vm324_vm0, %v3292_v22  ;;  %v3296_v22 = vld [vmem:[%s3927_s27 + $0xf8] sm:$0xff]  ;;  %v4591_v34 = vmul.f32 %v4083_v2, %v4548_v58  ;;  %v4611_v48 = vmul.f32 %v4167_v52, %v4548_v58 }
  0xb1   : > { %479 = vst.msk [vmem:[#allocation2 + $0x1e8] sm:$0xff] %vm324_vm0, %v3293_v4  ;;  %6872 = vst [vmem:[#allocation67_spill] sm:$0xff] %v4571_v25  ;;  %v4607_v4 = vmul.f32 %v4370_v26, %v4548_v58  ;;  %v4613_v25 = vld [vmem:[#allocation2 + $0x90] sm:$0xff] }
  0xb2   : > { %6873 = vst [vmem:[#allocation68_spill] sm:$0xff] %v4577_v18  ;;  %6874 = vst [vmem:[#allocation69_spill] sm:$0xff] %v4579_v45  ;;  %v6886_v18 = vrot.slane %v4591_v34, 1  ;;  %v4649_v30 = vmul.f32 %v4370_v26, %v4613_v25 }
  0xb3   : > { %480 = vst.msk [vmem:[#allocation2 + $0x1f0] sm:$0xff] %vm324_vm0, %v3294_v44  ;;  %481 = vst.msk [vmem:[#allocation2 + $0x208] sm:$0xff] %vm324_vm0, %v3295_v33  ;;  %v4601_v44 = vadd.f32 %v6656_v57, %v4116_v27  ;;  %v514_v33 = vmul.f32 %v4081_v1, %v4548_v58  ;;  %v4619_v27 = vmul.f32 %v4093_v10, %v4548_v58 }
  0xb4   : > { %6875 = vst [vmem:[#allocation70_spill] sm:$0xff] %v4587_v21  ;;  %6876 = vst [vmem:[#allocation71_spill] sm:$0xff] %v4591_v34  ;;  %v4623_v57 = vmul.f32 %v4093_v10, %v4579_v45  ;;  %v4629_v21 = vmul.f32 %v4370_v26, %v4579_v45  ;;  %v4654_v34 = vmul.f32 %v4093_v10, %v4613_v25 }
  0xb5   : > { %6877 = vst [vmem:[#allocation72_spill] sm:$0xff] %v4595_v5  ;;  %482 = vst.msk [vmem:[#allocation2 + $0x210] sm:$0xff] %vm324_vm0, %v3296_v22  ;;  %v4633_v22 = vmul.f32 %v4083_v2, %v4579_v45  ;;  %v4637_v5 = vadd.f32 %v6886_v18, %v514_v33  ;;  %v4658_v18 = vmul.f32 %v4167_v52, %v4613_v25 }
  0xb6   : > { %6878 = vst [vmem:[#allocation73_spill] sm:$0xff] %v4601_v44  ;;  %6879 = vst [vmem:[#allocation74_spill] sm:$0xff] %v4607_v4  ;;  %v4645_v44 = vmul.f32 %v4085_v3, %v4579_v45  ;;  %v4662_v33 = vmul.f32 %v4083_v2, %v4613_v25 }
  0xb7   : > { %6880 = vst [vmem:[#allocation75_spill] sm:$0xff] %v4611_v48  ;;  %6881 = vst [vmem:[#allocation76_spill] sm:$0xff] %v4613_v25  ;;  %v6896_v48 = vrot.slane %v4633_v22, 1 }
  0xb8   : > { %6882 = vst [vmem:[#allocation77_spill] sm:$0xff] %v4619_v27  ;;  %6883 = vst [vmem:[#allocation78_spill] sm:$0xff] %v4623_v57  ;;  %v4641_v27 = vmul.f32 %v4081_v1, %v4579_v45  ;;  %v1187_v57 = vld [vmem:[#allocation2 + $0xa8] sm:$0xff]  ;;  %v1200_v45 = vmul.f32 %v4081_v1, %v4613_v25  ;;  %v6675_v14 = vrot.slane %v4662_v33, 1 }
  0xb9   : > { %6884 = vst [vmem:[#allocation79_spill] sm:$0xff] %v4629_v21  ;;  %6885 = vst [vmem:[#allocation80_spill] sm:$0xff] %v4633_v22  ;;  %v4670_v21 = vmul.f32 %v4085_v3, %v4613_v25  ;;  %v4677_v4 = vadd.f32 %v6896_v48, %v4136_v35  ;;  %v4689_v25 = vmul.f32 %v4085_v3, %v1187_v57 }
  0xba   : > { %6887 = vst [vmem:[#allocation81_spill] sm:$0xff] %v4637_v5  ;;  %6888 = vst [vmem:[#allocation82_spill] sm:$0xff] %v4641_v27  ;;  %v4681_v27 = vmul.f32 %v4081_v1, %v1187_v57  ;;  %v4684_v5 = vmul.f32 %v4083_v2, %v1187_v57  ;;  %v4692_v36 = vmul.f32 %v4093_v10, %v1187_v57 }
  0xbb   : > { %6889 = vst [vmem:[#allocation83_spill] sm:$0xff] %v4645_v44  ;;  %6890 = vst [vmem:[#allocation84_spill] sm:$0xff] %v4649_v30  ;;  %v4696_v35 = vadd.f32 %v6675_v14, %v1200_v45  ;;  %v1191_v30 = vld [vmem:[#allocation2 + $0xc8] sm:$0xff] }
  0xbc   : > { %6891 = vst [vmem:[#allocation85_spill] sm:$0xff] %v4654_v34  ;;  %6892 = vst [vmem:[#allocation86_spill] sm:$0xff] %v4658_v18  ;;  %v4672_v34 = vld [vmem:[#allocation2 + $0xb0] sm:$0xff]  ;;  %v6680_v48 = vrot.slane %v4684_v5, 1  ;;  %v4733_v22 = vmul.f32 %v4081_v1, %v1191_v30 }
  0xbd   : > { %6893 = vst [vmem:[#allocation87_spill] sm:$0xff] %v4662_v33  ;;  %6894 = vst [vmem:[#allocation88_spill] sm:$0xff] %v4670_v21  ;;  %v4704_v44 = vmul.f32 %v4083_v2, %v4672_v34  ;;  %v1203_v21 = vmul.f32 %v4081_v1, %v4672_v34  ;;  %v4715_v45 = vmul.f32 %v4370_v26, %v4672_v34 }
  0xbe   : > { %6895 = vst [vmem:[#allocation89_spill] sm:$0xff] %v4672_v34  ;;  %6897 = vst [vmem:[#allocation90_spill] sm:$0xff] %v4677_v4  ;;  %v4725_v4 = vmul.f32 %v4093_v10, %v4672_v34  ;;  %v4748_v33 = vmul.f32 %v4093_v10, %v1191_v30 }
  0xbf   : > { %6898 = vst [vmem:[#allocation91_spill] sm:$0xff] %v4681_v27  ;;  %6899 = vst [vmem:[#allocation92_spill] sm:$0xff] %v4684_v5  ;;  %v4700_v27 = vmul.f32 %v4370_v26, %v1187_v57  ;;  %v4720_v57 = vadd.f32 %v6680_v48, %v4143_v40  ;;  %v6688_v14 = vrot.slane %v4704_v44, 1  ;;  %v4736_v5 = vmul.f32 %v4083_v2, %v1191_v30 }
  0xc0   : > { %6900 = vst [vmem:[#allocation93_spill] sm:$0xff] %v4689_v25  ;;  %6901 = vst [vmem:[#allocation94_spill] sm:$0xff] %v4692_v36  ;;  %v4711_v36 = vmul.f32 %v4085_v3, %v4672_v34  ;;  %v4729_v25 = vmul.f32 %v4167_v52, %v4672_v34  ;;  %v4739_v40 = vmul.f32 %v4085_v3, %v1191_v30 }
  0xc1   : > { %6902 = vst [vmem:[#allocation95_spill] sm:$0xff] %v4696_v35  ;;  %6903 = vst [vmem:[#allocation96_spill] sm:$0xff] %v4700_v27  ;;  %v1192_v35 = vld [vmem:[#allocation2 + $0xd0] sm:$0xff]  ;;  %v4743_v48 = vadd.f32 %v6688_v14, %v1203_v21  ;;  %v1195_v27 = vld [vmem:[#allocation2 + $0xe8] sm:$0xff]  ;;  %v4753_v34 = vmul.f32 %v4370_v26, %v1191_v30 }
  0xc2   : > { %6904 = vst [vmem:[#allocation97_spill] sm:$0xff] %v4704_v44  ;;  %6905 = vst [vmem:[#allocation98_spill] sm:$0xff] %v4711_v36  ;;  %v4756_v18 = vmul.f32 %v4083_v2, %v1192_v35  ;;  %v1206_v21 = vmul.f32 %v4081_v1, %v1192_v35  ;;  %v4760_v14 = vmul.f32 %v4085_v3, %v1192_v35 }
  0xc3   : > { %6906 = vst [vmem:[#allocation99_spill] sm:$0xff] %v4720_v57  ;;  %6907 = vst [vmem:[#allocation100_spill] sm:$0xff] %v4725_v4  ;;  %v4763_v4 = vmul.f32 %v4370_v26, %v1192_v35  ;;  %v4766_v57 = vmul.f32 %v4167_v52, %v1192_v35 }
  0xc4   : > { %6908 = vst [vmem:[#allocation101_spill] sm:$0xff] %v4729_v25  ;;  %6909 = vst [vmem:[#allocation102_spill] sm:$0xff] %v4733_v22  ;;  %v6695_v22 = vrot.slane %v4736_v5, 1  ;;  %v6699_v30 = vrot.slane %v4756_v18, 1  ;;  %v4783_v25 = vmul.f32 %v4081_v1, %v1195_v27 }
  0xc5   : > { %6910 = vst [vmem:[#allocation103_spill] sm:$0xff] %v4736_v5  ;;  %6911 = vst [vmem:[#allocation104_spill] sm:$0xff] %v4739_v40  ;;  %v4775_v40 = vmul.f32 %v4093_v10, %v1192_v35  ;;  %v4786_v5 = vmul.f32 %v4085_v3, %v1195_v27 }
  0xc6   : > { %6912 = vst [vmem:[#allocation105_spill] sm:$0xff] %v4743_v48  ;;  %6913 = vst [vmem:[#allocation106_spill] sm:$0xff] %v4748_v33  ;;  %v4771_v36 = vadd.f32 %v6695_v22, %v4146_v41  ;;  %v4778_v48 = vmul.f32 %v4083_v2, %v1195_v27  ;;  %v1196_v33 = vld [vmem:[#allocation2 + $0xf0] sm:$0xff]  ;;  %v4790_v41 = vadd.f32 %v6699_v30, %v1206_v21 }
  0xc7   : > { %6914 = vst [vmem:[#allocation107_spill] sm:$0xff] %v4753_v34  ;;  %6915 = vst [vmem:[#allocation108_spill] sm:$0xff] %v4756_v18  ;;  %v1355_v34 = vld [vmem:[#allocation2 + $0x108] sm:$0xff]  ;;  %v4805_v18 = vmul.f32 %v4085_v3, %v1196_v33  ;;  %v1209_v30 = vmul.f32 %v4081_v1, %v1196_v33  ;;  %v4814_v35 = vmul.f32 %v4370_v26, %v1196_v33 }
  0xc8   : > { %6916 = vst [vmem:[#allocation109_spill] sm:$0xff] %v4760_v14  ;;  %6917 = vst [vmem:[#allocation110_spill] sm:$0xff] %v4771_v36  ;;  %v6703_v22 = vrot.slane %v4778_v48, 1  ;;  %v4795_v36 = vmul.f32 %v4093_v10, %v1195_v27  ;;  %v4799_v14 = vmul.f32 %v4370_v26, %v1195_v27  ;;  %v4817_v44 = vmul.f32 %v4167_v52, %v1196_v33  ;;  %v1356_v27 = vld [vmem:[#allocation2 + $0x110] sm:$0xff] }
  0xc9   : > { %6918 = vst [vmem:[#allocation111_spill] sm:$0xff] %v4775_v40  ;;  %6919 = vst [vmem:[#allocation112_spill] sm:$0xff] %v4778_v48  ;;  %v4825_v48 = vmul.f32 %v4093_v10, %v1355_v34 }
  0xca   : > { %6920 = vst [vmem:[#allocation113_spill] sm:$0xff] %v4783_v25  ;;  %6921 = vst [vmem:[#allocation114_spill] sm:$0xff] %v4786_v5  ;;  %v4802_v25 = vmul.f32 %v4083_v2, %v1196_v33  ;;  %v4810_v21 = vadd.f32 %v6703_v22, %v4149_v42  ;;  %v4846_v42 = vmul.f32 %v4370_v26, %v1356_v27  ;;  %v1830_v22 = vld [vmem:[#allocation2 + $0x128] sm:$0xff] }
  0xcb   : > { %6922 = vst [vmem:[#allocation115_spill] sm:$0xff] %v4790_v41  ;;  %6923 = vst [vmem:[#allocation116_spill] sm:$0xff] %v4795_v36  ;;  %v4822_v36 = vmul.f32 %v4093_v10, %v1196_v33  ;;  %v4840_v33 = vmul.f32 %v4081_v1, %v1355_v34  ;;  %v4843_v41 = vmul.f32 %v4085_v3, %v1355_v34 }
  0xcc   : > { %6924 = vst [vmem:[#allocation117_spill] sm:$0xff] %v4799_v14  ;;  %6925 = vst [vmem:[#allocation118_spill] sm:$0xff] %v4802_v25  ;;  %v6706_v5 = vrot.slane %v4802_v25, 1  ;;  %v4833_v14 = vmul.f32 %v4083_v2, %v1355_v34  ;;  %v1517_v25 = vld [vmem:[#allocation2 + $0x130] sm:$0xff] }
  0xcd   : > { %6926 = vst [vmem:[#allocation119_spill] sm:$0xff] %v4805_v18  ;;  %6927 = vst [vmem:[#allocation120_spill] sm:$0xff] %v4810_v21  ;;  %v4830_v21 = vmul.f32 %v4370_v26, %v1355_v34  ;;  %v4853_v18 = vmul.f32 %v4167_v52, %v1356_v27  ;;  %v1834_v34 = vld [vmem:[#allocation2 + $0x148] sm:$0xff] }
  0xce   : > { %6928 = vst [vmem:[#allocation121_spill] sm:$0xff] %v4817_v44  ;;  %6929 = vst [vmem:[#allocation122_spill] sm:$0xff] %v4822_v36  ;;  %v4837_v40 = vadd.f32 %v6706_v5, %v1209_v30  ;;  %v4856_v30 = vmul.f32 %v4083_v2, %v1356_v27  ;;  %v4871_v44 = vmul.f32 %v4081_v1, %v1830_v22 }
  0xcf   : > { %6930 = vst [vmem:[#allocation123_spill] sm:$0xff] %v4825_v48  ;;  %6931 = vst [vmem:[#allocation124_spill] sm:$0xff] %v4830_v21  ;;  %v6714_v48 = vrot.slane %v4833_v14, 1  ;;  %v4850_v21 = vmul.f32 %v4093_v10, %v1356_v27  ;;  %v4874_v5 = vmul.f32 %v4083_v2, %v1830_v22 }
  0xd0   : > { %6932 = vst [vmem:[#allocation125_spill] sm:$0xff] %v4833_v14  ;;  %6933 = vst [vmem:[#allocation126_spill] sm:$0xff] %v4837_v40  ;;  %v4862_v40 = vmul.f32 %v4085_v3, %v1356_v27  ;;  %v6718_v36 = vrot.slane %v4856_v30, 1  ;;  %v4898_v14 = vmul.f32 %v4085_v3, %v1517_v25 }
  0xd1   : > { %6934 = vst [vmem:[#allocation127_spill] sm:$0xff] %v4840_v33  ;;  %6935 = vst [vmem:[#allocation128_spill] sm:$0xff] %v4843_v41  ;;  %v1843_v33 = vmul.f32 %v4081_v1, %v1356_v27  ;;  %v4879_v27 = vmul.f32 %v4085_v3, %v1830_v22  ;;  %v4913_v41 = vmul.f32 %v4167_v52, %v1517_v25 }
  0xd2   : > { %6936 = vst [vmem:[#allocation129_spill] sm:$0xff] %v4846_v42  ;;  %6937 = vst [vmem:[#allocation130_spill] sm:$0xff] %v4850_v21  ;;  %v4867_v21 = vadd.f32 %v6714_v48, %v4170_v53  ;;  %v4882_v42 = vmul.f32 %v4093_v10, %v1830_v22  ;;  %v6722_v48 = vrot.slane %v4874_v5, 1 }
  0xd3   : > { %6938 = vst [vmem:[#allocation131_spill] sm:$0xff] %v4853_v18  ;;  %6939 = vst [vmem:[#allocation132_spill] sm:$0xff] %v4856_v30  ;;  %v4886_v53 = vadd.f32 %v6718_v36, %v1843_v33  ;;  %v4910_v36 = vmul.f32 %v4093_v10, %v1517_v25  ;;  %v4920_v30 = vmul.f32 %v4083_v2, %v1834_v34 }
  0xd4   : > { %6940 = vst [vmem:[#allocation133_spill] sm:$0xff] %v4862_v40  ;;  %6941 = vst [vmem:[#allocation134_spill] sm:$0xff] %v4867_v21  ;;  %v4893_v21 = vmul.f32 %v4083_v2, %v1517_v25  ;;  %v1846_v40 = vmul.f32 %v4081_v1, %v1517_v25  ;;  %v4906_v33 = vadd.f32 %v6722_v48, %v4173_v54 }
  0xd5   : > { %6942 = vst [vmem:[#allocation135_spill] sm:$0xff] %v4871_v44  ;;  %6943 = vst [vmem:[#allocation136_spill] sm:$0xff] %v4874_v5  ;;  %v4890_v44 = vmul.f32 %v4370_v26, %v1830_v22  ;;  %v4923_v54 = vmul.f32 %v4085_v3, %v1834_v34  ;;  %v4932_v5 = vmul.f32 %v4093_v10, %v1834_v34 }
  0xd6   : > { %6944 = vst [vmem:[#allocation137_spill] sm:$0xff] %v4879_v27  ;;  %6945 = vst [vmem:[#allocation138_spill] sm:$0xff] %v4882_v42  ;;  %v4901_v42 = vmul.f32 %v4370_v26, %v1517_v25  ;;  %v6728_v22 = vrot.slane %v4893_v21, 1  ;;  %v1835_v27 = vld [vmem:[#allocation2 + $0x150] sm:$0xff] }
  0xd7   : > { %6946 = vst [vmem:[#allocation139_spill] sm:$0xff] %v4886_v53  ;;  %6947 = vst [vmem:[#allocation140_spill] sm:$0xff] %v4890_v44  ;;  %v4917_v44 = vmul.f32 %v4081_v1, %v1834_v34  ;;  %v1838_v53 = vld [vmem:[#allocation2 + $0x168] sm:$0xff]  ;;  %v4940_v18 = vmul.f32 %v4083_v2, %v1835_v27  ;;  %v4947_v25 = vmul.f32 %v4370_v26, %v1835_v27 }
  0xd8   : > { %6948 = vst [vmem:[#allocation141_spill] sm:$0xff] %v4893_v21  ;;  %6949 = vst [vmem:[#allocation142_spill] sm:$0xff] %v4898_v14  ;;  %v4927_v48 = vadd.f32 %v6728_v22, %v1846_v40  ;;  %v1849_v40 = vmul.f32 %v4081_v1, %v1835_v27  ;;  %v4944_v22 = vmul.f32 %v4085_v3, %v1835_v27 }
  0xd9   : > { %6950 = vst [vmem:[#allocation143_spill] sm:$0xff] %v4906_v33  ;;  %6951 = vst [vmem:[#allocation144_spill] sm:$0xff] %v4910_v36  ;;  %v4937_v36 = vmul.f32 %v4370_v26, %v1834_v34  ;;  %v4950_v33 = vmul.f32 %v4167_v52, %v1835_v27  ;;  %v6739_v34 = vrot.slane %v4940_v18, 1 }
  0xda   : > { %6952 = vst [vmem:[#allocation145_spill] sm:$0xff] %v4913_v41  ;;  %6953 = vst [vmem:[#allocation146_spill] sm:$0xff] %v4917_v44  ;;  %v6735_v44 = vrot.slane %v4920_v30, 1  ;;  %v4967_v41 = vmul.f32 %v4081_v1, %v1838_v53 }
  0xdb   : > { %6954 = vst [vmem:[#allocation147_spill] sm:$0xff] %v4920_v30  ;;  %6955 = vst [vmem:[#allocation148_spill] sm:$0xff] %v4923_v54  ;;  %v4959_v54 = vmul.f32 %v4093_v10, %v1835_v27  ;;  %v4970_v30 = vmul.f32 %v4085_v3, %v1838_v53 }
  0xdc   : > { %6956 = vst [vmem:[#allocation149_spill] sm:$0xff] %v4927_v48  ;;  %6957 = vst [vmem:[#allocation150_spill] sm:$0xff] %v4932_v5  ;;  %v4955_v14 = vadd.f32 %v6735_v44, %v4176_v55  ;;  %v4962_v48 = vmul.f32 %v4083_v2, %v1838_v53  ;;  %v1839_v5 = vld [vmem:[#allocation2 + $0x170] sm:$0xff]  ;;  %v4974_v55 = vadd.f32 %v6739_v34, %v1849_v40 }
  0xdd   : > { %6958 = vst [vmem:[#allocation151_spill] sm:$0xff] %v4937_v36  ;;  %6959 = vst [vmem:[#allocation152_spill] sm:$0xff] %v4940_v18  ;;  %v1998_v36 = vld [vmem:[#allocation2 + $0x188] sm:$0xff]  ;;  %v4989_v18 = vmul.f32 %v4085_v3, %v1839_v5  ;;  %v1852_v34 = vmul.f32 %v4081_v1, %v1839_v5  ;;  %v4998_v27 = vmul.f32 %v4370_v26, %v1839_v5 }
  0xde   : > { %6960 = vst [vmem:[#allocation153_spill] sm:$0xff] %v4944_v22  ;;  %6961 = vst [vmem:[#allocation154_spill] sm:$0xff] %v4955_v14  ;;  %v6743_v44 = vrot.slane %v4962_v48, 1  ;;  %v4979_v14 = vmul.f32 %v4093_v10, %v1838_v53  ;;  %v4983_v22 = vmul.f32 %v4370_v26, %v1838_v53  ;;  %v5001_v21 = vmul.f32 %v4167_v52, %v1839_v5  ;;  %v1999_v53 = vld [vmem:[#allocation2 + $0x190] sm:$0xff] }
  0xdf   : > { %6962 = vst [vmem:[#allocation155_spill] sm:$0xff] %v4959_v54  ;;  %6963 = vst [vmem:[#allocation156_spill] sm:$0xff] %v4962_v48  ;;  %v5009_v48 = vmul.f32 %v4093_v10, %v1998_v36 }
  0xe0   : > { %6964 = vst [vmem:[#allocation157_spill] sm:$0xff] %v4967_v41  ;;  %6965 = vst [vmem:[#allocation158_spill] sm:$0xff] %v4970_v30  ;;  %v4986_v41 = vmul.f32 %v4083_v2, %v1839_v5  ;;  %v4994_v40 = vadd.f32 %v6743_v44, %v4179_v56  ;;  %v5030_v56 = vmul.f32 %v4370_v26, %v1999_v53  ;;  %v2473_v44 = vld [vmem:[#allocation2 + $0x1a8] sm:$0xff] }
  0xe1   : > { %6966 = vst [vmem:[#allocation159_spill] sm:$0xff] %v4974_v55  ;;  %6967 = vst [vmem:[#allocation160_spill] sm:$0xff] %v4979_v14  ;;  %v5006_v14 = vmul.f32 %v4093_v10, %v1839_v5  ;;  %v5024_v5 = vmul.f32 %v4081_v1, %v1998_v36  ;;  %v5027_v55 = vmul.f32 %v4085_v3, %v1998_v36 }
  0xe2   : > { %6968 = vst [vmem:[#allocation161_spill] sm:$0xff] %v4983_v22  ;;  %6969 = vst [vmem:[#allocation162_spill] sm:$0xff] %v4986_v41  ;;  %v6746_v30 = vrot.slane %v4986_v41, 1  ;;  %v5017_v22 = vmul.f32 %v4083_v2, %v1998_v36  ;;  %v2160_v41 = vld [vmem:[#allocation2 + $0x1b0] sm:$0xff] }
  0xe3   : > { %6970 = vst [vmem:[#allocation163_spill] sm:$0xff] %v4989_v18  ;;  %6971 = vst [vmem:[#allocation164_spill] sm:$0xff] %v4994_v40  ;;  %v5014_v40 = vmul.f32 %v4370_v26, %v1998_v36  ;;  %v5037_v18 = vmul.f32 %v4167_v52, %v1999_v53  ;;  %v2477_v36 = vld [vmem:[#allocation2 + $0x1c8] sm:$0xff] }
  0xe4   : > { %6972 = vst [vmem:[#allocation165_spill] sm:$0xff] %v5001_v21  ;;  %6973 = vst [vmem:[#allocation166_spill] sm:$0xff] %v5006_v14  ;;  %v5021_v54 = vadd.f32 %v6746_v30, %v1852_v34  ;;  %v5040_v34 = vmul.f32 %v4083_v2, %v1999_v53  ;;  %v5055_v21 = vmul.f32 %v4081_v1, %v2473_v44 }
  0xe5   : > { %6974 = vst [vmem:[#allocation167_spill] sm:$0xff] %v5009_v48  ;;  %6975 = vst [vmem:[#allocation168_spill] sm:$0xff] %v5014_v40  ;;  %v6754_v48 = vrot.slane %v5017_v22, 1  ;;  %v5034_v40 = vmul.f32 %v4093_v10, %v1999_v53  ;;  %v5058_v30 = vmul.f32 %v4083_v2, %v2473_v44 }
  0xe6   : > { %6976 = vst [vmem:[#allocation169_spill] sm:$0xff] %v5017_v22  ;;  %6977 = vst [vmem:[#allocation170_spill] sm:$0xff] %v5021_v54  ;;  %v5046_v54 = vmul.f32 %v4085_v3, %v1999_v53  ;;  %v6758_v14 = vrot.slane %v5040_v34, 1  ;;  %v5082_v22 = vmul.f32 %v4085_v3, %v2160_v41 }
  0xe7   : > { %6978 = vst [vmem:[#allocation171_spill] sm:$0xff] %v5024_v5  ;;  %6979 = vst [vmem:[#allocation172_spill] sm:$0xff] %v5027_v55  ;;  %v2486_v5 = vmul.f32 %v4081_v1, %v1999_v53  ;;  %v5063_v53 = vmul.f32 %v4085_v3, %v2473_v44  ;;  %v5097_v55 = vmul.f32 %v4167_v52, %v2160_v41 }
  0xe8   : > { %6980 = vst [vmem:[#allocation173_spill] sm:$0xff] %v5030_v56  ;;  %6981 = vst [vmem:[#allocation174_spill] sm:$0xff] %v5034_v40  ;;  %v5051_v40 = vadd.f32 %v6754_v48, %v4194_v8  ;;  %v5066_v56 = vmul.f32 %v4093_v10, %v2473_v44  ;;  %v6762_v48 = vrot.slane %v5058_v30, 1 }
  0xe9   : > { %6982 = vst [vmem:[#allocation175_spill] sm:$0xff] %v5037_v18  ;;  %6983 = vst [vmem:[#allocation176_spill] sm:$0xff] %v5040_v34  ;;  %v5070_v8 = vadd.f32 %v6758_v14, %v2486_v5  ;;  %v5094_v14 = vmul.f32 %v4093_v10, %v2160_v41  ;;  %v5104_v34 = vmul.f32 %v4083_v2, %v2477_v36 }
  0xea   : > { %6984 = vst [vmem:[#allocation177_spill] sm:$0xff] %v5046_v54  ;;  %6985 = vst [vmem:[#allocation178_spill] sm:$0xff] %v5051_v40  ;;  %v5077_v40 = vmul.f32 %v4083_v2, %v2160_v41  ;;  %v2489_v54 = vmul.f32 %v4081_v1, %v2160_v41  ;;  %v5090_v5 = vadd.f32 %v6762_v48, %v4197_v9 }
  0xeb   : > { %6986 = vst [vmem:[#allocation179_spill] sm:$0xff] %v5055_v21  ;;  %6987 = vst [vmem:[#allocation180_spill] sm:$0xff] %v5058_v30  ;;  %v5074_v21 = vmul.f32 %v4370_v26, %v2473_v44  ;;  %v5107_v9 = vmul.f32 %v4085_v3, %v2477_v36  ;;  %v5116_v30 = vmul.f32 %v4093_v10, %v2477_v36  ;;  %v3540_v3 = vld [vmem:[#allocation6 + $0x1] ss:$0 sm:$0xff] }
  0xec   : > { %6988 = vst [vmem:[#allocation181_spill] sm:$0xff] %v5063_v53  ;;  %6989 = vst [vmem:[#allocation182_spill] sm:$0xff] %v5066_v56  ;;  %v5085_v56 = vmul.f32 %v4370_v26, %v2160_v41  ;;  %v6766_v44 = vrot.slane %v5077_v40, 1  ;;  %v2478_v53 = vld [vmem:[#allocation2 + $0x1d0] sm:$0xff] }
  0xed   : > { %6990 = vst [vmem:[#allocation183_spill] sm:$0xff] %v5070_v8  ;;  %6991 = vst [vmem:[#allocation184_spill] sm:$0xff] %v5074_v21  ;;  %v5101_v21 = vmul.f32 %v4081_v1, %v2477_v36  ;;  %v2481_v8 = vld [vmem:[#allocation2 + $0x1e8] sm:$0xff]  ;;  %v6776_v1 = vrot.slane %v5104_v34, 1  ;;  %v5128_v41 = vmul.f32 %v4370_v26, %v2478_v53  ;;  %v5131_v10 = vmul.f32 %v4167_v52, %v2478_v53 }
  0xee   : > { %6992 = vst [vmem:[#allocation185_spill] sm:$0xff] %v5077_v40  ;;  %6993 = vst [vmem:[#allocation186_spill] sm:$0xff] %v5082_v22  ;;  %v5111_v48 = vadd.f32 %v6766_v44, %v2489_v54  ;;  %v5123_v22 = vmul.f32 %v3540_v3, %v2478_v53  ;;  %v3541_v54 = vld [vmem:[#allocation6] ss:$0 sm:$0xff]  ;;  %v2482_v40 = vld [vmem:[#allocation2 + $0x1f0] sm:$0xff] }
  0xef   : > { %6994 = vst [vmem:[#allocation187_spill] sm:$0xff] %v5085_v56  ;;  %6995 = vst [vmem:[#allocation188_spill] sm:$0xff] %v5090_v5  ;;  %v2492_v44 = vmul.f32 %v3541_v54, %v2478_v53  ;;  %v5136_v2 = vadd.f32 %v6776_v1, %v4201_v11  ;;  %v5145_v56 = vmul.f32 %v3541_v54, %v2481_v8 }
  0xf0   : > { %6996 = vst [vmem:[#allocation189_spill] sm:$0xff] %v5094_v14  ;;  %6997 = vst [vmem:[#allocation190_spill] sm:$0xff] %v5097_v55  ;;  %v5159_v14 = vmul.f32 %v4370_v26, %v2481_v8  ;;  %v5161_v55 = vmul.f32 %v3540_v3, %v2482_v40  ;;  %v5171_v1 = vmul.f32 %v4370_v26, %v2482_v40 }
  0xf1   : > { %6998 = vst [vmem:[#allocation191_spill] sm:$0xff] %v5101_v21  ;;  %6999 = vst [vmem:[#allocation192_spill] sm:$0xff] %v5104_v34  ;;  %v5121_v21 = vmul.f32 %v4370_v26, %v2477_v36  ;;  %v6780_v36 = vrot.slane %v5123_v22, 1  ;;  %v2641_v34 = vld [vmem:[#allocation2 + $0x208] sm:$0xff] }
  0xf2   : > { %7000 = vst [vmem:[#allocation193_spill] sm:$0xff] %v5107_v9  ;;  %7001 = vst [vmem:[#allocation194_spill] sm:$0xff] %v5111_v48  ;;  %v3542_v48 = vld [vmem:[#allocation6 + $0x2] ss:$0 sm:$0xff]  ;;  %v3543_v9 = vld [vmem:[#allocation6 + $0x4] ss:$0 sm:$0xff] }
  0xf3   : > { %7002 = vst [vmem:[#allocation195_spill] sm:$0xff] %v5116_v30  ;;  %7003 = vst [vmem:[#allocation196_spill] sm:$0xff] %v5121_v21  ;;  %v5125_v5 = vmul.f32 %v3542_v48, %v2478_v53  ;;  %v5139_v30 = vmul.f32 %v3543_v9, %v2478_v53  ;;  %v5141_v21 = vmul.f32 %v3540_v3, %v2481_v8 }
  0xf4   : > { %7005 = vst [vmem:[#allocation198_spill] sm:$0xff] %v5136_v2  ;;  %7008 = vst [vmem:[#allocation201_spill] sm:$0xff] %v5145_v56  ;;  %v5147_v18 = vmul.f32 %v3542_v48, %v2481_v8  ;;  %v5151_v11 = vadd.f32 %v6780_v36, %v2492_v44  ;;  %v5155_v2 = vmul.f32 %v3543_v9, %v2481_v8  ;;  %v830_v8 = vld [vmem:[#allocation2 + $0x40] sm:$0xff] }
  0xf5   : > { %7004 = vst [vmem:[#allocation197_spill] sm:$0xff] %v5125_v5  ;;  %7006 = vst [vmem:[#allocation199_spill] sm:$0xff] %v5139_v30  ;;  %v6783_v53 = vrot.slane %v5141_v21, 1  ;;  %v5163_v56 = vmul.f32 %v3542_v48, %v2482_v40  ;;  %v2642_v5 = vld [vmem:[#allocation2 + $0x210] sm:$0xff]  ;;  %v2495_v36 = vmul.f32 %v3541_v54, %v2482_v40  ;;  %v5178_v30 = vmul.f32 %v3543_v9, %v2482_v40 }
  0xf6   : > { %7007 = vst [vmem:[#allocation200_spill] sm:$0xff] %v5141_v21  ;;  %7009 = vst [vmem:[#allocation202_spill] sm:$0xff] %v5147_v18  ;;  %v5180_v48 = vmul.f32 %v3543_v9, %v2641_v34  ;;  %v5182_v18 = vld [vmem:[#allocation6 + $0x8] ss:$0 sm:$0xff]  ;;  %v689_v54 = vadd.f32 %v4119_v28, %v4417_v49  ;;  %v7023_v49 = vrot.slane %v4461_v20, 1 }
  0xf7   : > { %7010 = vst [vmem:[#allocation203_spill] sm:$0xff] %v5151_v11  ;;  %7011 = vst [vmem:[#allocation204_spill] sm:$0xff] %v5161_v55  ;;  %v5168_v44 = vadd.f32 %v6783_v53, %v4205_v12  ;;  %v5174_v11 = vmul.f32 %v4167_v52, %v2482_v40  ;;  %v5187_v53 = vmul.f32 %v4370_v26, %v2641_v34  ;;  %v7020_v40 = vrot.slane %v5161_v55, 1 }
  0xf8   : > { %7012 = vst [vmem:[#allocation205_spill] sm:$0xff] %v5163_v56  ;;  %7014 = vst [vmem:[#allocation207_spill] sm:$0xff] %v5171_v1  ;;  %v5190_v52 = vmul.f32 %v4370_v26, %v2642_v5  ;;  %v646_v12 = vadd.f32 %v4412_v46, %v4405_v17  ;;  %v5210_v56 = vld [vmem:[#allocation6 + $0xa] ss:$0 sm:$0xff]  ;;  %v850_v17 = vmul.f32 %v5182_v18, %v830_v8 }
  0xf9   : > { %7013 = vst [vmem:[#allocation206_spill] sm:$0xff] %v5168_v44  ;;  %7015 = vst [vmem:[#allocation208_spill] sm:$0xff] %v5174_v11  ;;  %v5192_v44 = vld [vmem:[#allocation6 + $0x9] ss:$0 sm:$0xff]  ;;  %v5196_v3 = vadd.f32 %v7020_v40, %v2495_v36  ;;  %v721_v36 = vrot.slane %v4445_v6, 1  ;;  %v851_v28 = vmul.f32 %v5182_v18, %v4453_v19  ;;  %v935_v8 = vmul.f32 %v5210_v56, %v4472_v37 }
  0xfa   : > { %7016 = vst [vmem:[#allocation209_spill] sm:$0xff] %v5178_v30  ;;  %7017 = vst [vmem:[#allocation210_spill] sm:$0xff] %v5180_v48  ;;  %v5198_v48 = vmul.f32 %v3543_v9, %v2642_v5  ;;  %v690_v40 = vadd.f32 %v4441_v32, %v646_v12  ;;  %v878_v46 = vmul.f32 %v5192_v44, %v4453_v19  ;;  %v7024_v12 = vrot.slane %v4470_v50, 2 }
  0xfb   : > { %7018 = vst [vmem:[#allocation211_spill] sm:$0xff] %v5187_v53  ;;  %7019 = vst [vmem:[#allocation212_spill] sm:$0xff] %v5190_v52  ;;  %v5205_v53 = vld [vmem:[#allocation6 + $0x6] ss:$0 sm:$0xff]  ;;  %v745_v34 = vadd.f32 %v721_v36, %v689_v54  ;;  %v879_v6 = vmul.f32 %v5192_v44, %v4472_v37  ;;  %v934_v32 = vmul.f32 %v5210_v56, %v4453_v19 }
  0xfc   : > { %7021 = vst [vmem:[#allocation213_spill] sm:$0xff] %v5196_v3  ;;  %7022 = vst [vmem:[#allocation214_spill] sm:$0xff] %v5198_v48  ;;  %v5208_v26 = vmul.f32 %v5205_v53, %v2642_v5  ;;  %v761_v9 = vmul.f32 %v5205_v53, %v4399_v23  ;;  %v723_v5 = vsel %vm547_vm2, %v721_v36, %v7023_v49  ;;  %v894_v3 = vrot.slane %v878_v46, 1  ;;  %v833_v36 = vld [vmem:[#allocation2 + $0x58] sm:$0x1] }
  0xfd   : > { %v746_v23 = vadd.f32 %v723_v5, %v690_v40  ;;  %v895_v55 = vrot.slane %v879_v6, 1  ;;  %v647_v54 = vadd.f32 %v4437_v7, %v4140_v39  ;;  %v958_v49 = vrot.slane %v934_v32, 2 }
  0xfe   : > { %v785_v48 = vrot.slane %v761_v9, 2  ;;  %v959_v40 = vrot.slane %v935_v8, 2  ;;  %v7025_v46 = vrot.slane %v4223_v43, 2  ;;  %v7026_v5 = vmov %v7024_v12 }
  0xff   : > { %v896_v1 = vsel %vm547_vm2, %v894_v3, %v895_v55  ;;  %v936_v7 = vmul.f32 %v5210_v56, %v833_v36  ;;  %v7028_v43 = vrot.slane %v4425_v15, 1  ;;  %v764_v36 = vmul.f32 %v5205_v53, %v4453_v19 }
 0x100   : > { %v787_v52 = vsel %vm612_vm3, %v785_v48, %v7024_v12  ;;  %v817_v21 = vadd.f32 %v785_v48, %v745_v34  ;;  %v789_v30 = vsel %vm612_vm3, %v7026_v5, %v7025_v46  ;;  %v691_v12 = vadd.f32 %v4467_v59, %v647_v54 }
 0x101   : > { %v818_v9 = vadd.f32 %v787_v52, %v746_v23  ;;  %v852_v48 = vmul.f32 %v5182_v18, %v4472_v37  ;;  %v960_v39 = vsel %vm612_vm3, %v958_v49, %v959_v40  ;;  %v7027_v52 = vrot.slane %v4448_v60, 1  ;;  %v5262_v60 = vld [vmem:[%s6609_s2] ss:$0 sm:$0xff] }
 0x102   : > { %v862_v11 = vadd.f32 %v850_v17, %v817_v21  ;;  %v7029_v21 = vrot.slane %v4461_v20, 1  ;;  %v7030_v23 = vrot.slane %v4451_v31, 2  ;;  %v7031_v37 = vrot.slane %v4429_v13, 2 }
 0x103   : > { %v863_v34 = vadd.f32 %v851_v28, %v818_v9  ;;  %v553_v50 = vsel %vm547_vm2, %v7028_v43, %v7027_v52  ;;  %v961_v32 = vrot.slane %v936_v7, 2  ;;  %v834_v9 = vld [vmem:[#allocation2 + $0x60] sm:$0xff]  ;;  %v2760_v46 = vrot.slane %v5208_v26, 2 }
 0x104   : > { %v918_v6 = vadd.f32 %v894_v3, %v862_v11  ;;  %v747_v17 = vadd.f32 %v7029_v21, %v691_v12  ;;  %v576_v59 = vadd.f32 %v553_v50, %v4421_v38  ;;  %v620_v28 = vsel %vm612_vm3, %v7031_v37, %v7030_v23 }
 0x105   : > { %v919_v15 = vadd.f32 %v896_v1, %v863_v34  ;;  %v7032_v11 = vmov %v7031_v37  ;;  %v724_v3 = vrot.slane %v4510_v47, 1  ;;  %v962_v12 = vsel %vm612_vm3, %v959_v40, %v961_v32 }
 0x106   : > { %v648_v20 = vadd.f32 %v7032_v11, %v4477_v63  ;;  %v990_v38 = vadd.f32 %v958_v49, %v918_v6  ;;  %v819_v8 = vadd.f32 %v789_v30, %v747_v17  ;;  %v649_v54 = vadd.f32 %v620_v28, %v576_v59 }
 0x107   : > { %v991_v5 = vadd.f32 %v960_v39, %v919_v15  ;;  %v790_v47 = vrot.slane %v764_v36, 2  ;;  %v7033_v49 = vrot.slane %v4525_v16, 1  ;;  %v853_v52 = vmul.f32 %v5182_v18, %v834_v9 }
 0x108   : > { %v692_v1 = vadd.f32 %v4122_v29, %v648_v20  ;;  %v1008_v34 = vadd.f32 %v5262_v60, %v990_v38  ;;  %v864_v13 = vadd.f32 %v852_v48, %v819_v8  ;;  %v693_v63 = vadd.f32 %v4500_v62, %v649_v54 }
 0x109   : > { %v1009_v30 = vadd.f32 %v5262_v60, %v991_v5  ;;  %v726_v19 = vsel %vm547_vm2, %v724_v3, %v7033_v49  ;;  %v854_v29 = vmul.f32 %v5182_v18, %v4502_v0  ;;  %v7034_v62 = vrot.slane %v4529_v61, 2 }
 0x10a   : > { %v748_v7 = vadd.f32 %v724_v3, %v692_v1  ;;  %v1032_v39 = vmul.f32 0.70710677, %v1008_v34  ;;  %v920_v43 = vadd.f32 %v895_v55, %v864_v13  ;;  %v749_v40 = vadd.f32 %v726_v19, %v693_v63  ;;  %v837_v3 = vld [vmem:[#allocation2 + $0x78] sm:$0x1]  ;;  %v7039_v19 = vld [vmem:[#allocation59_spill] sm:$0xff] }
 0x10b   : > { %v5282_v50 = vmul.f32 0.5, %v1008_v34  ;;  %v1033_v48 = vmul.f32 0.70710677, %v1009_v30  ;;  %v792_v6 = vsel %vm612_vm3, %v790_v47, %v7034_v62  ;;  %v880_v23 = vmul.f32 %v5192_v44, %v4502_v0 }
 0x10c   : > { %v820_v21 = vadd.f32 %v790_v47, %v748_v7  ;;  %3444 = verf.f32 %v1032_v39  ;;  %v992_v17 = vadd.f32 %v962_v12, %v920_v43  ;;  %v821_v59 = vadd.f32 %v792_v6, %v749_v40  ;;  %v7040_v43 = vld [vmem:[#allocation63_spill] sm:$0xff] }
 0x10d   : > { %3446 = verf.f32 %v1033_v48  ;;  %v5291_v37 = vmul.f32 %v5192_v44, %v4548_v58  ;;  %v937_v28 = vmul.f32 %v5210_v56, %v4502_v0  ;;  %v897_v11 = vrot.slane %v880_v23, 1  ;;  %v7045_v23 = vld [vmem:[#allocation56_spill] sm:$0xff] }
 0x10e   : > { %v865_v55 = vadd.f32 %v853_v52, %v820_v21  ;;  %v1010_v15 = vadd.f32 %v5262_v60, %v992_v17  ;;  %v866_v32 = vadd.f32 %v854_v29, %v821_v59  ;;  %v938_v20 = vmul.f32 %v5210_v56, %v4548_v58  ;;  %v7041_v29 = vld [vmem:[#allocation60_spill] sm:$0xff] }
 0x10f   : > { %v1021_v38 = vmul.f32 0.5, %v1009_v30  ;;  %v898_v8 = vrot.slane %v5291_v37, 1  ;;  %v963_v54 = vrot.slane %v937_v28, 2  ;;  %v7035_v36 = vrot.slane %v4211_v24, 2  ;;  %v7046_v37 = vld [vmem:[#allocation62_spill] sm:$0xff] }
 0x110   : > { %v7036_v9 = vrot.slane %v4451_v31, 2  ;;  %v1034_v12 = vmul.f32 0.70710677, %v1010_v15  ;;  %v921_v1 = vadd.f32 %v897_v11, %v865_v55  ;;  %v964_v34 = vrot.slane %v938_v20, 2  ;;  %v7047_v28 = vld [vmem:[#allocation58_spill] sm:$0xff] }
 0x111   : > { %v7037_v13 = vrot.slane %v4226_v51, 2  ;;  %v7038_v63 = vmov %v7034_v62  ;;  %v5309_v49 = vmul.f32 0.5, %v1010_v15  ;;  %v899_v30 = vsel %vm547_vm2, %v897_v11, %v898_v8  ;;  %v7043_v62 = vld [vmem:[#allocation57_spill] sm:$0xff] }
 0x112   : > { %v622_v5 = vsel %vm612_vm3, %v7036_v9, %v7035_v36  ;;  %v939_v24 = vmul.f32 %v5210_v56, %v837_v3  ;;  %3448 = verf.f32 %v1034_v12  ;;  %v922_v31 = vadd.f32 %v899_v30, %v866_v32  ;;  %v7050_v3 = vld [vmem:[#allocation61_spill] sm:$0xff] }
 0x113   : > { %v794_v47 = vsel %vm612_vm3, %v7038_v63, %v7037_v13  ;;  %v650_v7 = vadd.f32 %v622_v5, %v7039_v19  ;;  %v993_v52 = vadd.f32 %v963_v54, %v921_v1  ;;  %v855_v39 = vmul.f32 %v5182_v18, %v4548_v58  ;;  %v7053_v5 = vld [vmem:[#allocation70_spill] sm:$0xff] }
 0x114   : > { %v965_v51 = vsel %vm612_vm3, %v963_v54, %v964_v34  ;;  %v966_v40 = vrot.slane %v939_v24, 2  ;;  %v7042_v48 = vrot.slane %v7041_v29, 1  ;;  %v7044_v6 = vrot.slane %v7043_v62, 1  ;;  %v7055_v29 = vld [vmem:[#allocation74_spill] sm:$0xff]  ;;  %v839_v62 = vld [vmem:[#allocation2 + $0x88] sm:$0xff] }
 0x115   : > { %v694_v61 = vadd.f32 %v7040_v43, %v650_v7  ;;  %v994_v17 = vadd.f32 %v965_v51, %v922_v31  ;;  %v1011_v59 = vadd.f32 %v5262_v60, %v993_v52  ;;  %v7048_v15 = vrot.slane %v7047_v28, 2  ;;  %v7054_v31 = vld [vmem:[#allocation12_spill] sm:$0xff]  ;;  %v838_v51 = vld [vmem:[#allocation2 + $0x80] sm:$0xff] }
 0x116   : > { %v556_v21 = vsel %vm547_vm2, %v7044_v6, %v7042_v48  ;;  %v7049_v32 = vrot.slane %v4525_v16, 1  ;;  %v967_v20 = vsel %vm612_vm3, %v964_v34, %v966_v40  ;;  %v7051_v54 = vrot.slane %v7050_v3, 2  ;;  %v3445_v1 = vpop.eup %3444  ;;  %v5346_v43 = vld [vmem:[%s6610_s3] ss:$0 sm:$0xff] }
 0x117   : > { %v579_v55 = vadd.f32 %v556_v21, %v7045_v23  ;;  %v651_v58 = vadd.f32 %v7048_v15, %v7046_v37  ;;  %v7052_v36 = vmov %v7048_v15  ;;  %v727_v12 = vrot.slane %v7053_v5, 1  ;;  %v3447_v16 = vpop.eup %3446  ;;  %v5356_v23 = vld [vmem:[%s6611_s4] ss:$0 sm:$0xff] }
 0x118   : > { %v750_v11 = vadd.f32 %v7049_v32, %v694_v61  ;;  %v625_v9 = vsel %vm612_vm3, %v7052_v36, %v7051_v54  ;;  %v1012_v13 = vadd.f32 %v5262_v60, %v994_v17  ;;  %v1035_v63 = vmul.f32 0.70710677, %v1011_v59  ;;  %v7058_v54 = vld [vmem:[#allocation75_spill] sm:$0xff] }
 0x119   : > { %v652_v30 = vadd.f32 %v625_v9, %v579_v55  ;;  %v767_v19 = vmul.f32 %v5205_v53, %v4502_v0  ;;  %v1056_v7 = vadd.f32 1.0, %v3445_v1  ;;  %v5340_v34 = vmul.f32 0.5, %v1011_v59 }
 0x11a   : > { %v822_v24 = vadd.f32 %v794_v47, %v750_v11  ;;  %v695_v52 = vadd.f32 %v7054_v31, %v651_v58  ;;  %v1057_v61 = vadd.f32 1.0, %v3447_v16  ;;  %v1036_v40 = vmul.f32 0.70710677, %v1012_v13  ;;  %v7057_v47 = vld [vmem:[#allocation68_spill] sm:$0xff] }
 0x11b   : > { %3450 = verf.f32 %v1035_v63  ;;  %v7056_v48 = vrot.slane %v7055_v29, 1  ;;  %v1068_v6 = vmul.f32 %v1056_v7, %v5282_v50  ;;  %v696_v17 = vadd.f32 %v7057_v47, %v652_v30  ;;  %v7060_v16 = vld [vmem:[#allocation76_spill] sm:$0xff] }
 0x11c   : > { %v867_v21 = vadd.f32 %v855_v39, %v822_v24  ;;  %v751_v59 = vadd.f32 %v727_v12, %v695_v52  ;;  %v1069_v55 = vmul.f32 %v1057_v61, %v1021_v38  ;;  %3452 = verf.f32 %v1036_v40  ;;  %v3449_v39 = vpop.eup %3448 }
 0x11d   : > { %v729_v0 = vsel %vm547_vm2, %v727_v12, %v7056_v48  ;;  %v795_v37 = vrot.slane %v767_v19, 2  ;;  %v856_v28 = vmul.f32 %v5182_v18, %v838_v51  ;;  %v1086_v15 = vmul.f32 %v5346_v43, %v1068_v6 }
 0x11e   : > { %v923_v58 = vadd.f32 %v898_v8, %v867_v21  ;;  %v752_v32 = vadd.f32 %v729_v0, %v696_v17  ;;  %v857_v50 = vmul.f32 %v5182_v18, %v839_v62  ;;  %v1087_v11 = vmul.f32 %v5346_v43, %v1069_v55 }
 0x11f   : > { %v7059_v36 = vrot.slane %v7058_v54, 2  ;;  %v823_v5 = vadd.f32 %v795_v37, %v751_v59  ;;  %v882_v38 = vmul.f32 %v5192_v44, %v839_v62  ;;  %v1104_v12 = vadd.f32 %v5356_v23, %v1086_v15 }
 0x120   : > { %v1058_v1 = vadd.f32 1.0, %v3449_v39  ;;  %v995_v63 = vadd.f32 %v967_v20, %v923_v58  ;;  %v1105_v8 = vadd.f32 %v5356_v23, %v1087_v11  ;;  %v5370_v7 = vmul.f32 %v5192_v44, %v7060_v16  ;;  %v7064_v58 = vld [vmem:[#allocation42_spill] sm:$0xff] }
 0x121   : > { %v797_v9 = vsel %vm612_vm3, %v795_v37, %v7059_v36  ;;  %v868_v19 = vadd.f32 %v856_v28, %v823_v5  ;;  %v900_v24 = vrot.slane %v882_v38, 1  ;;  %v1137_v31 = vrot.slane %v1104_v12, 7  ;;  %v7061_v28 = vld [vmem:[#allocation22_spill] sm:$0xff]  ;;  %v7065_v38 = vld [vmem:[#allocation67_spill] sm:$0xff] }
 0x122   : > { %v824_v30 = vadd.f32 %v797_v9, %v752_v32  ;;  %v1070_v52 = vmul.f32 %v1058_v1, %v5309_v49  ;;  %v1013_v51 = vadd.f32 %v5262_v60, %v995_v63  ;;  %v1138_v40 = vrot.slane %v1105_v8, 7 }
 0x123   : > { %v901_v48 = vrot.slane %v5370_v7, 1  ;;  %v924_v0 = vadd.f32 %v900_v24, %v868_v19  ;;  %v940_v20 = vmul.f32 %v5210_v56, %v839_v62  ;;  %v1024_v21 = vmul.f32 0.5, %v1012_v13 }
 0x124   : > { %v869_v61 = vadd.f32 %v857_v50, %v824_v30  ;;  %v1088_v6 = vmul.f32 %v5346_v43, %v1070_v52  ;;  %v1037_v47 = vmul.f32 0.70710677, %v1013_v51  ;;  %v5379_v17 = vmul.f32 %v5210_v56, %v7060_v16  ;;  %v7067_v52 = vld [vmem:[#allocation25_spill] sm:$0xff] }
 0x125   : > { %v3451_v59 = vpop.eup %3450  ;;  %v1139_v49 = vsel %vm1136_vm4, %v1137_v31, %v1138_v40  ;;  %v902_v55 = vsel %vm547_vm2, %v900_v24, %v901_v48  ;;  %v968_v37 = vrot.slane %v940_v20, 2  ;;  %v7062_v15 = vrot.slane %v7061_v28, 2  ;;  %v7066_v24 = vld [vmem:[#allocation77_spill] sm:$0xff] }
 0x126   : > { %v7063_v62 = vrot.slane %v7050_v3, 2  ;;  %v1165_v32 = vadd.f32 %v1139_v49, %v7064_v58  ;;  %v1106_v50 = vadd.f32 %v5356_v23, %v1088_v6  ;;  %v1059_v39 = vadd.f32 1.0, %v3451_v59  ;;  %v3453_v11 = vpop.eup %3452  ;;  %v841_v6 = vld [vmem:[#allocation2 + $0x98] sm:$0x1]  ;;  %v7070_v59 = vld [vmem:[#allocation43_spill] sm:$0xff] }
 0x127   : > { %3454 = verf.f32 %v1037_v47  ;;  %v925_v36 = vadd.f32 %v902_v55, %v869_v61  ;;  %v969_v9 = vrot.slane %v5379_v17, 2  ;;  %v996_v5 = vadd.f32 %v968_v37, %v924_v0 }
 0x128   : > { %v627_v13 = vsel %vm612_vm3, %v7063_v62, %v7062_v15  ;;  %1173 = vst.msk [vmem:[%s5396_s11] sm:$0xff] %vm324_vm0, %v1165_v32  ;;  %v1140_v3 = vrot.slane %v1106_v50, 7  ;;  %v1060_v1 = vadd.f32 1.0, %v3453_v11  ;;  %v1071_v63 = vmul.f32 %v1059_v39, %v5340_v34  ;;  %v7072_v32 = vld [vmem:[#allocation71_spill] sm:$0xff]  ;;  %v7074_v50 = vld [vmem:[#allocation64_spill] sm:$0xff] }
 0x129   : > { %v653_v12 = vadd.f32 %v627_v13, %v7065_v38  ;;  %v1025_v30 = vmul.f32 0.5, %v1013_v51  ;;  %v970_v8 = vsel %vm612_vm3, %v968_v37, %v969_v9  ;;  %v1014_v19 = vadd.f32 %v5262_v60, %v996_v5  ;;  %v7076_v38 = vld [vmem:[#allocation72_spill] sm:$0xff] }
 0x12a   : > { %v7068_v61 = vrot.slane %v7067_v52, 2  ;;  %v7069_v0 = vrot.slane %v7058_v54, 2  ;;  %v1141_v47 = vsel %vm1136_vm4, %v1138_v40, %v1140_v3  ;;  %v1072_v17 = vmul.f32 %v1060_v1, %v1024_v21  ;;  %v7078_v3 = vld [vmem:[#allocation66_spill] sm:$0xff]  ;;  %v7081_v52 = vld [vmem:[#allocation73_spill] sm:$0xff] }
 0x12b   : > { %v697_v31 = vadd.f32 %v7066_v24, %v653_v12  ;;  %v1089_v34 = vmul.f32 %v5346_v43, %v1071_v63  ;;  %v997_v51 = vadd.f32 %v970_v8, %v925_v36  ;;  %v1166_v49 = vadd.f32 %v1141_v47, %v7070_v59  ;;  %v7080_v24 = vld [vmem:[#allocation65_spill] sm:$0xff] }
 0x12c   : > { %v799_v20 = vsel %vm612_vm3, %v7069_v0, %v7068_v61  ;;  %v1038_v55 = vmul.f32 0.70710677, %v1014_v19  ;;  %v7071_v37 = vrot.slane %v7055_v29, 1  ;;  %v858_v15 = vmul.f32 %v5182_v18, %v7060_v16 }
 0x12d   : > { %v1090_v54 = vmul.f32 %v5346_v43, %v1072_v17  ;;  %v1107_v62 = vadd.f32 %v5356_v23, %v1089_v34  ;;  %v1015_v13 = vadd.f32 %v5262_v60, %v997_v51  ;;  %v942_v40 = vmul.f32 %v5210_v56, %v841_v6  ;;  %1174 = vst.msk [vmem:[%s5396_s11 + $0x8] sm:$0xff] %vm324_vm0, %v1166_v49  ;;  %v1118_v6 = vld [vmem:[%s3927_s27 + $0x10] sm:$0xff]  ;;  %v7083_v17 = vld [vmem:[#allocation79_spill] sm:$0xff] }
 0x12e   : > { %v753_v28 = vadd.f32 %v7071_v37, %v697_v31  ;;  %v1026_v21 = vmul.f32 0.5, %v1014_v19  ;;  %3456 = verf.f32 %v1038_v55  ;;  %v7073_v29 = vrot.slane %v7072_v32, 1  ;;  %v7084_v51 = vld [vmem:[#allocation69_spill] sm:$0xff] }
 0x12f   : > { %v7075_v39 = vrot.slane %v7074_v50, 1  ;;  %v1108_v11 = vadd.f32 %v5356_v23, %v1090_v54  ;;  %v1142_v36 = vrot.slane %v1107_v62, 7  ;;  %v1039_v5 = vmul.f32 0.70710677, %v1015_v13 }
 0x130   : > { %v825_v58 = vadd.f32 %v799_v20, %v753_v28  ;;  %v7077_v12 = vrot.slane %v7076_v38, 2  ;;  %v7079_v1 = vrot.slane %v7078_v3, 2  ;;  %v971_v19 = vrot.slane %v942_v40, 2  ;;  %v7085_v40 = vld [vmem:[#allocation13_spill] sm:$0xff]  ;;  %v7089_v3 = vld [vmem:[#allocation86_spill] sm:$0xff] }
 0x131   : > { %v559_v16 = vsel %vm547_vm2, %v7075_v39, %v7073_v29  ;;  %v3455_v20 = vpop.eup %3454  ;;  %v1143_v47 = vrot.slane %v1108_v11, 7  ;;  %3458 = verf.f32 %v1039_v5  ;;  %v730_v34 = vrot.slane %v7083_v17, 1  ;;  %v843_v29 = vld [vmem:[#allocation2 + $0xa8] sm:$0xff]  ;;  %v7086_v11 = vld [vmem:[#allocation78_spill] sm:$0xff] }
 0x132   : > { %v630_v63 = vsel %vm612_vm3, %v7079_v1, %v7077_v12  ;;  %v870_v8 = vadd.f32 %v858_v15, %v825_v58  ;;  %v582_v31 = vadd.f32 %v559_v16, %v7080_v24  ;;  %v7082_v61 = vmov %v7079_v1  ;;  %v842_v15 = vld [vmem:[#allocation2 + $0xa0] sm:$0xff] }
 0x133   : > { %v654_v0 = vadd.f32 %v7082_v61, %v7081_v52  ;;  %v770_v59 = vmul.f32 %v5205_v53, %v7084_v51  ;;  %v1061_v49 = vadd.f32 1.0, %v3455_v20  ;;  %v1027_v55 = vmul.f32 0.5, %v1015_v13  ;;  %v7087_v13 = vld [vmem:[#allocation84_spill] sm:$0xff] }
 0x134   : > { %v926_v37 = vadd.f32 %v901_v48, %v870_v8  ;;  %v655_v28 = vadd.f32 %v630_v63, %v582_v31  ;;  %v1144_v54 = vsel %vm1136_vm4, %v1142_v36, %v1143_v47  ;;  %v972_v62 = vsel %vm612_vm3, %v969_v9, %v971_v19  ;;  %v7091_v31 = vld [vmem:[#allocation89_spill] sm:$0xff] }
 0x135   : > { %v698_v58 = vadd.f32 %v7085_v40, %v654_v0  ;;  %v800_v32 = vrot.slane %v770_v59, 2  ;;  %v1167_v50 = vadd.f32 %v1144_v54, %v1118_v6  ;;  %v1073_v39 = vmul.f32 %v1061_v49, %v1025_v30 }
 0x136   : > { %v998_v16 = vadd.f32 %v972_v62, %v926_v37  ;;  %v699_v5 = vadd.f32 %v7086_v11, %v655_v28  ;;  %v7088_v12 = vrot.slane %v7087_v13, 1  ;;  %v7090_v1 = vrot.slane %v7089_v3, 2 }
 0x137   : > { %v754_v48 = vadd.f32 %v730_v34, %v698_v58  ;;  %v859_v9 = vmul.f32 %v5182_v18, %v842_v15  ;;  %1175 = vst.msk [vmem:[%s5396_s11 + $0x10] sm:$0xff] %vm324_vm0, %v1167_v50  ;;  %v1091_v63 = vmul.f32 %v5346_v43, %v1073_v39  ;;  %v884_v19 = vmul.f32 %v5192_v44, %v843_v29  ;;  %v1119_v15 = vld [vmem:[%s3927_s27 + $0x18] sm:$0xff] }
 0x138   : > { %v732_v7 = vsel %vm547_vm2, %v730_v34, %v7088_v12  ;;  %v802_v36 = vsel %vm612_vm3, %v800_v32, %v7090_v1  ;;  %v1016_v30 = vadd.f32 %v5262_v60, %v998_v16  ;;  %v5461_v52 = vmul.f32 %v5192_v44, %v7091_v31  ;;  %v3457_v20 = vpop.eup %3456  ;;  %v7092_v12 = vld [vmem:[#allocation23_spill] sm:$0xff] }
 0x139   : > { %v755_v8 = vadd.f32 %v732_v7, %v699_v5  ;;  %v826_v24 = vadd.f32 %v800_v32, %v754_v48  ;;  %v943_v61 = vmul.f32 %v5210_v56, %v843_v29  ;;  %v944_v0 = vmul.f32 %v5210_v56, %v7091_v31 }
 0x13a   : > { %v1109_v6 = vadd.f32 %v5356_v23, %v1091_v63  ;;  %v1040_v17 = vmul.f32 0.70710677, %v1016_v30  ;;  %v860_v51 = vmul.f32 %v5182_v18, %v843_v29  ;;  %v1062_v59 = vadd.f32 1.0, %v3457_v20  ;;  %v7096_v20 = vld [vmem:[#allocation26_spill] sm:$0xff] }
 0x13b   : > { %v827_v34 = vadd.f32 %v802_v36, %v755_v8  ;;  %v871_v49 = vadd.f32 %v859_v9, %v826_v24  ;;  %v903_v37 = vrot.slane %v884_v19, 1  ;;  %v904_v28 = vrot.slane %v5461_v52, 1  ;;  %v3459_v58 = vpop.eup %3458  ;;  %v845_v36 = vld [vmem:[#allocation2 + $0xb8] sm:$0x1] }
 0x13c   : > { %v1145_v54 = vrot.slane %v1109_v6, 7  ;;  %3460 = verf.f32 %v1040_v17  ;;  %v973_v40 = vrot.slane %v943_v61, 2  ;;  %v1074_v32 = vmul.f32 %v1062_v59, %v1026_v21  ;;  %v7095_v61 = vld [vmem:[#allocation81_spill] sm:$0xff] }
 0x13d   : > { %v872_v62 = vadd.f32 %v860_v51, %v827_v34  ;;  %v905_v50 = vsel %vm547_vm2, %v903_v37, %v904_v28  ;;  %v927_v39 = vadd.f32 %v903_v37, %v871_v49  ;;  %v974_v16 = vrot.slane %v944_v0, 2  ;;  %v7099_v59 = vld [vmem:[#allocation85_spill] sm:$0xff]  ;;  %v7100_v37 = vld [vmem:[#allocation87_spill] sm:$0xff] }
 0x13e   : > { %v1146_v29 = vsel %vm1136_vm4, %v1143_v47, %v1145_v54  ;;  %v1063_v11 = vadd.f32 1.0, %v3459_v58  ;;  %v7093_v7 = vrot.slane %v7092_v12, 2  ;;  %v7094_v48 = vrot.slane %v7076_v38, 2  ;;  %v7102_v54 = vld [vmem:[#allocation80_spill] sm:$0xff] }
 0x13f   : > { %v928_v5 = vadd.f32 %v905_v50, %v872_v62  ;;  %v1168_v9 = vadd.f32 %v1146_v29, %v1119_v15  ;;  %v1092_v21 = vmul.f32 %v5346_v43, %v1074_v32  ;;  %v975_v63 = vsel %vm612_vm3, %v973_v40, %v974_v16 }
 0x140   : > { %v632_v1 = vsel %vm612_vm3, %v7094_v48, %v7093_v7  ;;  %v999_v8 = vadd.f32 %v973_v40, %v927_v39  ;;  %v1075_v19 = vmul.f32 %v1063_v11, %v1027_v55  ;;  %v1028_v24 = vmul.f32 0.5, %v1016_v30 }
 0x141   : > { %v1000_v31 = vadd.f32 %v975_v63, %v928_v5  ;;  %v656_v47 = vadd.f32 %v632_v1, %v7095_v61  ;;  %1176 = vst.msk [vmem:[%s5396_s11 + $0x18] sm:$0xff] %vm324_vm0, %v1168_v9  ;;  %v1110_v0 = vadd.f32 %v5356_v23, %v1092_v21  ;;  %v7097_v6 = vrot.slane %v7096_v20, 2  ;;  %v7105_v1 = vld [vmem:[#allocation82_spill] sm:$0xff]  ;;  %v7106_v9 = vld [vmem:[#allocation88_spill] sm:$0xff]  ;;  %v7108_v63 = vld [vmem:[#allocation83_spill] sm:$0xff] }
 0x142   : > { %v1017_v38 = vadd.f32 %v5262_v60, %v999_v8  ;;  %v7098_v17 = vrot.slane %v7089_v3, 2  ;;  %v945_v51 = vmul.f32 %v5210_v56, %v845_v36  ;;  %v1093_v55 = vmul.f32 %v5346_v43, %v1075_v19  ;;  %v3545_v3 = vld [vmem:[#allocation2 + $0xb0] sm:$0xff] }
 0x143   : > { %v1018_v30 = vadd.f32 %v5262_v60, %v1000_v31  ;;  %v700_v49 = vadd.f32 %v7099_v59, %v656_v47  ;;  %v7101_v15 = vrot.slane %v7100_v37, 1  ;;  %v7103_v62 = vrot.slane %v7102_v54, 1  ;;  %v1503_v31 = vld [vmem:[#allocation2 + $0xc0] sm:$0xff]  ;;  %v3546_v59 = vld [vmem:[#allocation2 + $0xa8] sm:$0xff] }
 0x144   : > { %v804_v34 = vsel %vm612_vm3, %v7098_v17, %v7097_v6  ;;  %v1147_v58 = vrot.slane %v1110_v0, 7  ;;  %v1041_v32 = vmul.f32 0.70710677, %v1017_v38  ;;  %v861_v50 = vmul.f32 %v3545_v3, %v5182_v18  ;;  %v1120_v47 = vld [vmem:[%s3927_s27 + $0x20] sm:$0xff]  ;;  %v1504_v37 = vld [vmem:[#allocation2 + $0xc8] sm:$0xff] }
 0x145   : > { %v1240_v40 = vsel %vm547_vm2, %v7103_v62, %v7101_v15  ;;  %v976_v39 = vrot.slane %v945_v51, 2  ;;  %v5502_v29 = vadd.f32 %v5356_v23, %v1093_v55  ;;  %v5504_v11 = vmul.f32 0.5, %v1017_v38  ;;  %v7112_v51 = vld [vmem:[#allocation96_spill] sm:$0xff]  ;;  %v7113_v62 = vld [vmem:[#allocation14_spill] sm:$0xff] }
 0x146   : > { %v1042_v5 = vmul.f32 0.70710677, %v1018_v30  ;;  %v7104_v12 = vrot.slane %v7087_v13, 1  ;;  %3462 = verf.f32 %v1041_v32  ;;  %v1263_v36 = vadd.f32 %v1240_v40, %v7105_v1  ;;  %v3461_v61 = vpop.eup %3460  ;;  %v7110_v13 = vld [vmem:[#allocation90_spill] sm:$0xff] }
 0x147   : > { %v977_v48 = vsel %vm612_vm3, %v974_v16, %v976_v39  ;;  %v7107_v21 = vrot.slane %v7106_v9, 2  ;;  %v7109_v8 = vrot.slane %v7108_v63, 2  ;;  %v1148_v0 = vrot.slane %v5502_v29, 7  ;;  %v7114_v39 = vld [vmem:[#allocation94_spill] sm:$0xff]  ;;  %v3547_v63 = vld [vmem:[#allocation2 + $0xd0] sm:$0xff] }
 0x148   : > { %v756_v7 = vadd.f32 %v7104_v12, %v700_v49  ;;  %3464 = verf.f32 %v1042_v5  ;;  %v1064_v16 = vadd.f32 1.0, %v3461_v61  ;;  %v1398_v55 = vrot.slane %v7112_v51, 1 }
 0x149   : > { %v1300_v19 = vsel %vm612_vm3, %v7109_v8, %v7107_v21  ;;  %v7111_v20 = vmov %v7109_v8  ;;  %v1434_v49 = vmul.f32 %v3546_v59, %v5205_v53  ;;  %v1149_v15 = vsel %vm1136_vm4, %v1147_v58, %v1148_v0  ;;  %v1121_v59 = vld [vmem:[%s3927_s27 + $0x28] sm:$0xff] }
 0x14a   : > { %v828_v38 = vadd.f32 %v804_v34, %v756_v7  ;;  %v1330_v6 = vadd.f32 %v7111_v20, %v7110_v13  ;;  %v1331_v17 = vadd.f32 %v1300_v19, %v1263_v36  ;;  %v1519_v34 = vmul.f32 %v5182_v18, %v1503_v31  ;;  %v7116_v31 = vld [vmem:[#allocation101_spill] sm:$0xff] }
 0x14b   : > { %v1169_v32 = vadd.f32 %v1149_v15, %v1120_v47  ;;  %v1076_v3 = vmul.f32 %v1064_v16, %v1028_v24  ;;  %v7115_v5 = vrot.slane %v4715_v45, 1  ;;  %v1458_v36 = vrot.slane %v1434_v49, 2 }
 0x14c   : > { %v873_v54 = vadd.f32 %v861_v50, %v828_v38  ;;  %v1370_v40 = vadd.f32 %v7113_v62, %v1330_v6  ;;  %v1371_v29 = vadd.f32 %v7114_v39, %v1331_v17  ;;  %v1520_v58 = vmul.f32 %v5182_v18, %v1504_v37 }
 0x14d   : > { %v1400_v12 = vsel %vm547_vm2, %v1398_v55, %v7115_v5  ;;  %1177 = vst.msk [vmem:[%s5396_s11 + $0x20] sm:$0xff] %vm324_vm0, %v1169_v32  ;;  %v1094_v50 = vmul.f32 %v5346_v43, %v1076_v3  ;;  %v1543_v24 = vmul.f32 %v5192_v44, %v1504_v37  ;;  %v5537_v8 = vmul.f32 %v3547_v63, %v5192_v44 }
 0x14e   : > { %v929_v7 = vadd.f32 %v904_v28, %v873_v54  ;;  %v1422_v1 = vadd.f32 %v1398_v55, %v1370_v40  ;;  %v1423_v21 = vadd.f32 %v1400_v12, %v1371_v29  ;;  %v7117_v52 = vrot.slane %v7116_v31, 2 }
 0x14f   : > { %v1595_v47 = vmul.f32 %v5210_v56, %v1504_v37  ;;  %v1112_v38 = vadd.f32 %v5356_v23, %v1094_v50  ;;  %v1559_v20 = vrot.slane %v1543_v24, 1  ;;  %v1560_v6 = vrot.slane %v5537_v8, 1 }
 0x150   : > { %v1001_v19 = vadd.f32 %v977_v48, %v929_v7  ;;  %v1460_v28 = vsel %vm612_vm3, %v1458_v36, %v7117_v52  ;;  %v1490_v61 = vadd.f32 %v1458_v36, %v1422_v1  ;;  %v1030_v16 = vmul.f32 0.5, %v1018_v30  ;;  %v3463_v48 = vpop.eup %3462  ;;  %v7118_v30 = vld [vmem:[#allocation27_spill] sm:$0xff] }
 0x151   : > { %v1491_v13 = vadd.f32 %v1460_v28, %v1423_v21  ;;  %v1596_v55 = vmul.f32 %v3547_v63, %v5210_v56  ;;  %v1150_v49 = vrot.slane %v1112_v38, 7  ;;  %v1561_v37 = vsel %vm547_vm2, %v1559_v20, %v1560_v6  ;;  %v1506_v21 = vld [vmem:[#allocation2 + $0xd8] sm:$0x1]  ;;  %v7121_v28 = vld [vmem:[#allocation95_spill] sm:$0xff] }
 0x152   : > { %v1019_v17 = vadd.f32 %v5262_v60, %v1001_v19  ;;  %v1531_v51 = vadd.f32 %v1519_v34, %v1490_v61  ;;  %v1619_v54 = vrot.slane %v1595_v47, 2  ;;  %v3465_v62 = vpop.eup %3464  ;;  %v1065_v40 = vadd.f32 1.0, %v3463_v48  ;;  %v7122_v38 = vld [vmem:[#allocation31_spill] sm:$0xff]  ;;  %v7126_v48 = vld [vmem:[#allocation97_spill] sm:$0xff] }
 0x153   : > { %v1532_v15 = vadd.f32 %v1520_v58, %v1491_v13  ;;  %v7119_v39 = vrot.slane %v7118_v30, 2  ;;  %v7120_v34 = vrot.slane %v7106_v9, 2  ;;  %v1151_v5 = vsel %vm1136_vm4, %v1148_v0, %v1150_v49  ;;  %v7128_v49 = vld [vmem:[#allocation92_spill] sm:$0xff] }
 0x154   : > { %v1043_v32 = vmul.f32 0.70710677, %v1019_v17  ;;  %v1583_v3 = vadd.f32 %v1559_v20, %v1531_v51  ;;  %v1066_v12 = vadd.f32 1.0, %v3465_v62  ;;  %v1620_v1 = vrot.slane %v1596_v55, 2 }
 0x155   : > { %v1302_v29 = vsel %vm612_vm3, %v7120_v34, %v7119_v39  ;;  %v1584_v7 = vadd.f32 %v1561_v37, %v1532_v15  ;;  %v1170_v36 = vadd.f32 %v1151_v5, %v1121_v59  ;;  %v1077_v58 = vmul.f32 %v1065_v40, %v5504_v11  ;;  %v7131_v34 = vld [vmem:[#allocation91_spill] sm:$0xff] }
 0x156   : > { %3466 = verf.f32 %v1043_v32  ;;  %v1651_v50 = vadd.f32 %v1619_v54, %v1583_v3  ;;  %v1078_v24 = vmul.f32 %v1066_v12, %v1030_v16  ;;  %v1031_v19 = vmul.f32 0.5, %v1019_v17  ;;  %v7125_v17 = vld [vmem:[#allocation100_spill] sm:$0xff] }
 0x157   : > { %v1621_v52 = vsel %vm612_vm3, %v1619_v54, %v1620_v1  ;;  %v1332_v61 = vadd.f32 %v1302_v29, %v7121_v28  ;;  %1178 = vst.msk [vmem:[%s5396_s11 + $0x28] sm:$0xff] %vm324_vm0, %v1170_v36  ;;  %v1095_v9 = vmul.f32 %v5346_v43, %v1077_v58  ;;  %v7123_v13 = vrot.slane %v7122_v38, 2  ;;  %v1507_v36 = vld [vmem:[#allocation2 + $0xe0] sm:$0xff]  ;;  %v1122_v58 = vld [vmem:[%s3927_s27 + $0x30] sm:$0xff] }
 0x158   : > { %v1652_v0 = vadd.f32 %v1621_v52, %v1584_v7  ;;  %v1663_v47 = vadd.f32 %v5262_v60, %v1651_v50  ;;  %v7124_v11 = vrot.slane %v7116_v31, 2  ;;  %v1096_v16 = vmul.f32 %v5346_v43, %v1078_v24  ;;  %v7132_v24 = vld [vmem:[#allocation98_spill] sm:$0xff]  ;;  %v7134_v28 = vld [vmem:[#allocation93_spill] sm:$0xff] }
 0x159   : > { %v1372_v51 = vadd.f32 %v7125_v17, %v1332_v61  ;;  %v1597_v55 = vmul.f32 %v5210_v56, %v1506_v21  ;;  %v7127_v59 = vrot.slane %v7126_v48, 1  ;;  %v7129_v15 = vrot.slane %v7128_v49, 1  ;;  %v3548_v17 = vld [vmem:[#allocation2 + $0xc8] sm:$0xff] }
 0x15a   : > { %v1462_v20 = vsel %vm612_vm3, %v7124_v11, %v7123_v13  ;;  %v1113_v54 = vadd.f32 %v5356_v23, %v1095_v9  ;;  %v1664_v62 = vadd.f32 %v5262_v60, %v1652_v0  ;;  %v1687_v31 = vmul.f32 0.70710677, %v1663_v47  ;;  %v7136_v9 = vld [vmem:[#allocation99_spill] sm:$0xff] }
 0x15b   : > { %v1243_v37 = vsel %vm547_vm2, %v7129_v15, %v7127_v59  ;;  %v1521_v40 = vmul.f32 %v3547_v63, %v5182_v18  ;;  %v5581_v32 = vadd.f32 %v5356_v23, %v1096_v16  ;;  %v7130_v3 = vrot.slane %v4715_v45, 1  ;;  %v7138_v13 = vld [vmem:[#allocation107_spill] sm:$0xff] }
 0x15c   : > { %v1622_v39 = vrot.slane %v1597_v55, 2  ;;  %v1266_v29 = vadd.f32 %v1243_v37, %v7131_v34  ;;  %v1152_v5 = vrot.slane %v1113_v54, 7  ;;  %v5586_v12 = vmul.f32 0.5, %v1663_v47  ;;  %v1508_v16 = vld [vmem:[#allocation2 + $0xe8] sm:$0xff]  ;;  %v7140_v37 = vld [vmem:[#allocation106_spill] sm:$0xff] }
 0x15d   : > { %v1424_v30 = vadd.f32 %v7130_v3, %v1372_v51  ;;  %v1688_v7 = vmul.f32 0.70710677, %v1664_v62  ;;  %3468 = verf.f32 %v1687_v31  ;;  %v1153_v50 = vrot.slane %v5581_v32, 7  ;;  %v7139_v49 = vld [vmem:[#allocation15_spill] sm:$0xff] }
 0x15e   : > { %v1623_v63 = vsel %vm612_vm3, %v1620_v1, %v1622_v39  ;;  %v7133_v52 = vrot.slane %v7132_v24, 2  ;;  %v7135_v45 = vrot.slane %v7134_v28, 2  ;;  %v1401_v11 = vrot.slane %v7138_v13, 1 }
 0x15f   : > { %v1492_v21 = vadd.f32 %v1462_v20, %v1424_v30  ;;  %3470 = verf.f32 %v1688_v7  ;;  %v1154_v1 = vsel %vm1136_vm4, %v1152_v5, %v1153_v50  ;;  %v1437_v51 = vmul.f32 %v3548_v17, %v5205_v53  ;;  %v7143_v17 = vld [vmem:[#allocation28_spill] sm:$0xff] }
 0x160   : > { %v1305_v61 = vsel %vm612_vm3, %v7135_v45, %v7133_v52  ;;  %v7137_v0 = vmov %v7135_v45  ;;  %v1522_v55 = vmul.f32 %v5182_v18, %v1507_v36  ;;  %v3467_v48 = vpop.eup %3466  ;;  %v1171_v59 = vadd.f32 %v1154_v1, %v1122_v58  ;;  %v3549_v36 = vld [vmem:[#allocation2 + $0xf0] sm:$0xff] }
 0x161   : > { %v1333_v47 = vadd.f32 %v7137_v0, %v7136_v9  ;;  %v1334_v38 = vadd.f32 %v1305_v61, %v1266_v29  ;;  %v1533_v20 = vadd.f32 %v1521_v40, %v1492_v21  ;;  %v7141_v31 = vrot.slane %v4763_v4, 1 }
 0x162   : > { %v1067_v30 = vadd.f32 1.0, %v3467_v48  ;;  %v1463_v40 = vrot.slane %v1437_v51, 2  ;;  %v1523_v34 = vmul.f32 %v5182_v18, %v1508_v16  ;;  %1179 = vst.msk [vmem:[%s5396_s11 + $0x30] sm:$0xff] %vm324_vm0, %v1171_v59  ;;  %v1545_v7 = vmul.f32 %v5192_v44, %v1508_v16 }
 0x163   : > { %v1373_v15 = vadd.f32 %v7139_v49, %v1333_v47  ;;  %v1374_v54 = vadd.f32 %v7140_v37, %v1334_v38  ;;  %v1403_v3 = vsel %vm547_vm2, %v1401_v11, %v7141_v31  ;;  %v1585_v39 = vadd.f32 %v1560_v6, %v1533_v20 }
 0x164   : > { %v5617_v58 = vmul.f32 %v3549_v36, %v5192_v44  ;;  %v1079_v21 = vmul.f32 %v1067_v30, %v1031_v19  ;;  %v7142_v28 = vrot.slane %v4766_v57, 2  ;;  %v1598_v6 = vmul.f32 %v5210_v56, %v1508_v16 }
 0x165   : > { %v1425_v29 = vadd.f32 %v1401_v11, %v1373_v15  ;;  %v1426_v5 = vadd.f32 %v1403_v3, %v1374_v54  ;;  %v1653_v52 = vadd.f32 %v1623_v63, %v1585_v39  ;;  %v1562_v9 = vrot.slane %v1545_v7, 1  ;;  %v1123_v39 = vld [vmem:[%s3927_s27 + $0x38] sm:$0xff] }
 0x166   : > { %v1465_v8 = vsel %vm612_vm3, %v1463_v40, %v7142_v28  ;;  %v1563_v0 = vrot.slane %v5617_v58, 1  ;;  %v1097_v47 = vmul.f32 %v5346_v43, %v1079_v21  ;;  %v1676_v38 = vmul.f32 0.5, %v1664_v62  ;;  %v7147_v58 = vld [vmem:[#allocation111_spill] sm:$0xff] }
 0x167   : > { %v1493_v45 = vadd.f32 %v1463_v40, %v1425_v29  ;;  %v1494_v61 = vadd.f32 %v1465_v8, %v1426_v5  ;;  %v1665_v13 = vadd.f32 %v5262_v60, %v1653_v52  ;;  %v5627_v19 = vmul.f32 %v3549_v36, %v5210_v56  ;;  %v3469_v63 = vpop.eup %3468  ;;  %v1510_v52 = vld [vmem:[#allocation2 + $0xf8] sm:$0x1] }
 0x168   : > { %v1624_v20 = vrot.slane %v1598_v6, 2  ;;  %v7144_v16 = vrot.slane %v7143_v17, 2  ;;  %v7145_v51 = vrot.slane %v7132_v24, 2  ;;  %v1115_v59 = vadd.f32 %v5356_v23, %v1097_v47 }
 0x169   : > { %v1534_v11 = vadd.f32 %v1522_v55, %v1493_v45  ;;  %v1535_v1 = vadd.f32 %v1523_v34, %v1494_v61  ;;  %v1711_v49 = vadd.f32 1.0, %v3469_v63  ;;  %v1689_v62 = vmul.f32 0.70710677, %v1665_v13  ;;  %v3471_v37 = vpop.eup %3470  ;;  %v7146_v55 = vld [vmem:[#allocation105_spill] sm:$0xff] }
 0x16a   : > { %v1307_v48 = vsel %vm612_vm3, %v7145_v51, %v7144_v16  ;;  %v1564_v15 = vsel %vm547_vm2, %v1562_v9, %v1563_v0  ;;  %v1625_v3 = vrot.slane %v5627_v19, 2  ;;  %v1155_v40 = vrot.slane %v1115_v59, 7  ;;  %v7152_v16 = vld [vmem:[#allocation108_spill] sm:$0xff] }
 0x16b   : > { %v1586_v54 = vadd.f32 %v1562_v9, %v1534_v11  ;;  %v1587_v31 = vadd.f32 %v1564_v15, %v1535_v1  ;;  %v1335_v30 = vadd.f32 %v1307_v48, %v7146_v55  ;;  %v1712_v34 = vadd.f32 1.0, %v3471_v37  ;;  %v7156_v55 = vld [vmem:[#allocation102_spill] sm:$0xff] }
 0x16c   : > { %v1723_v24 = vmul.f32 %v1711_v49, %v5586_v12  ;;  %3472 = verf.f32 %v1689_v62  ;;  %v1677_v29 = vmul.f32 0.5, %v1665_v13  ;;  %v1626_v5 = vsel %vm612_vm3, %v1624_v20, %v1625_v3  ;;  %v7149_v13 = vld [vmem:[#allocation32_spill] sm:$0xff] }
 0x16d   : > { %v1654_v7 = vadd.f32 %v1624_v20, %v1586_v54  ;;  %v1375_v21 = vadd.f32 %v7147_v58, %v1335_v30  ;;  %v1156_v28 = vsel %vm1136_vm4, %v1153_v50, %v1155_v40  ;;  %v1724_v8 = vmul.f32 %v1712_v34, %v1676_v38  ;;  %v7157_v40 = vld [vmem:[#allocation109_spill] sm:$0xff]  ;;  %v7161_v58 = vld [vmem:[#allocation110_spill] sm:$0xff] }
 0x16e   : > { %v1735_v6 = vmul.f32 %v5346_v43, %v1723_v24  ;;  %v1655_v45 = vadd.f32 %v1626_v5, %v1587_v31  ;;  %v1172_v61 = vadd.f32 %v1156_v28, %v1123_v39  ;;  %v7148_v9 = vrot.slane %v4763_v4, 1  ;;  %v3309_v39 = vld [vmem:[%s3927_s27 + $0x40] sm:$0xff]  ;;  %v7159_v24 = vld [vmem:[#allocation104_spill] sm:$0xff] }
 0x16f   : > { %v1666_v12 = vadd.f32 %v5262_v60, %v1654_v7  ;;  %v7150_v19 = vrot.slane %v7149_v13, 2  ;;  %v7151_v63 = vrot.slane %v4766_v57, 2  ;;  %v1736_v32 = vmul.f32 %v5346_v43, %v1724_v8  ;;  %v7154_v57 = vld [vmem:[#allocation103_spill] sm:$0xff] }
 0x170   : > { %v1427_v47 = vadd.f32 %v7148_v9, %v1375_v21  ;;  %v1747_v50 = vadd.f32 %v5356_v23, %v1735_v6  ;;  %v1667_v38 = vadd.f32 %v5262_v60, %v1655_v45  ;;  %v1600_v1 = vmul.f32 %v5210_v56, %v1510_v52  ;;  %1180 = vst.msk [vmem:[%s5396_s11 + $0x38] sm:$0xff] %vm324_vm0, %v1172_v61  ;;  %v7163_v45 = vld [vmem:[#allocation117_spill] sm:$0xff] }
 0x171   : > { %v1467_v11 = vsel %vm612_vm3, %v7151_v63, %v7150_v19  ;;  %v1690_v20 = vmul.f32 0.70710677, %v1666_v12  ;;  %v1524_v17 = vmul.f32 %v3549_v36, %v5182_v18  ;;  %v7153_v51 = vrot.slane %v7152_v16, 1  ;;  %v7164_v19 = vld [vmem:[#allocation16_spill] sm:$0xff] }
 0x172   : > { %v1495_v4 = vadd.f32 %v1467_v11, %v1427_v47  ;;  %v7155_v48 = vrot.slane %v7154_v57, 1  ;;  %v5667_v49 = vadd.f32 %v5356_v23, %v1736_v32  ;;  %v1779_v62 = vrot.slane %v1747_v50, 7  ;;  %v3550_v11 = vld [vmem:[#allocation2 + $0xe8] sm:$0xff] }
 0x173   : > { %v5669_v15 = vmul.f32 0.5, %v1666_v12  ;;  %v1691_v37 = vmul.f32 0.70710677, %v1667_v38  ;;  %3474 = verf.f32 %v1690_v20  ;;  %v1627_v31 = vrot.slane %v1600_v1, 2  ;;  %v1511_v12 = vld [vmem:[#allocation2 + $0x100] sm:$0xff]  ;;  %v1512_v50 = vld [vmem:[#allocation2 + $0x108] sm:$0xff] }
 0x174   : > { %v1246_v59 = vsel %vm547_vm2, %v7155_v48, %v7153_v51  ;;  %v1536_v54 = vadd.f32 %v1524_v17, %v1495_v4  ;;  %v1780_v36 = vrot.slane %v5667_v49, 7  ;;  %v7158_v34 = vrot.slane %v7157_v40, 2  ;;  %v7165_v20 = vld [vmem:[#allocation116_spill] sm:$0xff] }
 0x175   : > { %v1269_v30 = vadd.f32 %v1246_v59, %v7156_v55  ;;  %3476 = verf.f32 %v1691_v37  ;;  %v7160_v5 = vrot.slane %v7159_v24, 2  ;;  %v5682_v28 = vmul.f32 0.5, %v1667_v38  ;;  %v7167_v37 = vld [vmem:[#allocation121_spill] sm:$0xff] }
 0x176   : > { %v1588_v8 = vadd.f32 %v1563_v0, %v1536_v54  ;;  %v1404_v61 = vrot.slane %v7163_v45, 1  ;;  %v3473_v9 = vpop.eup %3472  ;;  %v1781_v47 = vsel %vm1136_vm4, %v1779_v62, %v1780_v36  ;;  %v1628_v13 = vsel %vm612_vm3, %v1625_v3, %v1627_v31 }
 0x177   : > { %v1310_v7 = vsel %vm612_vm3, %v7160_v5, %v7158_v34  ;;  %v7162_v21 = vmov %v7160_v5  ;;  %v1440_v32 = vmul.f32 %v3550_v11, %v5205_v53  ;;  %v1807_v38 = vadd.f32 %v3309_v39, %v1781_v47  ;;  %v5703_v39 = vld [vmem:[#allocation6 + $0x9] ss:$0 sm:$0xff] }
 0x178   : > { %v1336_v52 = vadd.f32 %v7162_v21, %v7161_v58  ;;  %v1337_v6 = vadd.f32 %v1310_v7, %v1269_v30  ;;  %v1713_v0 = vadd.f32 1.0, %v3473_v9  ;;  %v1656_v1 = vadd.f32 %v1628_v13, %v1588_v8  ;;  %v3551_v30 = vld [vmem:[#allocation2 + $0x110] sm:$0xff]  ;;  %v5710_v7 = vld [vmem:[#allocation6 + $0x8] ss:$0 sm:$0xff]  ;;  %v5714_v8 = vld [vmem:[#allocation6 + $0xa] ss:$0 sm:$0xff] }
 0x179   : > { %v7166_v17 = vrot.slane %v4814_v35, 1  ;;  %v1468_v57 = vrot.slane %v1440_v32, 2  ;;  %v1525_v48 = vmul.f32 %v5182_v18, %v1511_v12  ;;  %3317 = vst.msk [vmem:[%s5396_s11 + $0x40] sm:$0xff] %vm324_vm0, %v1807_v38  ;;  %v1547_v62 = vmul.f32 %v5192_v44, %v1512_v50  ;;  %v3310_v11 = vld [vmem:[%s3927_s27 + $0x48] sm:$0xff] }
 0x17a   : > { %v1376_v63 = vadd.f32 %v7164_v19, %v1336_v52  ;;  %v1377_v4 = vadd.f32 %v7165_v20, %v1337_v6  ;;  %v1725_v3 = vmul.f32 %v1713_v0, %v1677_v29  ;;  %v1668_v59 = vadd.f32 %v5262_v60, %v1656_v1  ;;  %v7169_v0 = vld [vmem:[#allocation29_spill] sm:$0xff] }
 0x17b   : > { %v1406_v16 = vsel %vm547_vm2, %v1404_v61, %v7166_v17  ;;  %v7168_v54 = vrot.slane %v7167_v37, 2  ;;  %v5706_v34 = vmul.f32 %v5703_v39, %v3551_v30  ;;  %v1601_v18 = vmul.f32 %v5210_v56, %v1512_v50 }
 0x17c   : > { %v1428_v51 = vadd.f32 %v1404_v61, %v1376_v63  ;;  %v1429_v53 = vadd.f32 %v1406_v16, %v1377_v4  ;;  %v1737_v29 = vmul.f32 %v5346_v43, %v1725_v3  ;;  %v1692_v24 = vmul.f32 0.70710677, %v1668_v59  ;;  %v1514_v3 = vld [vmem:[#allocation2 + $0x118] sm:$0x1] }
 0x17d   : > { %v1470_v31 = vsel %vm612_vm3, %v1468_v57, %v7168_v54  ;;  %v1526_v44 = vmul.f32 %v5710_v7, %v1512_v50  ;;  %v1565_v21 = vrot.slane %v1547_v62, 1  ;;  %v1566_v52 = vrot.slane %v5706_v34, 1  ;;  %v3475_v45 = vpop.eup %3474 }
 0x17e   : > { %v1496_v55 = vadd.f32 %v1468_v57, %v1428_v51  ;;  %v1497_v5 = vadd.f32 %v1470_v31, %v1429_v53  ;;  %v1602_v6 = vmul.f32 %v5714_v8, %v3551_v30  ;;  %v1749_v56 = vadd.f32 %v5356_v23, %v1737_v29  ;;  %v7172_v57 = vld [vmem:[#allocation115_spill] sm:$0xff] }
 0x17f   : > { %3478 = verf.f32 %v1692_v24  ;;  %v1629_v12 = vrot.slane %v1601_v18, 2  ;;  %v3477_v9 = vpop.eup %3476  ;;  %v1714_v47 = vadd.f32 1.0, %v3475_v45  ;;  %v1567_v13 = vsel %vm547_vm2, %v1565_v21, %v1566_v52  ;;  %v7173_v18 = vld [vmem:[#allocation122_spill] sm:$0xff] }
 0x180   : > { %v1537_v58 = vadd.f32 %v1525_v48, %v1496_v55  ;;  %v1538_v61 = vadd.f32 %v1526_v44, %v1497_v5  ;;  %v1630_v63 = vrot.slane %v1602_v6, 2  ;;  %v1782_v32 = vrot.slane %v1749_v56, 7  ;;  %v7174_v44 = vld [vmem:[#allocation33_spill] sm:$0xff] }
 0x181   : > { %v1715_v50 = vadd.f32 1.0, %v3477_v9  ;;  %v7170_v1 = vrot.slane %v7169_v0, 2  ;;  %v7171_v20 = vrot.slane %v7157_v40, 2  ;;  %v1726_v17 = vmul.f32 %v1714_v47, %v5669_v15 }
 0x182   : > { %v1589_v19 = vadd.f32 %v1565_v21, %v1537_v58  ;;  %v1590_v38 = vadd.f32 %v1567_v13, %v1538_v61  ;;  %v1631_v16 = vsel %vm612_vm3, %v1629_v12, %v1630_v63  ;;  %v1783_v53 = vsel %vm1136_vm4, %v1780_v36, %v1782_v32  ;;  %v7178_v13 = vld [vmem:[#allocation118_spill] sm:$0xff] }
 0x183   : > { %v1312_v4 = vsel %vm612_vm3, %v7171_v20, %v7170_v1  ;;  %v1727_v62 = vmul.f32 %v1715_v50, %v5682_v28  ;;  %v1680_v54 = vmul.f32 0.5, %v1668_v59  ;;  %v1808_v40 = vadd.f32 %v3310_v11, %v1783_v53  ;;  %v7180_v11 = vld [vmem:[#allocation112_spill] sm:$0xff]  ;;  %v7182_v1 = vld [vmem:[#allocation113_spill] sm:$0xff] }
 0x184   : > { %v1657_v51 = vadd.f32 %v1629_v12, %v1589_v19  ;;  %v1338_v48 = vadd.f32 %v1312_v4, %v7172_v57  ;;  %v1658_v31 = vadd.f32 %v1631_v16, %v1590_v38  ;;  %v1738_v55 = vmul.f32 %v5346_v43, %v1726_v17  ;;  %v3311_v38 = vld [vmem:[%s3927_s27 + $0x50] sm:$0xff]  ;;  %v7183_v16 = vld [vmem:[#allocation119_spill] sm:$0xff]  ;;  %v7185_v57 = vld [vmem:[#allocation114_spill] sm:$0xff] }
 0x185   : > { %v1739_v24 = vmul.f32 %v5346_v43, %v1727_v62  ;;  %v7175_v49 = vrot.slane %v7174_v44, 2  ;;  %v7176_v36 = vrot.slane %v7167_v37, 2  ;;  %v1603_v59 = vmul.f32 %v5714_v8, %v1514_v3  ;;  %3318 = vst.msk [vmem:[%s5396_s11 + $0x48] sm:$0xff] %vm324_vm0, %v1808_v40  ;;  %v7187_v53 = vld [vmem:[#allocation120_spill] sm:$0xff]  ;;  %v1515_v40 = vld [vmem:[#allocation2 + $0x120] sm:$0xff] }
 0x186   : > { %v1669_v15 = vadd.f32 %v5262_v60, %v1657_v51  ;;  %v1378_v29 = vadd.f32 %v7173_v18, %v1338_v48  ;;  %v5739_v5 = vadd.f32 %v5262_v60, %v1658_v31  ;;  %v1750_v58 = vadd.f32 %v5356_v23, %v1738_v55 }
 0x187   : > { %v1472_v28 = vsel %vm612_vm3, %v7176_v36, %v7175_v49  ;;  %v7177_v6 = vrot.slane %v4814_v35, 1  ;;  %v1527_v60 = vmul.f32 %v5710_v7, %v3551_v30  ;;  %v5754_v56 = vadd.f32 %v5356_v23, %v1739_v24  ;;  %v3556_v24 = vld [vmem:[#allocation2 + $0x108] sm:$0xff] }
 0x188   : > { %v1693_v21 = vmul.f32 0.70710677, %v1669_v15  ;;  %v5756_v61 = vmul.f32 0.5, %v1669_v15  ;;  %v1694_v37 = vmul.f32 0.70710677, %v5739_v5  ;;  %v1632_v12 = vrot.slane %v1603_v59, 2 }
 0x189   : > { %v1430_v45 = vadd.f32 %v7177_v6, %v1378_v29  ;;  %v1784_v9 = vrot.slane %v1750_v58, 7  ;;  %v7179_v19 = vrot.slane %v7178_v13, 1  ;;  %v7181_v32 = vrot.slane %v7180_v11, 1  ;;  %v3479_v50 = vpop.eup %3478  ;;  %v5778_v29 = vld [vmem:[#allocation6 + $0x6] ss:$0 sm:$0xff]  ;;  %v1516_v49 = vld [vmem:[#allocation2 + $0x128] sm:$0xff] }
 0x18a   : > { %3480 = verf.f32 %v1693_v21  ;;  %v1785_v30 = vrot.slane %v5754_v56, 7  ;;  %v1633_v0 = vsel %vm612_vm3, %v1630_v63, %v1632_v12  ;;  %v1716_v4 = vadd.f32 1.0, %v3479_v50  ;;  %v7189_v63 = vld [vmem:[#allocation124_spill] sm:$0xff]  ;;  %v7190_v58 = vld [vmem:[#allocation17_spill] sm:$0xff]  ;;  %v7191_v6 = vld [vmem:[#allocation123_spill] sm:$0xff] }
 0x18b   : > { %v1498_v47 = vadd.f32 %v1472_v28, %v1430_v45  ;;  %v1249_v35 = vsel %vm547_vm2, %v7181_v32, %v7179_v19  ;;  %3482 = verf.f32 %v1694_v37  ;;  %v7184_v51 = vrot.slane %v7183_v16, 2  ;;  %v7194_v19 = vld [vmem:[#allocation131_spill] sm:$0xff]  ;;  %v3557_v50 = vld [vmem:[#allocation2 + $0x130] sm:$0xff] }
 0x18c   : > { %v1272_v20 = vadd.f32 %v1249_v35, %v7182_v1  ;;  %v7186_v48 = vrot.slane %v7185_v57, 2  ;;  %v1786_v55 = vsel %vm1136_vm4, %v1784_v9, %v1785_v30  ;;  %v1407_v18 = vrot.slane %v7189_v63, 1 }
 0x18d   : > { %v1539_v17 = vadd.f32 %v1527_v60, %v1498_v47  ;;  %v1443_v44 = vmul.f32 %v3556_v24, %v5778_v29  ;;  %v1809_v36 = vadd.f32 %v3311_v38, %v1786_v55  ;;  %v1728_v28 = vmul.f32 %v1716_v4, %v1680_v54  ;;  %v7192_v60 = vld [vmem:[#allocation129_spill] sm:$0xff] }
 0x18e   : > { %v1315_v3 = vsel %vm612_vm3, %v7186_v48, %v7184_v51  ;;  %v7188_v62 = vmov %v7186_v48  ;;  %v7193_v56 = vrot.slane %v7192_v60, 1  ;;  %v1528_v9 = vmul.f32 %v5710_v7, %v1515_v40 }
 0x18f   : > { %v1339_v31 = vadd.f32 %v7188_v62, %v7187_v53  ;;  %v1340_v15 = vadd.f32 %v1315_v3, %v1272_v20  ;;  %v1591_v59 = vadd.f32 %v1566_v52, %v1539_v17  ;;  %v1473_v12 = vrot.slane %v1443_v44, 2  ;;  %3319 = vst.msk [vmem:[%s5396_s11 + $0x50] sm:$0xff] %vm324_vm0, %v1809_v36  ;;  %v3312_v62 = vld [vmem:[%s3927_s27 + $0x58] sm:$0xff] }
 0x190   : > { %v1409_v37 = vsel %vm547_vm2, %v1407_v18, %v7193_v56  ;;  %v1740_v47 = vmul.f32 %v5346_v43, %v1728_v28  ;;  %v1529_v34 = vmul.f32 %v5710_v7, %v1516_v49  ;;  %v7195_v11 = vrot.slane %v7194_v19, 2 }
 0x191   : > { %v1379_v21 = vadd.f32 %v7190_v58, %v1339_v31  ;;  %v1380_v45 = vadd.f32 %v7191_v6, %v1340_v15  ;;  %v1659_v13 = vadd.f32 %v1633_v0, %v1591_v59  ;;  %v1549_v35 = vmul.f32 %v5703_v39, %v1516_v49  ;;  %v5804_v0 = vld [vmem:[%s6609_s2] ss:$0 sm:$0xff] }
 0x192   : > { %v1475_v32 = vsel %vm612_vm3, %v1473_v12, %v7195_v11  ;;  %v5798_v38 = vmul.f32 %v3557_v50, %v5703_v39  ;;  %v1752_v1 = vadd.f32 %v5356_v23, %v1740_v47  ;;  %v1604_v17 = vmul.f32 %v5714_v8, %v1516_v49  ;;  %v7200_v11 = vld [vmem:[#allocation34_spill] sm:$0xff] }
 0x193   : > { %v1431_v54 = vadd.f32 %v1407_v18, %v1379_v21  ;;  %v1432_v52 = vadd.f32 %v1409_v37, %v1380_v45  ;;  %v1671_v20 = vadd.f32 %v5804_v0, %v1659_v13  ;;  %v1568_v57 = vrot.slane %v1549_v35, 1  ;;  %v1518_v45 = vld [vmem:[#allocation2 + $0x138] sm:$0x1] }
 0x194   : > { %v1569_v48 = vrot.slane %v5798_v38, 1  ;;  %v1605_v3 = vmul.f32 %v3557_v50, %v5714_v8  ;;  %v3481_v53 = vpop.eup %3480  ;;  %v1787_v31 = vrot.slane %v1752_v1, 7  ;;  %v1682_v40 = vmul.f32 0.5, %v5739_v5 }
 0x195   : > { %v1499_v4 = vadd.f32 %v1473_v12, %v1431_v54  ;;  %v1500_v51 = vadd.f32 %v1475_v32, %v1432_v52  ;;  %v1695_v55 = vmul.f32 0.70710677, %v1671_v20  ;;  %v3483_v63 = vpop.eup %3482  ;;  %v1717_v18 = vadd.f32 1.0, %v3481_v53  ;;  %v7199_v52 = vld [vmem:[#allocation126_spill] sm:$0xff]  ;;  %v7204_v53 = vld [vmem:[#allocation132_spill] sm:$0xff] }
 0x196   : > { %v1570_v44 = vsel %vm547_vm2, %v1568_v57, %v1569_v48  ;;  %v1634_v49 = vrot.slane %v1604_v17, 2  ;;  %v1788_v36 = vsel %vm1136_vm4, %v1785_v30, %v1787_v31  ;;  %v1718_v28 = vadd.f32 1.0, %v3483_v63  ;;  %v7206_v31 = vld [vmem:[#allocation125_spill] sm:$0xff] }
 0x197   : > { %v1540_v15 = vadd.f32 %v1528_v9, %v1499_v4  ;;  %v1541_v24 = vadd.f32 %v1529_v34, %v1500_v51  ;;  %3484 = verf.f32 %v1695_v55  ;;  %v1810_v58 = vadd.f32 %v3312_v62, %v1788_v36  ;;  %v7196_v9 = vld [vmem:[#allocation30_spill] sm:$0xff] }
 0x198   : > { %v1729_v21 = vmul.f32 %v1717_v18, %v5756_v61  ;;  %v1635_v6 = vrot.slane %v1605_v3, 2  ;;  %v1730_v56 = vmul.f32 %v1718_v28, %v1682_v40  ;;  %v1683_v37 = vmul.f32 0.5, %v1671_v20 }
 0x199   : > { %v1592_v59 = vadd.f32 %v1568_v57, %v1540_v15  ;;  %v1593_v5 = vadd.f32 %v1570_v44, %v1541_v24  ;;  %v7197_v47 = vrot.slane %v7196_v9, 2  ;;  %v7198_v13 = vrot.slane %v7183_v16, 2  ;;  %3320 = vst.msk [vmem:[%s5396_s11 + $0x58] sm:$0xff] %vm324_vm0, %v1810_v58  ;;  %v5835_v16 = vld [vmem:[%s6610_s3] ss:$0 sm:$0xff]  ;;  %v7208_v24 = vld [vmem:[#allocation133_spill] sm:$0xff] }
 0x19a   : > { %v1741_v30 = vmul.f32 %v5346_v43, %v1729_v21  ;;  %v1636_v34 = vsel %vm612_vm3, %v1634_v49, %v1635_v6  ;;  %v7201_v32 = vrot.slane %v7200_v11, 2  ;;  %v7202_v35 = vrot.slane %v7194_v19, 2  ;;  %v7203_v57 = vld [vmem:[#allocation130_spill] sm:$0xff] }
 0x19b   : > { %v1660_v12 = vadd.f32 %v1634_v49, %v1592_v59  ;;  %v1317_v54 = vsel %vm612_vm3, %v7198_v13, %v7197_v47  ;;  %v1742_v20 = vmul.f32 %v5835_v16, %v1730_v56  ;;  %v1661_v4 = vadd.f32 %v1636_v34, %v1593_v5  ;;  %v7210_v49 = vld [vmem:[#allocation128_spill] sm:$0xff]  ;;  %v7213_v5 = vld [vmem:[#allocation127_spill] sm:$0xff] }
 0x19c   : > { %v1341_v61 = vadd.f32 %v1317_v54, %v7199_v52  ;;  %v1477_v1 = vsel %vm612_vm3, %v7202_v35, %v7201_v32  ;;  %v1606_v17 = vmul.f32 %v5714_v8, %v1518_v45  ;;  %v1753_v51 = vadd.f32 %v5356_v23, %v1741_v30  ;;  %v3313_v56 = vld [vmem:[%s3927_s27 + $0x60] sm:$0xff]  ;;  %v7216_v32 = vld [vmem:[#allocation140_spill] sm:$0xff] }
 0x19d   : > { %v1672_v43 = vadd.f32 %v5804_v0, %v1660_v12  ;;  %v1530_v19 = vmul.f32 %v3557_v50, %v5710_v7  ;;  %v7205_v62 = vrot.slane %v7204_v53, 1  ;;  %v7207_v40 = vrot.slane %v7206_v31, 1  ;;  %v7214_v54 = vld [vmem:[#allocation134_spill] sm:$0xff] }
 0x19e   : > { %v1381_v3 = vadd.f32 %v7203_v57, %v1341_v61  ;;  %v5849_v15 = vadd.f32 %v5356_v23, %v1742_v20  ;;  %v1673_v63 = vadd.f32 %v5804_v0, %v1661_v4  ;;  %v7209_v44 = vrot.slane %v7208_v24, 2  ;;  %v3560_v20 = vld [vmem:[#allocation2 + $0x128] sm:$0xff] }
 0x19f   : > { %v1883_v55 = vsel %vm547_vm2, %v7207_v40, %v7205_v62  ;;  %v1696_v18 = vmul.f32 0.70710677, %v1672_v43  ;;  %v7211_v36 = vrot.slane %v7210_v49, 2  ;;  %v1789_v59 = vrot.slane %v1753_v51, 7  ;;  %v2147_v4 = vld [vmem:[#allocation2 + $0x148] sm:$0xff]  ;;  %v7217_v51 = vld [vmem:[#allocation18_spill] sm:$0xff] }
 0x1a0   : > { %v7212_v50 = vrot.slane %v7192_v60, 1  ;;  %v1637_v21 = vrot.slane %v1606_v17, 2  ;;  %v1906_v45 = vadd.f32 %v1883_v55, %v7213_v5  ;;  %v1790_v23 = vrot.slane %v5849_v15, 7  ;;  %v2146_v60 = vld [vmem:[#allocation2 + $0x140] sm:$0xff] }
 0x1a1   : > { %v1943_v28 = vsel %vm612_vm3, %v7211_v36, %v7209_v44  ;;  %v5862_v12 = vmul.f32 0.5, %v1672_v43  ;;  %v1697_v9 = vmul.f32 0.70710677, %v1673_v63  ;;  %3486 = verf.f32 %v1696_v18  ;;  %v3485_v61 = vpop.eup %3484 }
 0x1a2   : > { %v1433_v58 = vadd.f32 %v7212_v50, %v1381_v3  ;;  %v1638_v13 = vsel %vm612_vm3, %v1635_v6, %v1637_v21  ;;  %v7215_v30 = vmov %v7211_v36  ;;  %v1974_v52 = vadd.f32 %v1943_v28, %v1906_v45  ;;  %v7218_v3 = vld [vmem:[#allocation138_spill] sm:$0xff]  ;;  %v7220_v28 = vld [vmem:[#allocation145_spill] sm:$0xff] }
 0x1a3   : > { %v1973_v34 = vadd.f32 %v7215_v30, %v7214_v54  ;;  %v1791_v11 = vsel %vm1136_vm4, %v1789_v59, %v1790_v23  ;;  %3488 = verf.f32 %v1697_v9  ;;  %v2041_v35 = vrot.slane %v7216_v32, 1  ;;  %v3561_v21 = vld [vmem:[#allocation2 + $0x150] sm:$0xff]  ;;  %v5900_v30 = vld [vmem:[%s6611_s4] ss:$0 sm:$0xff] }
 0x1a4   : > { %v1501_v47 = vadd.f32 %v1477_v1, %v1433_v58  ;;  %v2077_v1 = vmul.f32 %v3560_v20, %v5778_v29  ;;  %v1811_v6 = vadd.f32 %v3313_v56, %v1791_v11  ;;  %v1719_v43 = vadd.f32 1.0, %v3485_v61  ;;  %v7222_v20 = vld [vmem:[#allocation37_spill] sm:$0xff] }
 0x1a5   : > { %v2013_v57 = vadd.f32 %v7217_v51, %v1973_v34  ;;  %v2014_v53 = vadd.f32 %v7218_v3, %v1974_v52  ;;  %v7219_v62 = vrot.slane %v4901_v42, 1  ;;  %v2162_v55 = vmul.f32 %v5710_v7, %v2146_v60 }
 0x1a6   : > { %v1542_v17 = vadd.f32 %v1530_v19, %v1501_v47  ;;  %v2101_v40 = vrot.slane %v2077_v1, 2  ;;  %3321 = vst.msk [vmem:[%s5396_s11 + $0x60] sm:$0xff] %vm324_vm0, %v1811_v6  ;;  %v1731_v18 = vmul.f32 %v1719_v43, %v1683_v37  ;;  %v2163_v19 = vmul.f32 %v5710_v7, %v2147_v4  ;;  %v3314_v43 = vld [vmem:[%s3927_s27 + $0x68] sm:$0xff] }
 0x1a7   : > { %v2043_v31 = vsel %vm547_vm2, %v2041_v35, %v7219_v62  ;;  %v2065_v49 = vadd.f32 %v2041_v35, %v2013_v57  ;;  %v7221_v59 = vrot.slane %v7220_v28, 2  ;;  %v2186_v58 = vmul.f32 %v5703_v39, %v2147_v4 }
 0x1a8   : > { %v1594_v44 = vadd.f32 %v1569_v48, %v1542_v17  ;;  %v2066_v36 = vadd.f32 %v2043_v31, %v2014_v53  ;;  %v5889_v5 = vmul.f32 %v3561_v21, %v5703_v39  ;;  %v1743_v45 = vmul.f32 %v5835_v16, %v1731_v18 }
 0x1a9   : > { %v2103_v50 = vsel %vm612_vm3, %v2101_v40, %v7221_v59  ;;  %v2133_v56 = vadd.f32 %v2101_v40, %v2065_v49  ;;  %v2238_v38 = vmul.f32 %v5714_v8, %v2147_v4  ;;  %v2202_v9 = vrot.slane %v2186_v58, 1  ;;  %v7225_v40 = vld [vmem:[#allocation139_spill] sm:$0xff]  ;;  %v2149_v49 = vld [vmem:[#allocation2 + $0x158] sm:$0x1] }
 0x1aa   : > { %v1662_v37 = vadd.f32 %v1638_v13, %v1594_v44  ;;  %v2134_v48 = vadd.f32 %v2103_v50, %v2066_v36  ;;  %v2203_v47 = vrot.slane %v5889_v5, 1  ;;  %v5895_v54 = vmul.f32 %v3561_v21, %v5714_v8  ;;  %v7226_v50 = vld [vmem:[#allocation144_spill] sm:$0xff] }
 0x1ab   : > { %v1755_v34 = vadd.f32 %v5900_v30, %v1743_v45  ;;  %v2174_v52 = vadd.f32 %v2162_v55, %v2133_v56  ;;  %v2262_v60 = vrot.slane %v2238_v38, 2  ;;  %v3487_v61 = vpop.eup %3486  ;;  %v1685_v11 = vmul.f32 0.5, %v1673_v63  ;;  %v7227_v38 = vld [vmem:[#allocation44_spill] sm:$0xff] }
 0x1ac   : > { %v1674_v13 = vadd.f32 %v5804_v0, %v1662_v37  ;;  %v2175_v32 = vadd.f32 %v2163_v19, %v2134_v48  ;;  %v2263_v35 = vrot.slane %v5895_v54, 2  ;;  %v7223_v1 = vrot.slane %v7222_v20, 2 }
 0x1ad   : > { %v7224_v4 = vrot.slane %v7208_v24, 2  ;;  %v1792_v17 = vrot.slane %v1755_v34, 7  ;;  %v1720_v51 = vadd.f32 1.0, %v3487_v61  ;;  %v2204_v3 = vsel %vm547_vm2, %v2202_v9, %v2203_v47  ;;  %v3489_v53 = vpop.eup %3488  ;;  %v7231_v61 = vld [vmem:[#allocation141_spill] sm:$0xff] }
 0x1ae   : > { %v1698_v57 = vmul.f32 0.70710677, %v1674_v13  ;;  %v2226_v62 = vadd.f32 %v2202_v9, %v2174_v52  ;;  %v2227_v63 = vadd.f32 %v2204_v3, %v2175_v32  ;;  %v2264_v31 = vsel %vm612_vm3, %v2262_v60, %v2263_v35  ;;  %v7233_v32 = vld [vmem:[#allocation136_spill] sm:$0xff] }
 0x1af   : > { %v1945_v6 = vsel %vm612_vm3, %v7224_v4, %v7223_v1  ;;  %v1793_v24 = vsel %vm1136_vm4, %v1790_v23, %v1792_v17  ;;  %v1721_v18 = vadd.f32 1.0, %v3489_v53  ;;  %v1732_v44 = vmul.f32 %v1720_v51, %v5862_v12  ;;  %v7237_v51 = vld [vmem:[#allocation137_spill] sm:$0xff] }
 0x1b0   : > { %v1975_v55 = vadd.f32 %v1945_v6, %v7225_v40  ;;  %3490 = verf.f32 %v1698_v57  ;;  %v1812_v19 = vadd.f32 %v3314_v43, %v1793_v24  ;;  %v2294_v36 = vadd.f32 %v2262_v60, %v2226_v62  ;;  %v7235_v43 = vld [vmem:[#allocation142_spill] sm:$0xff] }
 0x1b1   : > { %v2295_v59 = vadd.f32 %v2264_v31, %v2227_v63  ;;  %v1733_v45 = vmul.f32 %v1721_v18, %v1685_v11  ;;  %v1744_v37 = vmul.f32 %v5835_v16, %v1732_v44  ;;  %v1686_v56 = vmul.f32 0.5, %v1674_v13  ;;  %v7239_v31 = vld [vmem:[#allocation135_spill] sm:$0xff] }
 0x1b2   : > { %v2015_v58 = vadd.f32 %v7226_v50, %v1975_v55  ;;  %v7228_v48 = vrot.slane %v7227_v38, 2  ;;  %v7229_v15 = vrot.slane %v7220_v28, 2  ;;  %3322 = vst.msk [vmem:[%s5396_s11 + $0x68] sm:$0xff] %vm324_vm0, %v1812_v19  ;;  %v2306_v12 = vadd.f32 %v5804_v0, %v2294_v36  ;;  %v7240_v55 = vld [vmem:[#allocation143_spill] sm:$0xff]  ;;  %v3315_v36 = vld [vmem:[%s3927_s27 + $0x70] sm:$0xff] }
 0x1b3   : > { %v2307_v9 = vadd.f32 %v5804_v0, %v2295_v59  ;;  %v7230_v54 = vrot.slane %v4901_v42, 1  ;;  %v2240_v52 = vmul.f32 %v5714_v8, %v2149_v49  ;;  %v1745_v60 = vmul.f32 %v5835_v16, %v1733_v45  ;;  %v7242_v44 = vld [vmem:[#allocation151_spill] sm:$0xff] }
 0x1b4   : > { %v2105_v23 = vsel %vm612_vm3, %v7229_v15, %v7228_v48  ;;  %v1756_v13 = vadd.f32 %v5900_v30, %v1744_v37  ;;  %v2164_v28 = vmul.f32 %v3561_v21, %v5710_v7  ;;  %v7232_v11 = vrot.slane %v7231_v61, 1  ;;  %v2150_v19 = vld [vmem:[#allocation2 + $0x160] sm:$0xff]  ;;  %v3563_v15 = vld [vmem:[#allocation2 + $0x148] sm:$0xff] }
 0x1b5   : > { %v2067_v34 = vadd.f32 %v7230_v54, %v2015_v58  ;;  %v7234_v20 = vrot.slane %v7233_v32, 1  ;;  %v5942_v4 = vmul.f32 0.5, %v2306_v12  ;;  %v2330_v6 = vmul.f32 0.70710677, %v2306_v12  ;;  %v7243_v38 = vld [vmem:[#allocation19_spill] sm:$0xff]  ;;  %v7245_v61 = vld [vmem:[#allocation150_spill] sm:$0xff] }
 0x1b6   : > { %v2331_v42 = vmul.f32 0.70710677, %v2307_v9  ;;  %v7236_v17 = vrot.slane %v7235_v43, 2  ;;  %v7238_v57 = vrot.slane %v7237_v51, 2  ;;  %v5950_v53 = vadd.f32 %v5900_v30, %v1745_v60  ;;  %v2151_v12 = vld [vmem:[#allocation2 + $0x168] sm:$0xff] }
 0x1b7   : > { %v1886_v1 = vsel %vm547_vm2, %v7234_v20, %v7232_v11  ;;  %v1794_v21 = vrot.slane %v1756_v13, 7  ;;  %v2135_v62 = vadd.f32 %v2105_v23, %v2067_v34  ;;  %v2265_v63 = vrot.slane %v2240_v52, 2 }
 0x1b8   : > { %v1948_v3 = vsel %vm612_vm3, %v7238_v57, %v7236_v17  ;;  %3492 = verf.f32 %v2330_v6  ;;  %v1909_v40 = vadd.f32 %v1886_v1, %v7239_v31  ;;  %v7241_v24 = vmov %v7238_v57 }
 0x1b9   : > { %v1976_v18 = vadd.f32 %v7241_v24, %v7240_v55  ;;  %v2044_v49 = vrot.slane %v7242_v44, 1  ;;  %v1795_v59 = vrot.slane %v5950_v53, 7  ;;  %v2319_v50 = vmul.f32 0.5, %v2307_v9 }
 0x1ba   : > { %3494 = verf.f32 %v2331_v42  ;;  %v2176_v58 = vadd.f32 %v2164_v28, %v2135_v62  ;;  %v2266_v45 = vsel %vm612_vm3, %v2263_v35, %v2265_v63  ;;  %v1977_v37 = vadd.f32 %v1948_v3, %v1909_v40  ;;  %v3491_v54 = vpop.eup %3490  ;;  %v3564_v42 = vld [vmem:[#allocation2 + $0x170] sm:$0xff] }
 0x1bb   : > { %v2016_v48 = vadd.f32 %v7243_v38, %v1976_v18  ;;  %v2080_v23 = vmul.f32 %v3563_v15, %v5778_v29  ;;  %v1796_v34 = vsel %vm1136_vm4, %v1794_v21, %v1795_v59  ;;  %v7244_v9 = vrot.slane %v4947_v25, 1 }
 0x1bc   : > { %v2228_v52 = vadd.f32 %v2203_v47, %v2176_v58  ;;  %v2165_v35 = vmul.f32 %v5710_v7, %v2150_v19  ;;  %v1813_v13 = vadd.f32 %v3315_v36, %v1796_v34  ;;  %v1722_v28 = vadd.f32 1.0, %v3491_v54 }
 0x1bd   : > { %v2046_v60 = vsel %vm547_vm2, %v2044_v49, %v7244_v9  ;;  %v2017_v11 = vadd.f32 %v7245_v61, %v1977_v37  ;;  %v2068_v32 = vadd.f32 %v2044_v49, %v2016_v48  ;;  %v2106_v1 = vrot.slane %v2080_v23, 2  ;;  %v7247_v37 = vld [vmem:[#allocation38_spill] sm:$0xff]  ;;  %v2153_v61 = vld [vmem:[#allocation2 + $0x178] sm:$0x1] }
 0x1be   : > { %v2296_v20 = vadd.f32 %v2266_v45, %v2228_v52  ;;  %v2188_v6 = vmul.f32 %v5703_v39, %v2151_v12  ;;  %v5972_v17 = vmul.f32 %v3564_v42, %v5703_v39  ;;  %3323 = vst.msk [vmem:[%s5396_s11 + $0x70] sm:$0xff] %vm324_vm0, %v1813_v13  ;;  %v1734_v5 = vmul.f32 %v1722_v28, %v1686_v56  ;;  %v3316_v52 = vld [vmem:[%s3927_s27 + $0x78] sm:$0xff] }
 0x1bf   : > { %v2069_v47 = vadd.f32 %v2046_v60, %v2017_v11  ;;  %v2241_v51 = vmul.f32 %v5714_v8, %v2151_v12  ;;  %v2242_v57 = vmul.f32 %v3564_v42, %v5714_v8  ;;  %v7246_v53 = vrot.slane %v4950_v33, 2  ;;  %v7250_v13 = vld [vmem:[#allocation149_spill] sm:$0xff] }
 0x1c0   : > { %v2308_v3 = vadd.f32 %v5804_v0, %v2296_v20  ;;  %v2136_v62 = vadd.f32 %v2106_v1, %v2068_v32  ;;  %v2205_v63 = vrot.slane %v2188_v6, 1  ;;  %v1746_v31 = vmul.f32 %v5835_v16, %v1734_v5  ;;  %v7251_v20 = vld [vmem:[#allocation45_spill] sm:$0xff] }
 0x1c1   : > { %v2108_v21 = vsel %vm612_vm3, %v2106_v1, %v7246_v53  ;;  %v2166_v55 = vmul.f32 %v5710_v7, %v2151_v12  ;;  %v2206_v56 = vrot.slane %v5972_v17, 1  ;;  %v2267_v44 = vrot.slane %v2241_v51, 2 }
 0x1c2   : > { %v2137_v40 = vadd.f32 %v2108_v21, %v2069_v47  ;;  %v2332_v24 = vmul.f32 0.70710677, %v2308_v3  ;;  %v2177_v18 = vadd.f32 %v2165_v35, %v2136_v62  ;;  %v2268_v49 = vrot.slane %v2242_v57, 2  ;;  %v3493_v19 = vpop.eup %3492 }
 0x1c3   : > { %v1758_v36 = vadd.f32 %v5900_v30, %v1746_v31  ;;  %v5986_v58 = vmul.f32 0.5, %v2308_v3  ;;  %v7248_v38 = vrot.slane %v7247_v37, 2  ;;  %v7249_v48 = vrot.slane %v7235_v43, 2  ;;  %v7254_v3 = vld [vmem:[#allocation155_spill] sm:$0xff] }
 0x1c4   : > { %v2178_v45 = vadd.f32 %v2166_v55, %v2137_v40  ;;  %v3495_v23 = vpop.eup %3494  ;;  %v2354_v12 = vadd.f32 1.0, %v3493_v19  ;;  %3496 = verf.f32 %v2332_v24  ;;  %v2207_v54 = vsel %vm547_vm2, %v2205_v63, %v2206_v56  ;;  %v7256_v24 = vld [vmem:[#allocation152_spill] sm:$0xff] }
 0x1c5   : > { %v1950_v15 = vsel %vm612_vm3, %v7249_v48, %v7248_v38  ;;  %v2229_v34 = vadd.f32 %v2205_v63, %v2177_v18  ;;  %v1797_v9 = vrot.slane %v1758_v36, 7  ;;  %v2355_v60 = vadd.f32 1.0, %v3495_v23 }
 0x1c6   : > { %v2230_v35 = vadd.f32 %v2207_v54, %v2178_v45  ;;  %v1978_v28 = vadd.f32 %v1950_v15, %v7250_v13  ;;  %v2366_v11 = vmul.f32 %v2354_v12, %v5942_v4  ;;  %v2269_v43 = vsel %vm612_vm3, %v2267_v44, %v2268_v49  ;;  %v7260_v54 = vld [vmem:[#allocation146_spill] sm:$0xff] }
 0x1c7   : > { %v2297_v32 = vadd.f32 %v2267_v44, %v2229_v34  ;;  %v7252_v1 = vrot.slane %v7251_v20, 2  ;;  %v7253_v6 = vmov %v7246_v53  ;;  %v1798_v47 = vsel %vm1136_vm4, %v1795_v59, %v1797_v9  ;;  %v3325_v9 = vld [vmem:[%s3927_s27 + $0x80] sm:$0xff] }
 0x1c8   : > { %v2367_v51 = vmul.f32 %v2355_v60, %v2319_v50  ;;  %v2298_v57 = vadd.f32 %v2269_v43, %v2230_v35  ;;  %v2018_v53 = vadd.f32 %v7254_v3, %v1978_v28  ;;  %v1814_v21 = vadd.f32 %v3316_v52, %v1798_v47  ;;  %v7258_v50 = vld [vmem:[#allocation147_spill] sm:$0xff]  ;;  %v7261_v35 = vld [vmem:[#allocation153_spill] sm:$0xff]  ;;  %v7263_v28 = vld [vmem:[#allocation148_spill] sm:$0xff] }
 0x1c9   : > { %v2110_v5 = vsel %vm612_vm3, %v7253_v6, %v7252_v1  ;;  %v2378_v62 = vmul.f32 %v5835_v16, %v2366_v11  ;;  %v2309_v4 = vadd.f32 %v5804_v0, %v2297_v32  ;;  %v2243_v63 = vmul.f32 %v5714_v8, %v2153_v61  ;;  %v2154_v52 = vld [vmem:[#allocation2 + $0x180] sm:$0xff]  ;;  %v7267_v6 = vld [vmem:[#allocation161_spill] sm:$0xff]  ;;  %v3565_v47 = vld [vmem:[#allocation2 + $0x168] sm:$0xff] }
 0x1ca   : > { %v2379_v31 = vmul.f32 %v5835_v16, %v2367_v51  ;;  %v2310_v40 = vadd.f32 %v5804_v0, %v2298_v57  ;;  %v7255_v33 = vrot.slane %v4947_v25, 1  ;;  %v7257_v59 = vrot.slane %v7256_v24, 1  ;;  %3324 = vst.msk [vmem:[%s5396_s11 + $0x78] sm:$0xff] %vm324_vm0, %v1814_v21  ;;  %v7265_v32 = vld [vmem:[#allocation154_spill] sm:$0xff]  ;;  %v2155_v57 = vld [vmem:[#allocation2 + $0x188] sm:$0xff] }
 0x1cb   : > { %v7259_v18 = vrot.slane %v7258_v50, 1  ;;  %v2390_v19 = vadd.f32 %v5900_v30, %v2378_v62  ;;  %v2333_v36 = vmul.f32 0.70710677, %v2309_v4  ;;  %v2167_v45 = vmul.f32 %v3564_v42, %v5710_v7 }
 0x1cc   : > { %v2070_v55 = vadd.f32 %v7255_v33, %v2018_v53  ;;  %v2270_v37 = vrot.slane %v2243_v63, 2  ;;  %v6024_v38 = vadd.f32 %v5900_v30, %v2379_v31  ;;  %v6026_v25 = vmul.f32 0.5, %v2309_v4  ;;  %v7268_v63 = vld [vmem:[#allocation20_spill] sm:$0xff] }
 0x1cd   : > { %v1889_v44 = vsel %vm547_vm2, %v7259_v18, %v7257_v59  ;;  %v2334_v48 = vmul.f32 0.70710677, %v2310_v40  ;;  %v2422_v23 = vrot.slane %v2390_v19, 7  ;;  %3498 = verf.f32 %v2333_v36  ;;  %v7269_v33 = vld [vmem:[#allocation160_spill] sm:$0xff] }
 0x1ce   : > { %v2138_v15 = vadd.f32 %v2110_v5, %v2070_v55  ;;  %v2271_v12 = vsel %vm612_vm3, %v2268_v49, %v2270_v37  ;;  %v1912_v34 = vadd.f32 %v1889_v44, %v7260_v54  ;;  %v2423_v60 = vrot.slane %v6024_v38, 7  ;;  %v3497_v43 = vpop.eup %3496 }
 0x1cf   : > { %3500 = verf.f32 %v2334_v48  ;;  %v7262_v13 = vrot.slane %v7261_v35, 2  ;;  %v7264_v61 = vrot.slane %v7263_v28, 2  ;;  %v2047_v5 = vrot.slane %v7267_v6, 1  ;;  %v3326_v6 = vld [vmem:[%s3927_s27 + $0x88] sm:$0xff] }
 0x1d0   : > { %v2179_v42 = vadd.f32 %v2167_v45, %v2138_v15  ;;  %v2083_v51 = vmul.f32 %v3565_v47, %v5778_v29  ;;  %v2424_v3 = vsel %vm1136_vm4, %v2422_v23, %v2423_v60  ;;  %v2356_v53 = vadd.f32 1.0, %v3497_v43  ;;  %v3566_v45 = vld [vmem:[#allocation2 + $0x190] sm:$0xff] }
 0x1d1   : > { %v1953_v11 = vsel %vm612_vm3, %v7264_v61, %v7262_v13  ;;  %v7266_v20 = vmov %v7264_v61  ;;  %v2168_v62 = vmul.f32 %v5710_v7, %v2154_v52  ;;  %v2450_v4 = vadd.f32 %v3325_v9, %v2424_v3  ;;  %v7271_v15 = vld [vmem:[#allocation165_spill] sm:$0xff] }
 0x1d2   : > { %v1979_v1 = vadd.f32 %v7266_v20, %v7265_v32  ;;  %v1980_v49 = vadd.f32 %v1953_v11, %v1912_v34  ;;  %v2231_v21 = vadd.f32 %v2206_v56, %v2179_v42  ;;  %v7270_v24 = vrot.slane %v4998_v27, 1 }
 0x1d3   : > { %v2368_v50 = vmul.f32 %v2356_v53, %v5986_v58  ;;  %v2111_v44 = vrot.slane %v2083_v51, 2  ;;  %v2169_v19 = vmul.f32 %v5710_v7, %v2155_v57  ;;  %3333 = vst.msk [vmem:[%s5396_s11 + $0x80] sm:$0xff] %vm324_vm0, %v2450_v4  ;;  %v2190_v36 = vmul.f32 %v5703_v39, %v2155_v57  ;;  %v7273_v53 = vld [vmem:[#allocation39_spill] sm:$0xff] }
 0x1d4   : > { %v2019_v31 = vadd.f32 %v7268_v63, %v1979_v1  ;;  %v2020_v55 = vadd.f32 %v7269_v33, %v1980_v49  ;;  %v2049_v59 = vsel %vm547_vm2, %v2047_v5, %v7270_v24  ;;  %v2299_v18 = vadd.f32 %v2271_v12, %v2231_v21 }
 0x1d5   : > { %v6057_v37 = vmul.f32 %v3566_v45, %v5703_v39  ;;  %v2380_v38 = vmul.f32 %v5835_v16, %v2368_v50  ;;  %v7272_v58 = vrot.slane %v7271_v15, 2  ;;  %v2244_v12 = vmul.f32 %v5714_v8, %v2155_v57 }
 0x1d6   : > { %v2071_v17 = vadd.f32 %v2047_v5, %v2019_v31  ;;  %v2072_v56 = vadd.f32 %v2049_v59, %v2020_v55  ;;  %v2311_v48 = vadd.f32 %v5804_v0, %v2299_v18  ;;  %v2208_v52 = vrot.slane %v2190_v36, 1  ;;  %v7276_v55 = vld [vmem:[#allocation159_spill] sm:$0xff]  ;;  %v2157_v59 = vld [vmem:[#allocation2 + $0x198] sm:$0x1]  ;;  %v7277_v36 = vld [vmem:[#allocation166_spill] sm:$0xff] }
 0x1d7   : > { %v2113_v23 = vsel %vm612_vm3, %v2111_v44, %v7272_v58  ;;  %v2209_v9 = vrot.slane %v6057_v37, 1  ;;  %v2392_v42 = vadd.f32 %v5900_v30, %v2380_v38  ;;  %v2322_v13 = vmul.f32 0.5, %v2310_v40  ;;  %v3499_v11 = vpop.eup %3498  ;;  %v7278_v38 = vld [vmem:[#allocation46_spill] sm:$0xff] }
 0x1d8   : > { %v2139_v54 = vadd.f32 %v2111_v44, %v2071_v17  ;;  %v2140_v34 = vadd.f32 %v2113_v23, %v2072_v56  ;;  %v2335_v28 = vmul.f32 0.70710677, %v2311_v48  ;;  %v2245_v61 = vmul.f32 %v3566_v45, %v5714_v8 }
 0x1d9   : > { %v2210_v20 = vsel %vm547_vm2, %v2208_v52, %v2209_v9  ;;  %v2272_v1 = vrot.slane %v2244_v12, 2  ;;  %v3501_v49 = vpop.eup %3500  ;;  %v2425_v5 = vrot.slane %v2392_v42, 7  ;;  %v2357_v47 = vadd.f32 1.0, %v3499_v11 }
 0x1da   : > { %v2180_v43 = vadd.f32 %v2168_v62, %v2139_v54  ;;  %v2181_v32 = vadd.f32 %v2169_v19, %v2140_v34  ;;  %3502 = verf.f32 %v2335_v28  ;;  %v2273_v51 = vrot.slane %v2245_v61, 2  ;;  %v7284_v61 = vld [vmem:[#allocation156_spill] sm:$0xff] }
 0x1db   : > { %v2358_v57 = vadd.f32 1.0, %v3501_v49  ;;  %v7274_v21 = vrot.slane %v7273_v53, 2  ;;  %v7275_v62 = vrot.slane %v7261_v35, 2  ;;  %v2426_v63 = vsel %vm1136_vm4, %v2423_v60, %v2425_v5  ;;  %v7286_v49 = vld [vmem:[#allocation163_spill] sm:$0xff]  ;;  %v7288_v5 = vld [vmem:[#allocation158_spill] sm:$0xff]  ;;  %v3327_v53 = vld [vmem:[%s3927_s27 + $0x90] sm:$0xff] }
 0x1dc   : > { %v2232_v3 = vadd.f32 %v2208_v52, %v2180_v43  ;;  %v2233_v40 = vadd.f32 %v2210_v20, %v2181_v32  ;;  %v2369_v31 = vmul.f32 %v2357_v47, %v6026_v25  ;;  %v2274_v33 = vsel %vm612_vm3, %v2272_v1, %v2273_v51 }
 0x1dd   : > { %v1955_v4 = vsel %vm612_vm3, %v7275_v62, %v7274_v21  ;;  %v2451_v50 = vadd.f32 %v3326_v6, %v2426_v63  ;;  %v2370_v18 = vmul.f32 %v2358_v57, %v2322_v13  ;;  %v2323_v56 = vmul.f32 0.5, %v2311_v48  ;;  %v7282_v13 = vld [vmem:[#allocation162_spill] sm:$0xff]  ;;  %v7290_v62 = vld [vmem:[#allocation157_spill] sm:$0xff]  ;;  %v7291_v63 = vld [vmem:[#allocation164_spill] sm:$0xff] }
 0x1de   : > { %v1981_v24 = vadd.f32 %v1955_v4, %v7276_v55  ;;  %v2300_v44 = vadd.f32 %v2272_v1, %v2232_v3  ;;  %v2301_v19 = vadd.f32 %v2274_v33, %v2233_v40  ;;  %v2381_v17 = vmul.f32 %v5835_v16, %v2369_v31 }
 0x1df   : > { %v7279_v58 = vrot.slane %v7278_v38, 2  ;;  %v7280_v60 = vrot.slane %v7271_v15, 2  ;;  %3334 = vst.msk [vmem:[%s5396_s11 + $0x88] sm:$0xff] %vm324_vm0, %v2451_v50  ;;  %v2382_v23 = vmul.f32 %v5835_v16, %v2370_v18  ;;  %v2246_v34 = vmul.f32 %v5714_v8, %v2157_v59  ;;  %v7293_v50 = vld [vmem:[#allocation168_spill] sm:$0xff] }
 0x1e0   : > { %v2021_v35 = vadd.f32 %v7277_v36, %v1981_v24  ;;  %v2312_v12 = vadd.f32 %v5804_v0, %v2300_v44  ;;  %v2313_v54 = vadd.f32 %v5804_v0, %v2301_v19  ;;  %v2393_v48 = vadd.f32 %v5900_v30, %v2381_v17  ;;  %v2158_v44 = vld [vmem:[#allocation2 + $0x1a0] sm:$0xff] }
 0x1e1   : > { %v2115_v25 = vsel %vm612_vm3, %v7280_v60, %v7279_v58  ;;  %v7281_v52 = vrot.slane %v4998_v27, 1  ;;  %v2170_v15 = vmul.f32 %v3566_v45, %v5710_v7  ;;  %v7283_v28 = vrot.slane %v7282_v13, 1  ;;  %v2159_v58 = vld [vmem:[#allocation2 + $0x1a8] sm:$0xff] }
 0x1e2   : > { %v7285_v11 = vrot.slane %v7284_v61, 1  ;;  %v6104_v32 = vadd.f32 %v5900_v30, %v2382_v23  ;;  %v6106_v20 = vmul.f32 0.5, %v2312_v12  ;;  %v2336_v1 = vmul.f32 0.70710677, %v2312_v12  ;;  %v7295_v23 = vld [vmem:[#allocation173_spill] sm:$0xff] }
 0x1e3   : > { %v2073_v42 = vadd.f32 %v7281_v52, %v2021_v35  ;;  %v7287_v6 = vrot.slane %v7286_v49, 2  ;;  %v7289_v47 = vrot.slane %v7288_v5, 2  ;;  %v2427_v57 = vrot.slane %v2393_v48, 7  ;;  %v7294_v35 = vld [vmem:[#allocation21_spill] sm:$0xff] }
 0x1e4   : > { %v1892_v43 = vsel %vm547_vm2, %v7285_v11, %v7283_v28  ;;  %v2337_v45 = vmul.f32 0.70710677, %v2313_v54  ;;  %v2275_v40 = vrot.slane %v2246_v34, 2  ;;  %v2428_v21 = vrot.slane %v6104_v32, 7  ;;  %v3503_v55 = vpop.eup %3502 }
 0x1e5   : > { %v1958_v27 = vsel %vm612_vm3, %v7289_v47, %v7287_v6  ;;  %v2141_v3 = vadd.f32 %v2115_v25, %v2073_v42  ;;  %3504 = verf.f32 %v2336_v1  ;;  %v1915_v4 = vadd.f32 %v1892_v43, %v7290_v62  ;;  %v7297_v42 = vld [vmem:[#allocation167_spill] sm:$0xff]  ;;  %v3568_v1 = vld [vmem:[#allocation2 + $0x1b0] sm:$0xff] }
 0x1e6   : > { %v7292_v31 = vmov %v7289_v47  ;;  %3506 = verf.f32 %v2337_v45  ;;  %v2276_v59 = vsel %vm612_vm3, %v2273_v51, %v2275_v40  ;;  %v2050_v18 = vrot.slane %v7293_v50, 1  ;;  %v3567_v51 = vld [vmem:[#allocation2 + $0x188] sm:$0xff] }
 0x1e7   : > { %v1982_v33 = vadd.f32 %v7292_v31, %v7291_v63  ;;  %v2182_v24 = vadd.f32 %v2170_v15, %v2141_v3  ;;  %v2429_v19 = vsel %vm1136_vm4, %v2427_v57, %v2428_v21  ;;  %v2359_v17 = vadd.f32 1.0, %v3503_v55  ;;  %v7298_v47 = vld [vmem:[#allocation175_spill] sm:$0xff] }
 0x1e8   : > { %v1983_v36 = vadd.f32 %v1958_v27, %v1915_v4  ;;  %v2452_v60 = vadd.f32 %v3327_v53, %v2429_v19  ;;  %v7296_v12 = vrot.slane %v7295_v23, 1  ;;  %v2086_v48 = vmul.f32 %v3567_v51, %v5778_v29  ;;  %v2161_v51 = vld [vmem:[#allocation2 + $0x1b8] sm:$0x1] }
 0x1e9   : > { %v2022_v38 = vadd.f32 %v7294_v35, %v1982_v33  ;;  %v2234_v25 = vadd.f32 %v2209_v9, %v2182_v24  ;;  %v2371_v52 = vmul.f32 %v2359_v17, %v2323_v56  ;;  %v2171_v28 = vmul.f32 %v5710_v7, %v2158_v44  ;;  %v3328_v24 = vld [vmem:[%s3927_s27 + $0x98] sm:$0xff]  ;;  %v7300_v35 = vld [vmem:[#allocation40_spill] sm:$0xff] }
 0x1ea   : > { %v2052_v34 = vsel %vm547_vm2, %v2050_v18, %v7296_v12  ;;  %v2023_v15 = vadd.f32 %v7297_v42, %v1983_v36  ;;  %3335 = vst.msk [vmem:[%s5396_s11 + $0x90] sm:$0xff] %vm324_vm0, %v2452_v60  ;;  %v2116_v11 = vrot.slane %v2086_v48, 2  ;;  %v2172_v37 = vmul.f32 %v5710_v7, %v2159_v58 }
 0x1eb   : > { %v2074_v13 = vadd.f32 %v2050_v18, %v2022_v38  ;;  %v2302_v61 = vadd.f32 %v2276_v59, %v2234_v25  ;;  %v2192_v9 = vmul.f32 %v5703_v39, %v2159_v58  ;;  %v2383_v43 = vmul.f32 %v5835_v16, %v2371_v52 }
 0x1ec   : > { %v2075_v32 = vadd.f32 %v2052_v34, %v2023_v15  ;;  %v6137_v56 = vmul.f32 %v3568_v1, %v5703_v39  ;;  %v2247_v6 = vmul.f32 %v5714_v8, %v2159_v58  ;;  %v7299_v27 = vrot.slane %v7298_v47, 2  ;;  %v7303_v15 = vld [vmem:[#allocation170_spill] sm:$0xff]  ;;  %v7308_v47 = vld [vmem:[#allocation176_spill] sm:$0xff] }
 0x1ed   : > { %v2314_v5 = vadd.f32 %v5804_v0, %v2302_v61  ;;  %v2142_v45 = vadd.f32 %v2116_v11, %v2074_v13  ;;  %v2211_v3 = vrot.slane %v2192_v9, 1  ;;  %v2395_v40 = vadd.f32 %v5900_v30, %v2383_v43 }
 0x1ee   : > { %v2118_v57 = vsel %vm612_vm3, %v2116_v11, %v7299_v27  ;;  %v2212_v62 = vrot.slane %v6137_v56, 1  ;;  %v2248_v4 = vmul.f32 %v3568_v1, %v5714_v8  ;;  %v2325_v63 = vmul.f32 0.5, %v2313_v54 }
 0x1ef   : > { %v2143_v53 = vadd.f32 %v2118_v57, %v2075_v32  ;;  %v2338_v39 = vmul.f32 0.70710677, %v2314_v5  ;;  %v2183_v31 = vadd.f32 %v2171_v28, %v2142_v45  ;;  %v2277_v33 = vrot.slane %v2247_v6, 2  ;;  %v3505_v55 = vpop.eup %3504  ;;  %v7307_v6 = vld [vmem:[#allocation174_spill] sm:$0xff] }
 0x1f0   : > { %v2430_v59 = vrot.slane %v2395_v40, 7  ;;  %v2213_v18 = vsel %vm547_vm2, %v2211_v3, %v2212_v62  ;;  %v2278_v44 = vrot.slane %v2248_v4, 2  ;;  %v3507_v19 = vpop.eup %3506  ;;  %v2360_v17 = vadd.f32 1.0, %v3505_v55  ;;  %v7310_v40 = vld [vmem:[#allocation169_spill] sm:$0xff] }
 0x1f1   : > { %v2184_v50 = vadd.f32 %v2172_v37, %v2143_v53  ;;  %3508 = verf.f32 %v2338_v39  ;;  %v2235_v36 = vadd.f32 %v2211_v3, %v2183_v31  ;;  %v7301_v38 = vrot.slane %v7300_v35, 2  ;;  %v7304_v37 = vld [vmem:[#allocation47_spill] sm:$0xff] }
 0x1f2   : > { %v7302_v54 = vrot.slane %v7286_v49, 2  ;;  %v2431_v60 = vsel %vm1136_vm4, %v2428_v21, %v2430_v59  ;;  %v2361_v25 = vadd.f32 1.0, %v3507_v19  ;;  %v2279_v34 = vsel %vm612_vm3, %v2277_v33, %v2278_v44 }
 0x1f3   : > { %v2236_v12 = vadd.f32 %v2213_v18, %v2184_v50  ;;  %v2453_v48 = vadd.f32 %v3328_v24, %v2431_v60  ;;  %v2372_v52 = vmul.f32 %v2360_v17, %v6106_v20  ;;  %v2303_v42 = vadd.f32 %v2277_v33, %v2235_v36  ;;  %v7315_v24 = vld [vmem:[#allocation172_spill] sm:$0xff] }
 0x1f4   : > { %v1960_v58 = vsel %vm612_vm3, %v7302_v54, %v7301_v38  ;;  %v2373_v28 = vmul.f32 %v2361_v25, %v2325_v63  ;;  %v2326_v61 = vmul.f32 0.5, %v2314_v5  ;;  %v7305_v49 = vrot.slane %v7304_v37, 2  ;;  %v7317_v38 = vld [vmem:[#allocation171_spill] sm:$0xff] }
 0x1f5   : > { %v1984_v13 = vadd.f32 %v1960_v58, %v7303_v15  ;;  %v2304_v11 = vadd.f32 %v2279_v34, %v2236_v12  ;;  %v7306_v9 = vmov %v7299_v27  ;;  %3336 = vst.msk [vmem:[%s5396_s11 + $0x98] sm:$0xff] %vm324_vm0, %v2453_v48  ;;  %v2384_v43 = vmul.f32 %v5835_v16, %v2372_v52  ;;  %v3329_v58 = vld [vmem:[%s3927_s27 + $0xa0] sm:$0xff]  ;;  %v7320_v15 = vld [vmem:[#allocation184_spill] sm:$0xff] }
 0x1f6   : > { %v2120_v21 = vsel %vm612_vm3, %v7306_v9, %v7305_v49  ;;  %v2315_v32 = vadd.f32 %v5804_v0, %v2303_v42  ;;  %v2249_v27 = vmul.f32 %v5714_v8, %v2161_v51  ;;  %v2385_v57 = vmul.f32 %v5835_v16, %v2373_v28  ;;  %v7313_v8 = vld [vmem:[#allocation177_spill] sm:$0xff]  ;;  %v7318_v12 = vld [vmem:[#allocation178_spill] sm:$0xff]  ;;  %v3569_v28 = vld [vmem:[#allocation2 + $0x1a8] sm:$0xff] }
 0x1f7   : > { %v2024_v20 = vadd.f32 %v7307_v6, %v1984_v13  ;;  %v2316_v5 = vadd.f32 %v5804_v0, %v2304_v11  ;;  %v2173_v45 = vmul.f32 %v3568_v1, %v5710_v7  ;;  %v7309_v3 = vrot.slane %v7308_v47, 1  ;;  %v2790_v37 = vld [vmem:[#allocation2 + $0x1c8] sm:$0xff] }
 0x1f8   : > { %v7311_v53 = vrot.slane %v7310_v40, 1  ;;  %v2396_v63 = vadd.f32 %v5900_v30, %v2384_v43  ;;  %v2339_v39 = vmul.f32 0.70710677, %v2315_v32  ;;  %v7312_v31 = vrot.slane %v7295_v23, 1  ;;  %v2789_v23 = vld [vmem:[#allocation2 + $0x1c0] sm:$0xff] }
 0x1f9   : > { %v7314_v55 = vrot.slane %v7313_v8, 2  ;;  %v7316_v59 = vrot.slane %v7315_v24, 2  ;;  %v6188_v1 = vadd.f32 %v5900_v30, %v2385_v57  ;;  %v6190_v18 = vmul.f32 0.5, %v2315_v32  ;;  %v7323_v57 = vld [vmem:[#allocation187_spill] sm:$0xff] }
 0x1fa   : > { %v2526_v4 = vsel %vm547_vm2, %v7311_v53, %v7309_v3  ;;  %v2076_v33 = vadd.f32 %v7312_v31, %v2024_v20  ;;  %v2340_v19 = vmul.f32 0.70710677, %v2316_v5  ;;  %v2280_v17 = vrot.slane %v2249_v27, 2  ;;  %v7322_v20 = vld [vmem:[#allocation182_spill] sm:$0xff]  ;;  %v6210_v53 = vld [vmem:[#allocation6 + $0x8] ss:$0 sm:$0xff] }
 0x1fb   : > { %v2586_v50 = vsel %vm612_vm3, %v7316_v59, %v7314_v55  ;;  %v2432_v36 = vrot.slane %v2396_v63, 7  ;;  %3510 = verf.f32 %v2339_v39  ;;  %v2549_v54 = vadd.f32 %v2526_v4, %v7317_v38  ;;  %v3509_v48 = vpop.eup %3508  ;;  %v6215_v39 = vld [vmem:[#allocation6 + $0x9] ss:$0 sm:$0xff] }
 0x1fc   : > { %v2144_v35 = vadd.f32 %v2120_v21, %v2076_v33  ;;  %v2433_v60 = vrot.slane %v6188_v1, 7  ;;  %3512 = verf.f32 %v2340_v19  ;;  %v2281_v25 = vsel %vm612_vm3, %v2278_v44, %v2280_v17  ;;  %v7321_v21 = vld [vmem:[#allocation24_spill] sm:$0xff]  ;;  %v7325_v33 = vld [vmem:[#allocation190_spill] sm:$0xff] }
 0x1fd   : > { %v7319_v34 = vmov %v7316_v59  ;;  %v2617_v42 = vadd.f32 %v2586_v50, %v2549_v54  ;;  %v2684_v13 = vrot.slane %v7320_v15, 1  ;;  %v2720_v11 = vmul.f32 %v3569_v28, %v5778_v29  ;;  %v6225_v50 = vld [vmem:[#allocation6 + $0xa] ss:$0 sm:$0xff] }
 0x1fe   : > { %v2616_v51 = vadd.f32 %v7319_v34, %v7318_v12  ;;  %v2185_v52 = vadd.f32 %v2173_v45, %v2144_v35  ;;  %v2434_v49 = vsel %vm1136_vm4, %v2432_v36, %v2433_v60  ;;  %v2362_v9 = vadd.f32 1.0, %v3509_v48 }
 0x1ff   : > { %v2805_v44 = vmul.f32 %v5710_v7, %v2789_v23  ;;  %v2454_v32 = vadd.f32 %v3329_v58, %v2434_v49  ;;  %v2657_v27 = vadd.f32 %v7322_v20, %v2617_v42  ;;  %v7324_v45 = vrot.slane %v7323_v57, 1  ;;  %v3330_v42 = vld [vmem:[%s3927_s27 + $0xa8] sm:$0xff] }
 0x200   : > { %v2656_v43 = vadd.f32 %v7321_v21, %v2616_v51  ;;  %v2237_v6 = vadd.f32 %v2212_v62, %v2185_v52  ;;  %v2374_v3 = vmul.f32 %v2362_v9, %v2326_v61  ;;  %v2744_v40 = vrot.slane %v2720_v11, 2  ;;  %v3572_v62 = vld [vmem:[#allocation2 + $0x1d0] sm:$0xff] }
 0x201   : > { %v2686_v47 = vsel %vm547_vm2, %v2684_v13, %v7324_v45  ;;  %v2806_v4 = vmul.f32 %v6210_v53, %v2790_v37  ;;  %3337 = vst.msk [vmem:[%s5396_s11 + $0xa0] sm:$0xff] %vm324_vm0, %v2454_v32  ;;  %v2829_v56 = vmul.f32 %v6215_v39, %v2790_v37  ;;  %v6219_v31 = vmul.f32 %v3572_v62, %v6215_v39  ;;  %v7327_v9 = vld [vmem:[#allocation48_spill] sm:$0xff] }
 0x202   : > { %v2708_v29 = vadd.f32 %v2684_v13, %v2656_v43  ;;  %v2305_v7 = vadd.f32 %v2281_v25, %v2237_v6  ;;  %v2709_v63 = vadd.f32 %v2686_v47, %v2657_v27  ;;  %v2386_v61 = vmul.f32 %v5835_v16, %v2374_v3  ;;  %v2792_v27 = vld [vmem:[#allocation2 + $0x1d8] sm:$0x1] }
 0x203   : > { %v7326_v55 = vrot.slane %v7325_v33, 2  ;;  %v2881_v1 = vmul.f32 %v6225_v50, %v2790_v37  ;;  %v2845_v36 = vrot.slane %v2829_v56, 1  ;;  %v2846_v35 = vrot.slane %v6219_v31, 1 }
 0x204   : > { %v2776_v59 = vadd.f32 %v2744_v40, %v2708_v29  ;;  %v2317_v19 = vadd.f32 %v5804_v0, %v2305_v7  ;;  %v2398_v38 = vadd.f32 %v5900_v30, %v2386_v61  ;;  %v2882_v23 = vmul.f32 %v6225_v50, %v3572_v62  ;;  %v7330_v29 = vld [vmem:[#allocation183_spill] sm:$0xff] }
 0x205   : > { %v2746_v24 = vsel %vm612_vm3, %v2744_v40, %v7326_v55  ;;  %v2905_v58 = vrot.slane %v2881_v1, 2  ;;  %v3511_v25 = vpop.eup %3510  ;;  %v2328_v12 = vmul.f32 0.5, %v2316_v5  ;;  %v2847_v48 = vsel %vm547_vm2, %v2845_v36, %v2846_v35 }
 0x206   : > { %v2777_v17 = vadd.f32 %v2746_v24, %v2709_v63  ;;  %v2817_v54 = vadd.f32 %v2805_v44, %v2776_v59  ;;  %v2341_v34 = vmul.f32 0.70710677, %v2317_v19  ;;  %v3513_v52 = vpop.eup %3512  ;;  %v2435_v15 = vrot.slane %v2398_v38, 7  ;;  %v7331_v63 = vld [vmem:[#allocation52_spill] sm:$0xff]  ;;  %v7334_v24 = vld [vmem:[#allocation189_spill] sm:$0xff] }
 0x207   : > { %v2363_v13 = vadd.f32 1.0, %v3511_v25  ;;  %v2906_v11 = vrot.slane %v2882_v23, 2  ;;  %v2364_v37 = vadd.f32 1.0, %v3513_v52  ;;  %v7328_v21 = vrot.slane %v7327_v9, 2  ;;  %v7335_v38 = vld [vmem:[#allocation185_spill] sm:$0xff] }
 0x208   : > { %v2818_v51 = vadd.f32 %v2806_v4, %v2777_v17  ;;  %v2869_v28 = vadd.f32 %v2845_v36, %v2817_v54  ;;  %3514 = verf.f32 %v2341_v34  ;;  %v7329_v5 = vrot.slane %v7313_v8, 2  ;;  %v7337_v54 = vld [vmem:[#allocation180_spill] sm:$0xff] }
 0x209   : > { %v2436_v44 = vsel %vm1136_vm4, %v2433_v60, %v2435_v15  ;;  %v2375_v32 = vmul.f32 %v2363_v13, %v6190_v18  ;;  %v2907_v6 = vsel %vm612_vm3, %v2905_v58, %v2906_v11  ;;  %v2376_v47 = vmul.f32 %v2364_v37, %v2328_v12  ;;  %v2793_v15 = vld [vmem:[#allocation2 + $0x1e0] sm:$0xff]  ;;  %v3331_v13 = vld [vmem:[%s3927_s27 + $0xb0] sm:$0xff] }
 0x20a   : > { %v2870_v49 = vadd.f32 %v2847_v48, %v2818_v51  ;;  %v2588_v43 = vsel %vm612_vm3, %v7329_v5, %v7328_v21  ;;  %v2937_v20 = vadd.f32 %v2905_v58, %v2869_v28  ;;  %v2455_v45 = vadd.f32 %v3330_v42, %v2436_v44  ;;  %v7340_v42 = vld [vmem:[#allocation179_spill] sm:$0xff]  ;;  %v7343_v21 = vld [vmem:[#allocation181_spill] sm:$0xff]  ;;  %v7345_v44 = vld [vmem:[#allocation188_spill] sm:$0xff] }
 0x20b   : > { %v2618_v40 = vadd.f32 %v2588_v43, %v7330_v29  ;;  %v2387_v4 = vmul.f32 %v5835_v16, %v2375_v32  ;;  %v2329_v7 = vmul.f32 0.5, %v2317_v19  ;;  %v7332_v56 = vrot.slane %v7331_v63, 2 }
 0x20c   : > { %v2938_v3 = vadd.f32 %v2907_v6, %v2870_v49  ;;  %v2949_v8 = vadd.f32 %v5804_v0, %v2937_v20  ;;  %v7333_v60 = vmov %v7326_v55  ;;  %3338 = vst.msk [vmem:[%s5396_s11 + $0xa8] sm:$0xff] %vm324_vm0, %v2455_v45  ;;  %v2388_v61 = vmul.f32 %v5835_v16, %v2376_v47  ;;  %v7341_v49 = vld [vmem:[#allocation186_spill] sm:$0xff]  ;;  %v2794_v47 = vld [vmem:[#allocation2 + $0x1e8] sm:$0xff] }
 0x20d   : > { %v2748_v18 = vsel %vm612_vm3, %v7333_v60, %v7332_v56  ;;  %v2658_v59 = vadd.f32 %v7334_v24, %v2618_v40  ;;  %v2883_v1 = vmul.f32 %v6225_v50, %v2792_v27  ;;  %v2399_v19 = vadd.f32 %v5900_v30, %v2387_v4  ;;  %v7347_v27 = vld [vmem:[#allocation196_spill] sm:$0xff]  ;;  %v6288_v4 = vld [vmem:[#allocation6 + $0x6] ss:$0 sm:$0xff] }
 0x20e   : > { %v2950_v55 = vadd.f32 %v5804_v0, %v2938_v3  ;;  %v2973_v17 = vmul.f32 0.70710677, %v2949_v8  ;;  %v2807_v36 = vmul.f32 %v3572_v62, %v6210_v53  ;;  %v7336_v33 = vrot.slane %v7335_v38, 1  ;;  %v7349_v24 = vld [vmem:[#allocation195_spill] sm:$0xff] }
 0x20f   : > { %v7338_v23 = vrot.slane %v7337_v54, 1  ;;  %v6266_v25 = vadd.f32 %v5900_v30, %v2388_v61  ;;  %v6268_v0 = vmul.f32 0.5, %v2949_v8  ;;  %v7339_v34 = vrot.slane %v7323_v57, 1  ;;  %v3575_v8 = vld [vmem:[#allocation2 + $0x1c8] sm:$0xff] }
 0x210   : > { %v2974_v12 = vmul.f32 0.70710677, %v2950_v55  ;;  %v2437_v48 = vrot.slane %v2399_v19, 7  ;;  %3516 = verf.f32 %v2973_v17  ;;  %v2908_v52 = vrot.slane %v2883_v1, 2 }
 0x211   : > { %v2529_v58 = vsel %vm547_vm2, %v7338_v23, %v7336_v33  ;;  %v2710_v51 = vadd.f32 %v7339_v34, %v2658_v59  ;;  %v2438_v28 = vrot.slane %v6266_v25, 7  ;;  %v7342_v9 = vrot.slane %v7341_v49, 2 }
 0x212   : > { %v2552_v62 = vadd.f32 %v2529_v58, %v7340_v42  ;;  %3518 = verf.f32 %v2974_v12  ;;  %v7344_v5 = vrot.slane %v7343_v21, 2  ;;  %v2909_v57 = vsel %vm612_vm3, %v2906_v11, %v2908_v52  ;;  %v3515_v3 = vpop.eup %3514 }
 0x213   : > { %v2778_v37 = vadd.f32 %v2748_v18, %v2710_v51  ;;  %v2687_v45 = vrot.slane %v7347_v27, 1  ;;  %v2439_v29 = vsel %vm1136_vm4, %v2437_v48, %v2438_v28  ;;  %v2723_v11 = vmul.f32 %v3575_v8, %v6288_v4  ;;  %v7348_v18 = vld [vmem:[#allocation35_spill] sm:$0xff] }
 0x214   : > { %v2591_v43 = vsel %vm612_vm3, %v7344_v5, %v7342_v9  ;;  %v7346_v32 = vmov %v7344_v5  ;;  %v2808_v63 = vmul.f32 %v6210_v53, %v2793_v15  ;;  %v2456_v56 = vadd.f32 %v3331_v13, %v2439_v29  ;;  %v6314_v13 = vld [vmem:[%s6609_s2] ss:$0 sm:$0xff]  ;;  %v3332_v29 = vld [vmem:[%s3927_s27 + $0xb8] sm:$0xff] }
 0x215   : > { %v2619_v6 = vadd.f32 %v7346_v32, %v7345_v44  ;;  %v2620_v20 = vadd.f32 %v2591_v43, %v2552_v62  ;;  %v2819_v40 = vadd.f32 %v2807_v36, %v2778_v37  ;;  %v2365_v60 = vadd.f32 1.0, %v3515_v3  ;;  %v7352_v44 = vld [vmem:[#allocation49_spill] sm:$0xff] }
 0x216   : > { %v7350_v19 = vrot.slane %v5128_v41, 1  ;;  %v2749_v36 = vrot.slane %v2723_v11, 2  ;;  %v2809_v38 = vmul.f32 %v6210_v53, %v2794_v47  ;;  %3339 = vst.msk [vmem:[%s5396_s11 + $0xb0] sm:$0xff] %vm324_vm0, %v2456_v56  ;;  %v2831_v58 = vmul.f32 %v6215_v39, %v2794_v47 }
 0x217   : > { %v2659_v61 = vadd.f32 %v7348_v18, %v2619_v6  ;;  %v2660_v59 = vadd.f32 %v7349_v24, %v2620_v20  ;;  %v2871_v1 = vadd.f32 %v2846_v35, %v2819_v40  ;;  %v2377_v33 = vmul.f32 %v2365_v60, %v2329_v7  ;;  %v3576_v35 = vld [vmem:[#allocation2 + $0x1f0] sm:$0xff] }
 0x218   : > { %v2689_v17 = vsel %vm547_vm2, %v2687_v45, %v7350_v19  ;;  %v7351_v34 = vrot.slane %v5131_v10, 2  ;;  %v6307_v51 = vmul.f32 %v3576_v35, %v6215_v39  ;;  %v2884_v48 = vmul.f32 %v6225_v50, %v2794_v47  ;;  %v2796_v19 = vld [vmem:[#allocation2 + $0x1f8] sm:$0x1] }
 0x219   : > { %v2711_v54 = vadd.f32 %v2687_v45, %v2659_v61  ;;  %v2712_v23 = vadd.f32 %v2689_v17, %v2660_v59  ;;  %v2939_v12 = vadd.f32 %v2909_v57, %v2871_v1  ;;  %v2389_v52 = vmul.f32 %v5835_v16, %v2377_v33  ;;  %v7356_v33 = vld [vmem:[#allocation199_spill] sm:$0xff] }
 0x21a   : > { %v2751_v31 = vsel %vm612_vm3, %v2749_v36, %v7351_v34  ;;  %v2848_v7 = vrot.slane %v2831_v58, 1  ;;  %v2962_v15 = vmul.f32 0.5, %v2950_v55  ;;  %v2849_v9 = vrot.slane %v6307_v51, 1  ;;  %v3517_v5 = vpop.eup %3516  ;;  %v7357_v58 = vld [vmem:[#allocation53_spill] sm:$0xff] }
 0x21b   : > { %v2779_v42 = vadd.f32 %v2749_v36, %v2711_v54  ;;  %v2780_v62 = vadd.f32 %v2751_v31, %v2712_v23  ;;  %v2951_v37 = vadd.f32 %v6314_v13, %v2939_v12  ;;  %v2885_v21 = vmul.f32 %v3576_v35, %v6225_v50  ;;  %v6337_v36 = vld [vmem:[%s6610_s3] ss:$0 sm:$0xff] }
 0x21c   : > { %v2401_v43 = vadd.f32 %v5900_v30, %v2389_v52  ;;  %v7353_v32 = vrot.slane %v7352_v44, 2  ;;  %v7354_v55 = vrot.slane %v7341_v49, 2  ;;  %v3519_v20 = vpop.eup %3518  ;;  %v2997_v27 = vadd.f32 1.0, %v3517_v5  ;;  %v7355_v49 = vld [vmem:[#allocation194_spill] sm:$0xff] }
 0x21d   : > { %v2820_v16 = vadd.f32 %v2808_v63, %v2779_v42  ;;  %v2821_v57 = vadd.f32 %v2809_v38, %v2780_v62  ;;  %v2975_v45 = vmul.f32 0.70710677, %v2951_v37  ;;  %v2850_v47 = vsel %vm547_vm2, %v2848_v7, %v2849_v9 }
 0x21e   : > { %v2593_v6 = vsel %vm612_vm3, %v7354_v55, %v7353_v32  ;;  %v2910_v3 = vrot.slane %v2884_v48, 2  ;;  %v2440_v40 = vrot.slane %v2401_v43, 7  ;;  %v2998_v8 = vadd.f32 1.0, %v3519_v20  ;;  %v7363_v32 = vld [vmem:[#allocation191_spill] sm:$0xff] }
 0x21f   : > { %v2872_v11 = vadd.f32 %v2848_v7, %v2820_v16  ;;  %v2873_v63 = vadd.f32 %v2850_v47, %v2821_v57  ;;  %v3009_v56 = vmul.f32 %v2997_v27, %v6268_v0  ;;  %3520 = verf.f32 %v2975_v45  ;;  %v7364_v47 = vld [vmem:[#allocation197_spill] sm:$0xff] }
 0x220   : > { %v2911_v60 = vrot.slane %v2885_v21, 2  ;;  %v2621_v18 = vadd.f32 %v2593_v6, %v7355_v49  ;;  %v2441_v61 = vsel %vm1136_vm4, %v2438_v28, %v2440_v40  ;;  %v3010_v24 = vmul.f32 %v2998_v8, %v2962_v15  ;;  %v7361_v15 = vld [vmem:[#allocation192_spill] sm:$0xff]  ;;  %v3341_v6 = vld [vmem:[%s3927_s27 + $0xc0] sm:$0xff] }
 0x221   : > { %v2963_v59 = vmul.f32 0.5, %v2951_v37  ;;  %v2940_v1 = vadd.f32 %v2910_v3, %v2872_v11  ;;  %v2457_v17 = vadd.f32 %v3332_v29, %v2441_v61  ;;  %v3021_v0 = vmul.f32 %v6337_v36, %v3009_v56  ;;  %v7366_v29 = vld [vmem:[#allocation193_spill] sm:$0xff]  ;;  %v7368_v8 = vld [vmem:[#allocation198_spill] sm:$0xff]  ;;  %v2798_v61 = vld [vmem:[#allocation2 + $0x208] sm:$0xff] }
 0x222   : > { %v2912_v38 = vsel %vm612_vm3, %v2910_v3, %v2911_v60  ;;  %v2661_v54 = vadd.f32 %v7356_v33, %v2621_v18  ;;  %v3022_v25 = vmul.f32 %v6337_v36, %v3010_v24  ;;  %v7358_v12 = vrot.slane %v7357_v58, 2  ;;  %v2797_v56 = vld [vmem:[#allocation2 + $0x200] sm:$0xff] }
 0x223   : > { %v2941_v23 = vadd.f32 %v2912_v38, %v2873_v63  ;;  %v2952_v28 = vadd.f32 %v6314_v13, %v2940_v1  ;;  %3340 = vst.msk [vmem:[%s5396_s11 + $0xb8] sm:$0xff] %vm324_vm0, %v2457_v17  ;;  %v3033_v48 = vadd.f32 %v5900_v30, %v3021_v0  ;;  %v7359_v52 = vrot.slane %v5128_v41, 1  ;;  %v7370_v17 = vld [vmem:[#allocation36_spill] sm:$0xff] }
 0x224   : > { %v2753_v31 = vsel %vm612_vm3, %v7351_v34, %v7358_v12  ;;  %v2886_v62 = vmul.f32 %v6225_v50, %v2796_v19  ;;  %v7360_v7 = vrot.slane %v5123_v22, 1  ;;  %v7362_v37 = vrot.slane %v7361_v15, 1  ;;  %v3579_v38 = vld [vmem:[#allocation2 + $0x1e8] sm:$0xff] }
 0x225   : > { %v2713_v42 = vadd.f32 %v7359_v52, %v2661_v54  ;;  %v6361_v5 = vadd.f32 %v5900_v30, %v3022_v25  ;;  %v2953_v10 = vadd.f32 %v6314_v13, %v2941_v23  ;;  %v2976_v43 = vmul.f32 0.70710677, %v2952_v28  ;;  %v7371_v23 = vld [vmem:[#allocation207_spill] sm:$0xff] }
 0x226   : > { %v2532_v21 = vsel %vm547_vm2, %v7362_v37, %v7360_v7  ;;  %v2810_v16 = vmul.f32 %v3576_v35, %v6210_v53  ;;  %v3065_v57 = vrot.slane %v3033_v48, 7  ;;  %v2913_v41 = vrot.slane %v2886_v62, 2  ;;  %v7373_v7 = vld [vmem:[#allocation208_spill] sm:$0xff] }
 0x227   : > { %v2781_v44 = vadd.f32 %v2753_v31, %v2713_v42  ;;  %v2555_v55 = vadd.f32 %v2532_v21, %v7363_v32  ;;  %v3066_v22 = vrot.slane %v6361_v5, 7  ;;  %v2964_v20 = vmul.f32 0.5, %v2952_v28  ;;  %v3580_v42 = vld [vmem:[#allocation2 + $0x210] sm:$0xff] }
 0x228   : > { %v2977_v27 = vmul.f32 0.70710677, %v2953_v10  ;;  %3522 = verf.f32 %v2976_v43  ;;  %v2914_v30 = vsel %vm612_vm3, %v2911_v60, %v2913_v41  ;;  %v7365_v3 = vrot.slane %v7364_v47, 2  ;;  %v7382_v5 = vld [vmem:[#allocation209_spill] sm:$0xff] }
 0x229   : > { %v2822_v45 = vadd.f32 %v2810_v16, %v2781_v44  ;;  %v7367_v40 = vrot.slane %v7366_v29, 2  ;;  %v3067_v49 = vsel %vm1136_vm4, %v3065_v57, %v3066_v22  ;;  %v2690_v60 = vrot.slane %v5159_v14, 1  ;;  %v3521_v24 = vpop.eup %3520 }
 0x22a   : > { %3524 = verf.f32 %v2977_v27  ;;  %v3093_v1 = vadd.f32 %v3341_v6, %v3067_v49  ;;  %v2726_v33 = vmul.f32 %v3579_v38, %v6288_v4  ;;  %v2999_v54 = vadd.f32 1.0, %v3521_v24 }
 0x22b   : > { %v2596_v35 = vsel %vm612_vm3, %v7367_v40, %v7365_v3  ;;  %v7369_v11 = vmov %v7367_v40  ;;  %v2874_v19 = vadd.f32 %v2849_v9, %v2822_v45  ;;  %v7372_v28 = vrot.slane %v7371_v23, 1  ;;  %v6408_v45 = vld [vmem:[%s6611_s4] ss:$0 sm:$0xff] }
 0x22c   : > { %v2622_v63 = vadd.f32 %v7369_v11, %v7368_v8  ;;  %v2623_v18 = vadd.f32 %v2596_v35, %v2555_v55  ;;  %v2811_v14 = vmul.f32 %v6210_v53, %v2797_v56  ;;  %3349 = vst.msk [vmem:[%s5396_s11 + $0xc0] sm:$0xff] %vm324_vm0, %v3093_v1  ;;  %v2754_v51 = vrot.slane %v2726_v33, 2  ;;  %v2800_v33 = vld [vmem:[#allocation2 + $0x218] sm:$0x1] }
 0x22d   : > { %v2692_v58 = vsel %vm547_vm2, %v2690_v60, %v7372_v28  ;;  %v2942_v12 = vadd.f32 %v2914_v30, %v2874_v19  ;;  %v2812_v9 = vmul.f32 %v6210_v53, %v2798_v61  ;;  %v3011_v31 = vmul.f32 %v2999_v54, %v2963_v59  ;;  %v7378_v28 = vld [vmem:[#allocation203_spill] sm:$0xff] }
 0x22e   : > { %v2662_v0 = vadd.f32 %v7370_v17, %v2622_v63  ;;  %v2663_v25 = vadd.f32 %v5155_v2, %v2623_v18  ;;  %v2833_v52 = vmul.f32 %v6215_v39, %v2798_v61  ;;  %v6395_v2 = vmul.f32 %v3580_v42, %v6215_v39  ;;  %v3342_v63 = vld [vmem:[%s3927_s27 + $0xc8] sm:$0xff] }
 0x22f   : > { %v2954_v62 = vadd.f32 %v6314_v13, %v2942_v12  ;;  %v7374_v15 = vrot.slane %v7373_v7, 2  ;;  %v2887_v43 = vmul.f32 %v6225_v50, %v2798_v61  ;;  %v3023_v16 = vmul.f32 %v6337_v36, %v3011_v31 }
 0x230   : > { %v2714_v34 = vadd.f32 %v2690_v60, %v2662_v0  ;;  %v2715_v48 = vadd.f32 %v2692_v58, %v2663_v25  ;;  %v2851_v59 = vrot.slane %v2833_v52, 1  ;;  %v2852_v44 = vrot.slane %v6395_v2, 1  ;;  %v7375_v60 = vld [vmem:[#allocation50_spill] sm:$0xff] }
 0x231   : > { %v2756_v37 = vsel %vm612_vm3, %v2754_v51, %v7374_v15  ;;  %v2965_v41 = vmul.f32 0.5, %v2953_v10  ;;  %v2978_v32 = vmul.f32 0.70710677, %v2954_v62  ;;  %v2888_v6 = vmul.f32 %v3580_v42, %v6225_v50 }
 0x232   : > { %v2782_v21 = vadd.f32 %v2754_v51, %v2714_v34  ;;  %v2783_v57 = vadd.f32 %v2756_v37, %v2715_v48  ;;  %v3523_v27 = vpop.eup %3522  ;;  %v3035_v30 = vadd.f32 %v6408_v45, %v3023_v16  ;;  %v2853_v29 = vsel %vm547_vm2, %v2851_v59, %v2852_v44  ;;  %v7385_v37 = vld [vmem:[#allocation200_spill] sm:$0xff] }
 0x233   : > { %v2915_v40 = vrot.slane %v2887_v43, 2  ;;  %v3000_v35 = vadd.f32 1.0, %v3523_v27  ;;  %3526 = verf.f32 %v2978_v32  ;;  %v2916_v8 = vrot.slane %v2888_v6, 2 }
 0x234   : > { %v2823_v55 = vadd.f32 %v2811_v14, %v2782_v21  ;;  %v2824_v3 = vadd.f32 %v2812_v9, %v2783_v57  ;;  %v3525_v11 = vpop.eup %3524  ;;  %v3068_v56 = vrot.slane %v3035_v30, 7  ;;  %v2966_v49 = vmul.f32 0.5, %v2954_v62  ;;  %v7379_v14 = vld [vmem:[#allocation54_spill] sm:$0xff]  ;;  %v7383_v62 = vld [vmem:[#allocation204_spill] sm:$0xff] }
 0x235   : > { %v7376_v61 = vrot.slane %v7375_v60, 2  ;;  %v7377_v24 = vrot.slane %v7364_v47, 2  ;;  %v3001_v19 = vadd.f32 1.0, %v3525_v11  ;;  %v3012_v17 = vmul.f32 %v3000_v35, %v2964_v20  ;;  %v2801_v35 = vld [vmem:[#allocation2 + $0x220] sm:$0xff] }
 0x236   : > { %v2875_v10 = vadd.f32 %v2851_v59, %v2823_v55  ;;  %v2876_v18 = vadd.f32 %v2853_v29, %v2824_v3  ;;  %v2917_v0 = vsel %vm612_vm3, %v2915_v40, %v2916_v8  ;;  %v3069_v54 = vsel %vm1136_vm4, %v3066_v22, %v3068_v56  ;;  %v7388_v29 = vld [vmem:[#allocation201_spill] sm:$0xff]  ;;  %v7391_v56 = vld [vmem:[#allocation202_spill] sm:$0xff] }
 0x237   : > { %v2598_v1 = vsel %vm612_vm3, %v7377_v24, %v7376_v61  ;;  %v7380_v12 = vrot.slane %v7379_v14, 2  ;;  %v7381_v47 = vmov %v7374_v15  ;;  %v3094_v51 = vadd.f32 %v3342_v63, %v3069_v54  ;;  %v3343_v61 = vld [vmem:[%s3927_s27 + $0xd0] sm:$0xff] }
 0x238   : > { %v2943_v38 = vadd.f32 %v2915_v40, %v2875_v10  ;;  %v2944_v25 = vadd.f32 %v2917_v0, %v2876_v18  ;;  %v2624_v58 = vadd.f32 %v2598_v1, %v7378_v28  ;;  %v3013_v20 = vmul.f32 %v3001_v19, %v2965_v41  ;;  %v7393_v1 = vld [vmem:[#allocation206_spill] sm:$0xff] }
 0x239   : > { %v2758_v34 = vsel %vm612_vm3, %v7381_v47, %v7380_v12  ;;  %v3024_v9 = vmul.f32 %v6337_v36, %v3012_v17  ;;  %v2889_v22 = vmul.f32 %v6225_v50, %v2800_v33  ;;  %v7384_v15 = vrot.slane %v7383_v62, 1  ;;  %3350 = vst.msk [vmem:[%s5396_s11 + $0xc8] sm:$0xff] %vm324_vm0, %v3094_v51  ;;  %v6467_v12 = vld [vmem:[#allocation2 + $0x230] sm:$0xff] }
 0x23a   : > { %v2955_v31 = vadd.f32 %v6314_v13, %v2943_v38  ;;  %v2956_v48 = vadd.f32 %v6314_v13, %v2944_v25  ;;  %v2664_v52 = vadd.f32 %v7382_v5, %v2624_v58  ;;  %v7386_v21 = vrot.slane %v7385_v37, 1  ;;  %v7395_v38 = vld [vmem:[#allocation211_spill] sm:$0xff] }
 0x23b   : > { %v3025_v43 = vmul.f32 %v6337_v36, %v3013_v20  ;;  %v3036_v16 = vadd.f32 %v6408_v45, %v3024_v9  ;;  %v2813_v59 = vmul.f32 %v3580_v42, %v6210_v53  ;;  %v7387_v55 = vrot.slane %v7371_v23, 1  ;;  %v7389_v42 = vld [vmem:[#allocation205_spill] sm:$0xff]  ;;  %v2802_v58 = vld [vmem:[#allocation2 + $0x228] sm:$0xff]  ;;  %v7397_v20 = vld [vmem:[#allocation210_spill] sm:$0xff] }
 0x23c   : > { %v2535_v7 = vsel %vm547_vm2, %v7386_v21, %v7384_v15  ;;  %v2979_v57 = vmul.f32 0.70710677, %v2955_v31  ;;  %v6445_v41 = vmul.f32 0.5, %v2955_v31  ;;  %v2980_v32 = vmul.f32 0.70710677, %v2956_v48  ;;  %v7398_v31 = vld [vmem:[#allocation212_spill] sm:$0xff] }
 0x23d   : > { %v2716_v6 = vadd.f32 %v7387_v55, %v2664_v52  ;;  %v2918_v27 = vrot.slane %v2889_v22, 2  ;;  %v6450_v30 = vadd.f32 %v6408_v45, %v3025_v43  ;;  %v3070_v3 = vrot.slane %v3036_v16, 7  ;;  %v3527_v60 = vpop.eup %3526 }
 0x23e   : > { %3528 = verf.f32 %v2979_v57  ;;  %v2558_v40 = vadd.f32 %v2535_v7, %v7388_v29  ;;  %v7390_v63 = vrot.slane %v7389_v42, 2  ;;  %v7392_v18 = vrot.slane %v7391_v56, 2 }
 0x23f   : > { %3530 = verf.f32 %v2980_v32  ;;  %v2784_v10 = vadd.f32 %v2758_v34, %v2716_v6  ;;  %v2919_v11 = vsel %vm612_vm3, %v2916_v8, %v2918_v27  ;;  %v3071_v24 = vrot.slane %v6450_v30, 7  ;;  %v3582_v8 = vld [vmem:[#allocation2 + $0x208] sm:$0xff]  ;;  %v7396_v34 = vld [vmem:[#allocation41_spill] sm:$0xff] }
 0x240   : > { %v2601_v23 = vsel %vm612_vm3, %v7392_v18, %v7390_v63  ;;  %v7394_v19 = vmov %v7392_v18  ;;  %v2693_v33 = vrot.slane %v7395_v38, 1  ;;  %v3002_v54 = vadd.f32 1.0, %v3527_v60  ;;  %v3344_v63 = vld [vmem:[%s3927_s27 + $0xd8] sm:$0xff]  ;;  %v7400_v60 = vld [vmem:[#allocation51_spill] sm:$0xff] }
 0x241   : > { %v2625_v17 = vadd.f32 %v7394_v19, %v7393_v1  ;;  %v2626_v0 = vadd.f32 %v2601_v23, %v2558_v40  ;;  %v2825_v25 = vadd.f32 %v2813_v59, %v2784_v10  ;;  %v2729_v28 = vmul.f32 %v3582_v8, %v6288_v4  ;;  %v2804_v8 = vld [vmem:[#allocation2 + $0x238] sm:$0x1] }
 0x242   : > { %v2814_v14 = vmul.f32 %v6210_v53, %v2801_v35  ;;  %v3072_v47 = vsel %vm1136_vm4, %v3070_v3, %v3071_v24  ;;  %v7399_v5 = vrot.slane %v7398_v31, 1  ;;  %v3014_v62 = vmul.f32 %v3002_v54, %v2966_v49 }
 0x243   : > { %v2665_v51 = vadd.f32 %v7396_v34, %v2625_v17  ;;  %v2666_v9 = vadd.f32 %v7397_v20, %v2626_v0  ;;  %v3095_v22 = vadd.f32 %v3343_v61, %v3072_v47  ;;  %v2877_v4 = vadd.f32 %v2852_v44, %v2825_v25 }
 0x244   : > { %v2695_v52 = vsel %vm547_vm2, %v2693_v33, %v7399_v5  ;;  %v2759_v15 = vrot.slane %v2729_v28, 2  ;;  %v2815_v7 = vmul.f32 %v6210_v53, %v2802_v58  ;;  %v2835_v43 = vmul.f32 %v6215_v39, %v2802_v58 }
 0x245   : > { %v2717_v37 = vadd.f32 %v2693_v33, %v2665_v51  ;;  %v2718_v21 = vadd.f32 %v2695_v52, %v2666_v9  ;;  %3351 = vst.msk [vmem:[%s5396_s11 + $0xd0] sm:$0xff] %vm324_vm0, %v3095_v22  ;;  %v3026_v16 = vmul.f32 %v6337_v36, %v3014_v62  ;;  %v2945_v57 = vadd.f32 %v2919_v11, %v2877_v4  ;;  %v7403_v51 = vld [vmem:[#allocation213_spill] sm:$0xff]  ;;  %v7404_v22 = vld [vmem:[#allocation214_spill] sm:$0xff] }
 0x246   : > { %v2761_v59 = vsel %vm612_vm3, %v2759_v15, %v2760_v46  ;;  %v6487_v2 = vmul.f32 %v6215_v39, %v6467_v12  ;;  %v2854_v32 = vrot.slane %v2835_v43, 1  ;;  %v2890_v55 = vmul.f32 %v6225_v50, %v2802_v58 }
 0x247   : > { %v2785_v44 = vadd.f32 %v2759_v15, %v2717_v37  ;;  %v2786_v49 = vadd.f32 %v2761_v59, %v2718_v21  ;;  %v3038_v6 = vadd.f32 %v6408_v45, %v3026_v16  ;;  %v2957_v27 = vadd.f32 %v6314_v13, %v2945_v57  ;;  %v7405_v37 = vld [vmem:[#allocation55_spill] sm:$0xff] }
 0x248   : > { %v2855_v30 = vrot.slane %v6487_v2, 1  ;;  %v2891_v3 = vmul.f32 %v6225_v50, %v6467_v12  ;;  %v3529_v29 = vpop.eup %3528  ;;  %v2968_v40 = vmul.f32 0.5, %v2956_v48  ;;  %v2920_v39 = vrot.slane %v2890_v55, 2  ;;  %v3345_v2 = vld [vmem:[%s3927_s27 + $0xe0] sm:$0xff] }
 0x249   : > { %v2826_v35 = vadd.f32 %v2814_v14, %v2785_v44  ;;  %v2827_v10 = vadd.f32 %v2815_v7, %v2786_v49  ;;  %v3531_v11 = vpop.eup %3530  ;;  %v3073_v56 = vrot.slane %v3038_v6, 7  ;;  %v3003_v18 = vadd.f32 1.0, %v3529_v29 }
 0x24a   : > { %v2981_v23 = vmul.f32 0.70710677, %v2957_v27  ;;  %v7401_v61 = vrot.slane %v7400_v60, 2  ;;  %v7402_v1 = vrot.slane %v7389_v42, 2  ;;  %v3004_v17 = vadd.f32 1.0, %v3531_v11 }
 0x24b   : > { %v2856_v0 = vsel %vm547_vm2, %v2854_v32, %v2855_v30  ;;  %v2878_v38 = vadd.f32 %v2854_v32, %v2826_v35  ;;  %v2921_v48 = vrot.slane %v2891_v3, 2  ;;  %v3074_v33 = vsel %vm1136_vm4, %v3071_v24, %v3073_v56 }
 0x24c   : > { %v2603_v19 = vsel %vm612_vm3, %v7402_v1, %v7401_v61  ;;  %v3015_v54 = vmul.f32 %v3003_v18, %v6445_v41  ;;  %3532 = verf.f32 %v2981_v23  ;;  %v2879_v25 = vadd.f32 %v2856_v0, %v2827_v10  ;;  %v3346_v23 = vld [vmem:[%s3927_s27 + $0xe8] sm:$0xff] }
 0x24d   : > { %v3096_v28 = vadd.f32 %v3344_v63, %v3074_v33  ;;  %v3016_v58 = vmul.f32 %v3004_v17, %v2968_v40  ;;  %v2922_v14 = vsel %vm612_vm3, %v2920_v39, %v2921_v48  ;;  %v2946_v42 = vadd.f32 %v2920_v39, %v2878_v38 }
 0x24e   : > { %v3027_v47 = vmul.f32 %v6337_v36, %v3015_v54  ;;  %v2947_v34 = vadd.f32 %v2922_v14, %v2879_v25  ;;  %v2627_v20 = vadd.f32 %v2603_v19, %v7403_v51  ;;  %v2892_v9 = vmul.f32 %v6225_v50, %v2804_v8  ;;  %v3347_v25 = vld [vmem:[%s3927_s27 + $0xf0] sm:$0xff] }
 0x24f   : > { %3352 = vst.msk [vmem:[%s5396_s11 + $0xd8] sm:$0xff] %vm324_vm0, %v3096_v28  ;;  %v3028_v24 = vmul.f32 %v6337_v36, %v3016_v58  ;;  %v2958_v41 = vadd.f32 %v6314_v13, %v2946_v42  ;;  %v7406_v21 = vrot.slane %v7405_v37, 2  ;;  %v7407_v57 = vrot.slane %v7398_v31, 1 }
 0x250   : > { %v3039_v5 = vadd.f32 %v6408_v45, %v3027_v47  ;;  %v2959_v52 = vadd.f32 %v6314_v13, %v2947_v34  ;;  %v2667_v62 = vadd.f32 %v7404_v22, %v2627_v20  ;;  %v2816_v59 = vmul.f32 %v6210_v53, %v6467_v12 }
 0x251   : > { %v3040_v4 = vadd.f32 %v6408_v45, %v3028_v24  ;;  %v2982_v15 = vmul.f32 0.70710677, %v2958_v41  ;;  %v2763_v7 = vsel %vm612_vm3, %v2760_v46, %v7406_v21  ;;  %v2923_v49 = vrot.slane %v2892_v9, 2  ;;  %v3348_v24 = vld [vmem:[%s3927_s27 + $0xf8] sm:$0xff]  ;;  %s3736_s27 = smov [#allocation8]  }
 0x252   : > { %v3075_v43 = vrot.slane %v3039_v5, 7  ;;  %v2983_v16 = vmul.f32 0.70710677, %v2959_v52  ;;  %v2719_v50 = vadd.f32 %v7407_v57, %v2667_v62  ;;  %v2969_v3 = vmul.f32 0.5, %v2957_v27  ;;  %s3645_s26 = sshll.u32 %s3736_s27, 4  ;;  %s3646_s26 = int_to_ptr.vmem [resolvable:$false] %s3645_s26 }
 0x253   : > { %v3076_v44 = vrot.slane %v3040_v4, 7  ;;  %3534 = verf.f32 %v2982_v15  ;;  %v2924_v31 = vsel %vm612_vm3, %v2921_v48, %v2923_v49  ;;  %v2970_v56 = vmul.f32 0.5, %v2958_v41  ;;  %s3647_s28 = scalar_lea.vmem %s3646_s26, 8192  ;;  %p3648_p12 = scmp.lt.s32.totalorder %s6556_s16, %s3646_s26 }
 0x254   : > { %3536 = verf.f32 %v2983_v16  ;;  %v2787_v32 = vadd.f32 %v2763_v7, %v2719_v50  ;;  %v2971_v61 = vmul.f32 0.5, %v2959_v52  ;;  %p3649_p11 = scmp.lt.s32.totalorder %s3647_s28, %s3641_s21 }
 0x255   : > { %v3077_v55 = vsel %vm1136_vm4, %v3075_v43, %v3076_v44 }
 0x256   : > { %v3533_v26 = vpop.eup %3532  ;;  %v3097_v6 = vadd.f32 %v3345_v2, %v3077_v55  ;;  %v2828_v46 = vadd.f32 %v2816_v59, %v2787_v32  ;;  %p3650_p0 = por %p3649_p11, %p3648_p12 }
 0x257   : > { %v3005_v29 = vadd.f32 1.0, %v3533_v26 }
 0x258   : > { %3353 = vst.msk [vmem:[%s5396_s11 + $0xe0] sm:$0xff] %vm324_vm0, %v3097_v6  ;;  %v2880_v40 = vadd.f32 %v2855_v30, %v2828_v46  ;;  %p3651_p5 = pnand %p3650_p0, %p3644_p8 }
 0x259   : > { %v3017_v53 = vmul.f32 %v3005_v29, %v2969_v3 }
 0x25a   : > { %v2948_v12 = vadd.f32 %v2924_v31, %v2880_v40 }
 0x25b   : > { %v3029_v35 = vmul.f32 %v6337_v36, %v3017_v53 }
 0x25c   : > { %v2960_v10 = vadd.f32 %v6314_v13, %v2948_v12 }
 0x25d   : > { %v3535_v39 = vpop.eup %3534  ;;  %v3041_v11 = vadd.f32 %v6408_v45, %v3029_v35 }
 0x25e   : > { %v3537_v63 = vpop.eup %3536  ;;  %v3006_v18 = vadd.f32 1.0, %v3535_v39  ;;  %v2984_v27 = vmul.f32 0.70710677, %v2960_v10  ;;  %v2972_v42 = vmul.f32 0.5, %v2960_v10 }
 0x25f   : > { %v3078_v60 = vrot.slane %v3041_v11, 7  ;;  %v3007_v1 = vadd.f32 1.0, %v3537_v63 }
 0x260   : > { %v3018_v30 = vmul.f32 %v3006_v18, %v2970_v56  ;;  %3538 = verf.f32 %v2984_v27 }
 0x261   : > { %v3079_v19 = vsel %vm1136_vm4, %v3076_v44, %v3078_v60  ;;  %v3019_v17 = vmul.f32 %v3007_v1, %v2971_v61 }
 0x262   : > { %v3098_v13 = vadd.f32 %v3346_v23, %v3079_v19  ;;  %v3030_v0 = vmul.f32 %v6337_v36, %v3018_v30 }
 0x263   : > { %v3031_v38 = vmul.f32 %v6337_v36, %v3019_v17 }
 0x264   : > { %3354 = vst.msk [vmem:[%s5396_s11 + $0xe8] sm:$0xff] %vm324_vm0, %v3098_v13  ;;  %v3042_v48 = vadd.f32 %v6408_v45, %v3030_v0 }
 0x265   : > { %v3043_v33 = vadd.f32 %v6408_v45, %v3031_v38 }
 0x266   : > { %v3080_v54 = vrot.slane %v3042_v48, 7 }
 0x267   : > { %v3081_v8 = vrot.slane %v3043_v33, 7 }
 0x269   : > { %v3082_v28 = vsel %vm1136_vm4, %v3080_v54, %v3081_v8 }
 0x26a   : > { %v3539_v58 = vpop.eup %3538  ;;  %v3099_v14 = vadd.f32 %v3347_v25, %v3082_v28 }
 0x26b   : > { %v3008_v47 = vadd.f32 1.0, %v3539_v58 }
 0x26c   : > { %3355 = vst.msk [vmem:[%s5396_s11 + $0xf0] sm:$0xff] %vm324_vm0, %v3099_v14 }
 0x26d   : > { %v3020_v34 = vmul.f32 %v3008_v47, %v2972_v42 }
 0x26f   : > { %v3032_v51 = vmul.f32 %v6337_v36, %v3020_v34 }
 0x271   : > { %v3044_v20 = vadd.f32 %v6408_v45, %v3032_v51 }
 0x273   : > { %v3083_v41 = vrot.slane %v3044_v20, 7 }
 0x275   : > { %v3084_v9 = vsel %vm1136_vm4, %v3081_v8, %v3083_v41 }
 0x276   : > { %v3100_v5 = vadd.f32 %v3348_v24, %v3084_v9 }
 0x278   : > { %3356 = vst.msk [vmem:[%s5396_s11 + $0xf8] sm:$0xff] %vm324_vm0, %v3100_v5 }
 0x279   : > { %3654 = shalt.err (!%p3651_p5)
}
 0x27a   : > { %s3655_s11 = scalar_lea.hbm %s6554_s24, 4096  ;;  %s3659_s6 = scalar_lea.hbm %s6612_s5, 8192 }
 0x27b   : > { %p3656_p9 = scmp.ne.s32.totalorder %s6554_s24, %s3655_s11  ;;  %p3660_p3 = scmp.lt.u32.totalorder %s6554_s24, %s6612_s5 }
 0x27c   : > { %p3661_p7 = scmp.lt.u32.totalorder %s3659_s6, %s3655_s11  ;;  %p3663_p4 = scmp.lt.u32.totalorder %s3655_s11, %s6554_s24 }
 0x27d   : > { %p3657_p1 = pnand %p3656_p9, %p3865_p10 }
 0x27e   : > { %p3662_p13 = por %p3661_p7, %p3660_p3 }
 0x27f   : > { %p3658_p2 = pneg %p3657_p1 }
 0x280   : > { %p3664_p6 = por %p3663_p4, %p3662_p13 }
 0x282   : > { %p3665_p8 = pnand %p3664_p6, %p3658_p2 }
 0x284   : > { %3668 = shalt.err (!%p3665_p8)
}
 0x285   : > { %s3737_s8 = smov 128   ;;  %s3738_s12 = smov 8  }
 0x286   : > { %3370 = dma.vmem_to_hbm [thread:$0]  (%p3865_p10), %s6556_s16, 4096, %s6554_s24, %s3111_s7, %s3737_s8, %s3737_s8, %s3738_s12  }
 0x287 PF: > { %s3140_s21 = sand.u32 1, %s3707_s18   ;;  %p7408_p12 = scmp.ne.s32.totalorder %s6797_s29, 0 }
 0x288   : > { %p7409_p11 = scmp.ge.s32.totalorder %s3727_s23, 2  ;;  %s3141_s27 = scalar_lea.sflag [#allocation5], %s3140_s21 }
 0x28a   : > { %p3381_p0 = pnand %p7409_p11, %p7408_p12 }
 0x28c   : > { %3702 = dma.done.wait (!%p3381_p0), %s3141_s27, 4096  }
 0x28d   : > { %3704 = vsyncadd (!%p3381_p0), %s3141_s27, 4294963200  ;;  %s22_s23 = sadd.s32 1, %s3727_s23   ;;  %s7410_s18 = smov %s3711_s19 }
 0x28e   : > { %p19_p5 = scmp.ge.s32.totalorder %s22_s23, 4   ;;  %s7411_s19 = smov %s3715_s20 }
 0x28f   : > { %s7412_s20 = smov %s3874_s15  ;;  %s7413_s21 = smov %s3723_s22 }
 0x290   : > { %s7414_s22 = smov %s7416_s9  ;;  %21 = sbr.rel (!%p19_p5) target bundleno = 7 (0x7), region = 118 }
 0x297   :  { %3146 = vsyncpa [#allocation4], 1 }
 0x298   :  { %3148 = vsyncpa [#allocation4 + $0x1], 1 }
 0x299   :  { %3149 = vsyncpa [#allocation7], 1 }
 0x29a   :  { %3150 = vsyncpa [#allocation5], 1 }
 0x29b   :  { %3152 = vsyncpa [#allocation5 + $0x1], 1 }

</bundles_post_ra>
